<compile_context>
chip_gen: v5e
topology: v5e:2x2
jax: 0.10.0
libtpu: 0.0.40
codegen_flags: <defaults>
</compile_context>

<pallas_src>
import functools

import jax
import jax.numpy as jnp
from jax.experimental import pallas as pl
from jax.experimental.pallas import tpu as pltpu


def _round_up(x, m):
    return (x + m - 1) // m * m


def dueling_q_kernel(
    x_ref,
    w1_ref, b1_ref,
    w2_ref, b2_ref,
    wva1_ref, bva1_ref,
    wheads_ref, bheads_ref,
    q_ref,
    *, n_actions,
):
    # fc1 + relu; dropout1 == identity (eval mode).
    x = x_ref[...]                                               # bf16 (bt, d_in)
    h1 = jnp.dot(x, w1_ref[...], preferred_element_type=jnp.float32) + b1_ref[...]
    h1 = jnp.maximum(h1, 0.0)                                    # (bt, 1024)

    # fc2 + relu; dropout2 == identity.
    h2 = jnp.dot(h1.astype(jnp.bfloat16), w2_ref[...],
                 preferred_element_type=jnp.float32) + b2_ref[...]
    h2 = jnp.maximum(h2, 0.0)                                    # (bt, 512)

    # fused fc_value / fc_advantage hidden layers: one (bt,512)x(512,768) matmul.
    hva = jnp.dot(h2.astype(jnp.bfloat16), wva1_ref[...],
                  preferred_element_type=jnp.float32) + bva1_ref[...]
    hva = jnp.maximum(hva, 0.0)                                  # (bt, 768)

    # fused, lane-dense output heads (block-diagonal (768, 128) weight):
    #   cols 0..n_actions-1 -> advantage, col n_actions -> value, rest exact 0.
    heads = jnp.dot(hva.astype(jnp.bfloat16), wheads_ref[...],
                    preferred_element_type=jnp.float32) + bheads_ref[...]  # (bt,128)

    val = heads[:, n_actions:n_actions + 1]                      # (bt, 1)
    # pad columns are exact zeros, so sum(heads) = adv_sum + val.
    adv_mean = (jnp.sum(heads, axis=-1, keepdims=True) - val) * (1.0 / n_actions)

    # q = val + (adv - adv_mean); cols >= n_actions are junk, sliced off outside.
    q_ref[...] = heads + (val - adv_mean)


def dueling_q_forward(state, params, *, max_batch_tile=256):
    """state: (batch, input_dims) float32; params: dict from init_params()."""
    batch, d_in = state.shape
    n_actions = params["n_actions"]
    K = params["w1"].shape[1]            # 1024
    h2_dim = params["w2"].shape[1]       # 512
    va_dim = params["wva1"].shape[1]     # 768
    head_dim = params["wheads"].shape[1]  # lane-dense (>=128) fused head width

    # Batch tiling: sublane-aligned; split into >= 2 tiles when batch >= 16 so
    # the "parallel" axis can shard across v7x's two TensorCores.
    bt = _round_up(batch, 8)
    if batch >= 16:
        bt = min(bt, _round_up((bt + 1) // 2, 8))
    bt = min(bt, max_batch_tile)
    padded_batch = _round_up(batch, bt)

    x = state.astype(jnp.bfloat16)
    if padded_batch != batch:
        x = jnp.pad(x, ((0, padded_batch - batch), (0, 0)))

    grid = (padded_batch // bt,)

    flops = 2 * padded_batch * (
        d_in * K + K * h2_dim + h2_dim * va_dim + va_dim * head_dim)
    bytes_accessed = (
        int(x.size) * x.dtype.itemsize
        + sum(int(p.size) * p.dtype.itemsize
              for k, p in params.items() if k != "n_actions")
        + padded_batch * head_dim * 4
    )

    kernel = functools.partial(dueling_q_kernel, n_actions=n_actions)

    q = pl.pallas_call(
        kernel,
        out_shape=jax.ShapeDtypeStruct((padded_batch, head_dim), jnp.float32),
        grid=grid,
        in_specs=[
            pl.BlockSpec((bt, d_in), lambda i: (i, 0)),            # state (bf16)
            pl.BlockSpec((d_in, K), lambda i: (0, 0)),             # w1
            pl.BlockSpec((1, K), lambda i: (0, 0)),                # b1
            pl.BlockSpec((K, h2_dim), lambda i: (0, 0)),           # w2
            pl.BlockSpec((1, h2_dim), lambda i: (0, 0)),           # b2
            pl.BlockSpec((h2_dim, va_dim), lambda i: (0, 0)),      # wva1 (fused)
            pl.BlockSpec((1, va_dim), lambda i: (0, 0)),           # bva1 (fused)
            pl.BlockSpec((va_dim, head_dim), lambda i: (0, 0)),    # fused heads W
            pl.BlockSpec((1, head_dim), lambda i: (0, 0)),         # fused heads b
        ],
        out_specs=pl.BlockSpec((bt, head_dim), lambda i: (i, 0)),
        compiler_params=pltpu.CompilerParams(
            dimension_semantics=("parallel",)),
        cost_estimate=pl.CostEstimate(
            flops=flops, transcendentals=0, bytes_accessed=bytes_accessed),
    )(
        x,
        params["w1"], params["b1"],
        params["w2"], params["b2"],
        params["wva1"], params["bva1"],
        params["wheads"], params["bheads"],
    )

    return q[:batch, :n_actions]


def init_params(key, input_dims, n_actions):
    """PyTorch-style uniform +/-1/sqrt(fan_in) init.  MXU weights stored
    transposed (in, out) in bfloat16; fc_value/fc_advantage hidden layers are
    fused into one (512, 768) weight; value/advantage output layers are fused
    into one lane-dense block-diagonal (768, 128) weight (pad cols exact 0)."""
    layer_dims = [
        ("w1", "b1", input_dims, 1024),
        ("w2", "b2", 1024, 512),
        ("wv1", "bv1", 512, 512),
        ("wv2", "bv2", 512, 1),
        ("wa1", "ba1", 512, 256),
        ("wa2", "ba2", 256, n_actions),
    ]
    raw = {}
    keys = jax.random.split(key, 2 * len(layer_dims))
    for i, (wname, bname, fan_in, fan_out) in enumerate(layer_dims):
        bound = 1.0 / float(fan_in) ** 0.5
        raw[wname] = jax.random.uniform(
            keys[2 * i], (fan_in, fan_out), jnp.float32, -bound, bound)
        raw[bname] = jax.random.uniform(
            keys[2 * i + 1], (1, fan_out), jnp.float32, -bound, bound)

    v_dim, a_dim, va_dim = 512, 256, 768
    head_dim = _round_up(n_actions + 1, 128)

    # block-diagonal fused output heads: cols 0..n_actions-1 = advantage (vs
    # hva[:, 512:]), col n_actions = value (vs hva[:, :512]), rest exact zero.
    wheads = jnp.zeros((va_dim, head_dim), jnp.float32)
    wheads = wheads.at[v_dim:, :n_actions].set(raw["wa2"])
    wheads = wheads.at[:v_dim, n_actions].set(raw["wv2"][:, 0])
    bheads = jnp.zeros((1, head_dim), jnp.float32)
    bheads = bheads.at[0, :n_actions].set(raw["ba2"][0])
    bheads = bheads.at[0, n_actions].set(raw["bv2"][0, 0])

    return {
        "w1": raw["w1"].astype(jnp.bfloat16),
        "b1": raw["b1"],
        "w2": raw["w2"].astype(jnp.bfloat16),
        "b2": raw["b2"],
        "wva1": jnp.concatenate([raw["wv1"], raw["wa1"]], axis=1).astype(jnp.bfloat16),
        "bva1": jnp.concatenate([raw["bv1"], raw["ba1"]], axis=1),
        "wheads": wheads.astype(jnp.bfloat16),
        "bheads": bheads,
        "n_actions": n_actions,
    }


def reference_forward(state, params):
    """Pure-JAX reference with the same bf16-in / f32-accumulate numerics."""
    bf16, f32 = jnp.bfloat16, jnp.float32
    n = params["n_actions"]
    x = state.astype(bf16)
    h1 = jnp.maximum(
        jnp.dot(x, params["w1"], preferred_element_type=f32) + params["b1"], 0.0)
    h2 = jnp.maximum(
        jnp.dot(h1.astype(bf16), params["w2"], preferred_element_type=f32)
        + params["b2"], 0.0)
    hva = jnp.maximum(
        jnp.dot(h2.astype(bf16), params["wva1"], preferred_element_type=f32)
        + params["bva1"], 0.0)
    heads = jnp.dot(hva.astype(bf16), params["wheads"],
                    preferred_element_type=f32) + params["bheads"]
    adv = heads[:, :n]
    val = heads[:, n:n + 1]
    return val + (adv - jnp.mean(adv, axis=1, keepdims=True))


if __name__ == "__main__":
    batch = 8
    input_dims = 64
    n_actions = 8

    key = jax.random.PRNGKey(0)
    k_state, k_params = jax.random.split(key)

    state = jax.random.normal(k_state, (batch, input_dims), jnp.float32)
    params = init_params(k_params, input_dims, n_actions)

    q = dueling_q_forward(state, params)
    q = jax.block_until_ready(q)

    q_ref = reference_forward(state, params)
    assert q.shape == (batch, n_actions)
    assert jnp.allclose(q, q_ref, atol=5e-3, rtol=5e-3), "mismatch vs reference"

    print("KERNEL_OK")
</pallas_src>

<mosaic_0001>
module attributes {stable_mosaic.version = 11 : i64} {
  func.func @dueling_q_kernel(%arg0: i32, %arg1: memref<8x64xbf16, #tpu.memory_space<vmem>>, %arg2: memref<64x1024xbf16, #tpu.memory_space<vmem>>, %arg3: memref<1x1024xf32, #tpu.memory_space<vmem>>, %arg4: memref<1024x512xbf16, #tpu.memory_space<vmem>>, %arg5: memref<1x512xf32, #tpu.memory_space<vmem>>, %arg6: memref<512x768xbf16, #tpu.memory_space<vmem>>, %arg7: memref<1x768xf32, #tpu.memory_space<vmem>>, %arg8: memref<768x128xbf16, #tpu.memory_space<vmem>>, %arg9: memref<1x128xf32, #tpu.memory_space<vmem>>, %arg10: memref<8x128xf32, #tpu.memory_space<vmem>>) attributes {dimension_semantics = [#tpu.dimension_semantics<parallel>], iteration_bounds = array<i64: 1>, scalar_prefetch = 0 : i64, scratch_operands = 0 : i64, tpu.core_type = #tpu.core_type<tc>, window_params = [{transform_indices = @transform_0, window_bounds = array<i64: 8, 64>}, {pipeline_mode = #tpu.pipeline_mode<synchronous>, transform_indices = @transform_1, window_bounds = array<i64: 64, 1024>}, {pipeline_mode = #tpu.pipeline_mode<synchronous>, transform_indices = @transform_2, window_bounds = array<i64: 1, 1024>}, {pipeline_mode = #tpu.pipeline_mode<synchronous>, transform_indices = @transform_3, window_bounds = array<i64: 1024, 512>}, {pipeline_mode = #tpu.pipeline_mode<synchronous>, transform_indices = @transform_4, window_bounds = array<i64: 1, 512>}, {pipeline_mode = #tpu.pipeline_mode<synchronous>, transform_indices = @transform_5, window_bounds = array<i64: 512, 768>}, {pipeline_mode = #tpu.pipeline_mode<synchronous>, transform_indices = @transform_6, window_bounds = array<i64: 1, 768>}, {pipeline_mode = #tpu.pipeline_mode<synchronous>, transform_indices = @transform_7, window_bounds = array<i64: 768, 128>}, {pipeline_mode = #tpu.pipeline_mode<synchronous>, transform_indices = @transform_8, window_bounds = array<i64: 1, 128>}, {transform_indices = @transform_9, window_bounds = array<i64: 8, 128>}]} {
    %c0 = arith.constant 0 : index
    %c0_0 = arith.constant 0 : index
    %0 = vector.load %arg1[%c0, %c0_0] : memref<8x64xbf16, #tpu.memory_space<vmem>>, vector<8x64xbf16>
    %c0_1 = arith.constant 0 : index
    %c0_2 = arith.constant 0 : index
    %1 = vector.load %arg2[%c0_1, %c0_2] : memref<64x1024xbf16, #tpu.memory_space<vmem>>, vector<64x1024xbf16>
    %cst = arith.constant dense<0.000000e+00> : vector<8x1024xf32>
    %2 = tpu.matmul %0, %1, %cst {dimension_numbers = #tpu.dot_dimension_numbers<[1], [0], [0], [1], [0, 0, 1, 1], [], []>} : vector<8x64xbf16>, vector<64x1024xbf16>, vector<8x1024xf32> -> vector<8x1024xf32>
    %c0_3 = arith.constant 0 : index
    %c0_4 = arith.constant 0 : index
    %3 = vector.load %arg3[%c0_3, %c0_4] : memref<1x1024xf32, #tpu.memory_space<vmem>>, vector<1x1024xf32>
    %4 = vector.broadcast %3 : vector<1x1024xf32> to vector<8x1024xf32>
    %5 = arith.addf %2, %4 : vector<8x1024xf32>
    %cst_5 = arith.constant 0.000000e+00 : f32
    %6 = vector.broadcast %cst_5 : f32 to vector<8x1024xf32>
    %7 = arith.maximumf %5, %6 : vector<8x1024xf32>
    %8 = arith.truncf %7 : vector<8x1024xf32> to vector<8x1024xbf16>
    %c0_6 = arith.constant 0 : index
    %c0_7 = arith.constant 0 : index
    %9 = vector.load %arg4[%c0_6, %c0_7] : memref<1024x512xbf16, #tpu.memory_space<vmem>>, vector<1024x512xbf16>
    %cst_8 = arith.constant dense<0.000000e+00> : vector<8x512xf32>
    %10 = tpu.matmul %8, %9, %cst_8 {dimension_numbers = #tpu.dot_dimension_numbers<[1], [0], [0], [1], [0, 0, 1, 1], [], []>} : vector<8x1024xbf16>, vector<1024x512xbf16>, vector<8x512xf32> -> vector<8x512xf32>
    %c0_9 = arith.constant 0 : index
    %c0_10 = arith.constant 0 : index
    %11 = vector.load %arg5[%c0_9, %c0_10] : memref<1x512xf32, #tpu.memory_space<vmem>>, vector<1x512xf32>
    %12 = vector.broadcast %11 : vector<1x512xf32> to vector<8x512xf32>
    %13 = arith.addf %10, %12 : vector<8x512xf32>
    %cst_11 = arith.constant 0.000000e+00 : f32
    %14 = vector.broadcast %cst_11 : f32 to vector<8x512xf32>
    %15 = arith.maximumf %13, %14 : vector<8x512xf32>
    %16 = arith.truncf %15 : vector<8x512xf32> to vector<8x512xbf16>
    %c0_12 = arith.constant 0 : index
    %c0_13 = arith.constant 0 : index
    %17 = vector.load %arg6[%c0_12, %c0_13] : memref<512x768xbf16, #tpu.memory_space<vmem>>, vector<512x768xbf16>
    %cst_14 = arith.constant dense<0.000000e+00> : vector<8x768xf32>
    %18 = tpu.matmul %16, %17, %cst_14 {dimension_numbers = #tpu.dot_dimension_numbers<[1], [0], [0], [1], [0, 0, 1, 1], [], []>} : vector<8x512xbf16>, vector<512x768xbf16>, vector<8x768xf32> -> vector<8x768xf32>
    %c0_15 = arith.constant 0 : index
    %c0_16 = arith.constant 0 : index
    %19 = vector.load %arg7[%c0_15, %c0_16] : memref<1x768xf32, #tpu.memory_space<vmem>>, vector<1x768xf32>
    %20 = vector.broadcast %19 : vector<1x768xf32> to vector<8x768xf32>
    %21 = arith.addf %18, %20 : vector<8x768xf32>
    %cst_17 = arith.constant 0.000000e+00 : f32
    %22 = vector.broadcast %cst_17 : f32 to vector<8x768xf32>
    %23 = arith.maximumf %21, %22 : vector<8x768xf32>
    %24 = arith.truncf %23 : vector<8x768xf32> to vector<8x768xbf16>
    %c0_18 = arith.constant 0 : index
    %c0_19 = arith.constant 0 : index
    %25 = vector.load %arg8[%c0_18, %c0_19] : memref<768x128xbf16, #tpu.memory_space<vmem>>, vector<768x128xbf16>
    %cst_20 = arith.constant dense<0.000000e+00> : vector<8x128xf32>
    %26 = tpu.matmul %24, %25, %cst_20 {dimension_numbers = #tpu.dot_dimension_numbers<[1], [0], [0], [1], [0, 0, 1, 1], [], []>} : vector<8x768xbf16>, vector<768x128xbf16>, vector<8x128xf32> -> vector<8x128xf32>
    %c0_21 = arith.constant 0 : index
    %c0_22 = arith.constant 0 : index
    %27 = vector.load %arg9[%c0_21, %c0_22] : memref<1x128xf32, #tpu.memory_space<vmem>>, vector<1x128xf32>
    %28 = vector.broadcast %27 : vector<1x128xf32> to vector<8x128xf32>
    %29 = arith.addf %26, %28 : vector<8x128xf32>
    %30 = vector.extract_strided_slice %29 {offsets = [0, 8], sizes = [8, 1], strides = [1, 1]} : vector<8x128xf32> to vector<8x1xf32>
    %cst_23 = arith.constant dense<0.000000e+00> : vector<8xf32>
    %31 = vector.multi_reduction <add>, %29, %cst_23 [1] : vector<8x128xf32> to vector<8xf32>
    %32 = vector.shape_cast %31 : vector<8xf32> to vector<8x1xf32>
    %33 = arith.subf %32, %30 : vector<8x1xf32>
    %cst_24 = arith.constant 1.250000e-01 : f32
    %34 = vector.broadcast %cst_24 : f32 to vector<8x1xf32>
    %35 = arith.mulf %33, %34 : vector<8x1xf32>
    %36 = arith.subf %30, %35 : vector<8x1xf32>
    %37 = vector.broadcast %36 : vector<8x1xf32> to vector<8x128xf32>
    %38 = arith.addf %29, %37 : vector<8x128xf32>
    %c0_25 = arith.constant 0 : index
    %c0_26 = arith.constant 0 : index
    %39 = vector.load %arg10[%c0_25, %c0_26] : memref<8x128xf32, #tpu.memory_space<vmem>>, vector<8x128xf32>
    tpu.vector_store %arg10[%c0_25, %c0_26], %38 {strides = array<i32>} : memref<8x128xf32, #tpu.memory_space<vmem>>, vector<8x128xf32>,
    return
  }
  func.func @transform_0(%arg0: i32) -> (i32, i32) {
    %c0_i32 = arith.constant 0 : i32
    %c0_i32_0 = arith.constant 0 : i32
    return %arg0, %c0_i32 : i32, i32
  }
  func.func @transform_1(%arg0: i32) -> (i32, i32) {
    %c0_i32 = arith.constant 0 : i32
    %c0_i32_0 = arith.constant 0 : i32
    %c0_i32_1 = arith.constant 0 : i32
    return %c0_i32, %c0_i32_0 : i32, i32
  }
  func.func @transform_2(%arg0: i32) -> (i32, i32) {
    %c0_i32 = arith.constant 0 : i32
    %c0_i32_0 = arith.constant 0 : i32
    %c0_i32_1 = arith.constant 0 : i32
    return %c0_i32, %c0_i32_0 : i32, i32
  }
  func.func @transform_3(%arg0: i32) -> (i32, i32) {
    %c0_i32 = arith.constant 0 : i32
    %c0_i32_0 = arith.constant 0 : i32
    %c0_i32_1 = arith.constant 0 : i32
    return %c0_i32, %c0_i32_0 : i32, i32
  }
  func.func @transform_4(%arg0: i32) -> (i32, i32) {
    %c0_i32 = arith.constant 0 : i32
    %c0_i32_0 = arith.constant 0 : i32
    %c0_i32_1 = arith.constant 0 : i32
    return %c0_i32, %c0_i32_0 : i32, i32
  }
  func.func @transform_5(%arg0: i32) -> (i32, i32) {
    %c0_i32 = arith.constant 0 : i32
    %c0_i32_0 = arith.constant 0 : i32
    %c0_i32_1 = arith.constant 0 : i32
    return %c0_i32, %c0_i32_0 : i32, i32
  }
  func.func @transform_6(%arg0: i32) -> (i32, i32) {
    %c0_i32 = arith.constant 0 : i32
    %c0_i32_0 = arith.constant 0 : i32
    %c0_i32_1 = arith.constant 0 : i32
    return %c0_i32, %c0_i32_0 : i32, i32
  }
  func.func @transform_7(%arg0: i32) -> (i32, i32) {
    %c0_i32 = arith.constant 0 : i32
    %c0_i32_0 = arith.constant 0 : i32
    %c0_i32_1 = arith.constant 0 : i32
    return %c0_i32, %c0_i32_0 : i32, i32
  }
  func.func @transform_8(%arg0: i32) -> (i32, i32) {
    %c0_i32 = arith.constant 0 : i32
    %c0_i32_0 = arith.constant 0 : i32
    %c0_i32_1 = arith.constant 0 : i32
    return %c0_i32, %c0_i32_0 : i32, i32
  }
  func.func @transform_9(%arg0: i32) -> (i32, i32) {
    %c0_i32 = arith.constant 0 : i32
    %c0_i32_0 = arith.constant 0 : i32
    return %arg0, %c0_i32 : i32, i32
  }
}

</mosaic_0001>

<bundles_post_ra>
// kernel: tpu_custom_call.1
= control target key start
LH: loop header
LB: loop body
LE: loop exit
PB: predicated region body
PF: predicated region fallthrough
CT: control target
= control target key end

     0   :  { %14 = vsyncpa [#allocation3], 0  ;;  %s7666_s0 = inlined_call_operand.hbm [shape: bf16[8,64], index: 0, kind: input, shape index: {}]   ;;  %s7667_s1 = inlined_call_operand.hbm [shape: bf16[64,1024], index: 1, kind: input, shape index: {}]   ;;  %s7668_s2 = inlined_call_operand.hbm [shape: f32[1,1024], index: 2, kind: input, shape index: {}]   ;;  %s7669_s3 = inlined_call_operand.hbm [shape: bf16[1024,512], index: 3, kind: input, shape index: {}]   ;;  %s7670_s4 = inlined_call_operand.hbm [shape: f32[1,512], index: 4, kind: input, shape index: {}]   ;;  %s7671_s5 = inlined_call_operand.hbm [shape: bf16[512,768], index: 5, kind: input, shape index: {}]   ;;  %s7672_s6 = inlined_call_operand.hbm [shape: f32[1,768], index: 6, kind: input, shape index: {}]   ;;  %s7673_s7 = inlined_call_operand.hbm [shape: bf16[768,128], index: 7, kind: input, shape index: {}]   ;;  %s7674_s8 = inlined_call_operand.vmem [shape: f32[1,128], index: 8, kind: input, shape index: {}]   ;;  %s7675_s9 = inlined_call_operand.hbm [shape: f32[8,128], index: 9, kind: output, shape index: {}]  }
   0x1   :  { %15 = vsyncpa [#allocation6], 0 }
   0x2   :  { %16 = vsyncpa [#allocation9], 0 }
   0x3   :  { %17 = vsyncpa [#allocation12], 0 }
   0x4   :  { %18 = vsyncpa [#allocation15], 0  ;;  %s35_s11 = sshll.u32 %s7667_s1, 4  ;;  %s36_s11 = int_to_ptr.hbm [resolvable:$true] %s35_s11 }
   0x5   :  { %19 = vsyncpa [#allocation4], 0  ;;  %s7342_s12 = smov [#allocation5]   ;;  %s59_s16 = sshll.u32 %s7669_s3, 4  ;;  %s60_s16 = int_to_ptr.hbm [resolvable:$true] %s59_s16 }
   0x6   :  { %s37_s13 = sshll.u32 %s7342_s12, 4  ;;  %s7343_s17 = smov 512   ;;  %s38_s13 = int_to_ptr.vmem [resolvable:$true] %s37_s13 }
   0x7   :  { %s7344_s18 = smov 32   ;;  %s7345_s19 = smov [#allocation8]  }
   0x8   :  { %43 = dma.hbm_to_vmem [thread:$0]  %s36_s11, 4096, %s38_s13, [#allocation6], %s7343_s17, %s7343_s17, %s7344_s18  }
   0x9   :  { %s61_s20 = sshll.u32 %s7345_s19, 4  ;;  %s7346_s21 = smov 256   ;;  %s62_s20 = int_to_ptr.vmem [resolvable:$true] %s61_s20 }
   0xa   :  { %s7347_s22 = smov 16   ;;  %s83_s24 = sshll.u32 %s7671_s5, 4  ;;  %s84_s24 = int_to_ptr.hbm [resolvable:$true] %s83_s24 }
   0xb   :  { %67 = dma.hbm_to_vmem [thread:$0]  %s60_s16, 32768, %s62_s20, [#allocation9], %s7346_s21, %s7346_s21, %s7347_s22  }
   0xc   :  { %s7348_s25 = smov [#allocation11]   ;;  %s25_s28 = sshll.u32 %s7666_s0, 4  ;;  %s26_s28 = int_to_ptr.hbm [resolvable:$true] %s25_s28 }
   0xd   :  { %s85_s26 = sshll.u32 %s7348_s25, 4  ;;  %s7349_s29 = smov 384   ;;  %s86_s26 = int_to_ptr.vmem [resolvable:$true] %s85_s26 }
   0xe   :  { %s7350_s30 = smov 24   ;;  %s7351_s10 = smov [#allocation2]  }
   0xf   :  { %91 = dma.hbm_to_vmem [thread:$0]  %s84_s24, 24576, %s86_s26, [#allocation12], %s7349_s29, %s7349_s29, %s7350_s30  }
  0x10   :  { %s27_s11 = sshll.u32 %s7351_s10, 4  ;;  %s49_s14 = sshll.u32 %s7668_s2, 4  ;;  %s28_s11 = int_to_ptr.vmem [resolvable:$true] %s27_s11  ;;  %s50_s14 = int_to_ptr.hbm [resolvable:$true] %s49_s14 }
  0x11   :  { %30 = dma.hbm_to_vmem [thread:$0]  %s26_s28, 64, %s28_s11, [#allocation3]  }
  0x12   :  { %s73_s16 = sshll.u32 %s7670_s4, 4  ;;  %s7352_s17 = smov [#allocation7]   ;;  %s74_s16 = int_to_ptr.hbm [resolvable:$true] %s73_s16 }
  0x13   :  { %s51_s18 = sshll.u32 %s7352_s17, 4  ;;  %s7353_s0 = smov [#allocation10]   ;;  %s52_s18 = int_to_ptr.vmem [resolvable:$true] %s51_s18 }
  0x14   :  { %54 = dma.hbm_to_vmem [thread:$0]  %s50_s14, 128, %s52_s18, [#allocation6]  }
  0x15   :  { %s75_s19 = sshll.u32 %s7353_s0, 4  ;;  %s97_s22 = sshll.u32 %s7672_s6, 4  ;;  %s76_s19 = int_to_ptr.vmem [resolvable:$true] %s75_s19  ;;  %s98_s22 = int_to_ptr.hbm [resolvable:$true] %s97_s22 }
  0x16   :  { %78 = dma.hbm_to_vmem [thread:$0]  %s74_s16, 64, %s76_s19, [#allocation9]  }
  0x17   :  { %s107_s23 = sshll.u32 %s7673_s7, 4  ;;  %s7354_s24 = smov [#allocation13]   ;;  %s108_s23 = int_to_ptr.hbm [resolvable:$true] %s107_s23 }
  0x18   :  { %s99_s4 = sshll.u32 %s7354_s24, 4  ;;  %s7355_s25 = smov [#allocation14]   ;;  %s100_s4 = int_to_ptr.vmem [resolvable:$true] %s99_s4 }
  0x19   :  { %102 = dma.hbm_to_vmem [thread:$0]  %s98_s22, 96, %s100_s4, [#allocation12]  }
  0x1a   :  { %s109_s26 = sshll.u32 %s7355_s25, 4  ;;  %s7356_s27 = smov 64   ;;  %s110_s26 = int_to_ptr.vmem [resolvable:$true] %s109_s26 }
  0x1b   :  { %s7357_s3 = smov 4  }
  0x1c   :  { %115 = dma.hbm_to_vmem [thread:$0]  %s108_s23, 6144, %s110_s26, [#allocation15], %s7356_s27, %s7356_s27, %s7357_s3  }
  0x1d   :  { %7330 = dma.done.wait [#allocation3], 64  }
  0x1e   :  { %7331 = vsyncadd [#allocation3], 4294967232 }
  0x1f   :  { %7332 = dma.done.wait [#allocation6], 4224  }
  0x20   :  { %7333 = vsyncadd [#allocation6], 4294963072 }
  0x21   :  { %7334 = dma.done.wait [#allocation9], 32832  }
  0x22   :  { %7335 = vsyncadd [#allocation9], 4294934464 }
  0x23   :  { %7336 = dma.done.wait [#allocation12], 24672  }
  0x24   :  { %7337 = vsyncadd [#allocation12], 4294942624 }
  0x25   :  { %7338 = dma.done.wait [#allocation15], 6144  }
  0x26   :  { %7339 = vsyncadd [#allocation15], 4294961152  ;;  %v4543_v0 = vld [vmem:[#allocation5 + $0xc0] sm:$0xf]  ;;  %v6589_v2 = vld [vmem:[#allocation5 + $0xc4] sm:$0xf] }
  0x27   :  { %v6593_v1 = vld [vmem:[#allocation5 + $0xdc] sm:$0xf0]  ;;  %v4545_v4 = vld [vmem:[#allocation5 + $0xe0] sm:$0xf0]  ;;  %v4551_v22 = vld [vmem:[#allocation5 + $0xc8] sm:$0xf] }
  0x28   :  { %v4544_v3 = vor.u32 %v6593_v1, %v4543_v0  ;;  %v4511_v5 = vld [vmem:[#allocation5 + $0x80] sm:$0xf]  ;;  %v4548_v7 = vor.u32 %v6589_v2, %v4545_v4  ;;  %v6581_v8 = vld [vmem:[#allocation5 + $0x84] sm:$0xf]  ;;  %v4559_v23 = vld [vmem:[#allocation5 + $0xd0] sm:$0xf] }
  0x29   :  { %v6585_v6 = vld [vmem:[#allocation5 + $0x9c] sm:$0xf0]  ;;  %v4513_v9 = vld [vmem:[#allocation5 + $0xa0] sm:$0xf0]  ;;  %v6595_v24 = vld [vmem:[#allocation5 + $0xec] sm:$0xf0] }
  0x2a   :  { %370 = vmatpush.bf16.msra.mxu2 %v4544_v3  ;;  %v4512_v10 = vor.u32 %v6585_v6, %v4511_v5  ;;  %383 = vmatpush.bf16.msra.mxu3 %v4548_v7  ;;  %v4516_v11 = vor.u32 %v6581_v8, %v4513_v9  ;;  %v4479_v12 = vld [vmem:[#allocation5 + $0x40] sm:$0xf]  ;;  %v6573_v14 = vld [vmem:[#allocation5 + $0x44] sm:$0xf]  ;;  %v6594_v25 = vld [vmem:[#allocation5 + $0xe4] sm:$0xf0]  ;;  %v4560_v26 = vor.u32 %v6595_v24, %v4559_v23 }
  0x2b   :  { %v6577_v13 = vld [vmem:[#allocation5 + $0x5c] sm:$0xf0]  ;;  %v4481_v15 = vld [vmem:[#allocation5 + $0x60] sm:$0xf0]  ;;  %v6591_v27 = vld [vmem:[#allocation5 + $0xd4] sm:$0xf]  ;;  %v4552_v37 = vor.u32 %v6594_v25, %v4551_v22 }
  0x2c   :  { %v4447_v16 = vld [vmem:[#allocation5] sm:$0xf]  ;;  %v4480_v17 = vor.u32 %v6577_v13, %v4479_v12  ;;  %v6565_v19 = vld [vmem:[#allocation5 + $0x4] sm:$0xf]  ;;  %v4484_v21 = vor.u32 %v6573_v14, %v4481_v15  ;;  %v4561_v28 = vld [vmem:[#allocation5 + $0xf0] sm:$0xf0]  ;;  %422 = vmatpush.bf16.msra.mxu0 %v4560_v26 }
  0x2d   :  { %v6569_v18 = vld [vmem:[#allocation5 + $0x1c] sm:$0xf0]  ;;  %v4449_v20 = vld [vmem:[#allocation5 + $0x20] sm:$0xf0]  ;;  %v6590_v29 = vld [vmem:[#allocation5 + $0xcc] sm:$0xf]  ;;  %v4564_v31 = vor.u32 %v6591_v27, %v4561_v28 }
  0x2e   :  { %371 = vmatpush.bf16.msra.mxu2 %v4512_v10  ;;  %384 = vmatpush.bf16.msra.mxu3 %v4516_v11  ;;  %v4553_v30 = vld [vmem:[#allocation5 + $0xe8] sm:$0xf0]  ;;  %v4448_v32 = vor.u32 %v6569_v18, %v4447_v16  ;;  %v4527_v33 = vld [vmem:[#allocation5 + $0x90] sm:$0xf]  ;;  %v6583_v35 = vld [vmem:[#allocation5 + $0x94] sm:$0xf]  ;;  %v4452_v36 = vor.u32 %v6565_v19, %v4449_v20 }
  0x2f   :  { %v6587_v34 = vld [vmem:[#allocation5 + $0xac] sm:$0xf0]  ;;  %v4519_v38 = vld [vmem:[#allocation5 + $0x88] sm:$0xf]  ;;  %435 = vmatpush.bf16.msra.mxu1 %v4564_v31  ;;  %v4529_v41 = vld [vmem:[#allocation5 + $0xb0] sm:$0xf0]  ;;  %v4556_v42 = vor.u32 %v6590_v29, %v4553_v30 }
  0x30   :  { %v6586_v39 = vld [vmem:[#allocation5 + $0xa4] sm:$0xf0]  ;;  %v4528_v40 = vor.u32 %v6587_v34, %v4527_v33  ;;  %v6582_v43 = vld [vmem:[#allocation5 + $0x8c] sm:$0xf]  ;;  %v4532_v45 = vor.u32 %v6583_v35, %v4529_v41  ;;  %v4495_v46 = vld [vmem:[#allocation5 + $0x50] sm:$0xf] }
  0x31   :  { %v4521_v44 = vld [vmem:[#allocation5 + $0xa8] sm:$0xf0]  ;;  %v6579_v47 = vld [vmem:[#allocation5 + $0x6c] sm:$0xf0]  ;;  %v6575_v48 = vld [vmem:[#allocation5 + $0x54] sm:$0xf]  ;;  %v4520_v52 = vor.u32 %v6586_v39, %v4519_v38 }
  0x32   :  { %372 = vmatpush.bf16.msra.mxu2 %v4480_v17  ;;  %385 = vmatpush.bf16.msra.mxu3 %v4484_v21  ;;  %v4497_v49 = vld [vmem:[#allocation5 + $0x70] sm:$0xf0]  ;;  %v7434_v50 = vld [vmem:[#allocation2] sm:$0xf]  ;;  %vm362_vm0 = vcmask 523264   ;;  %v4496_v51 = vor.u32 %v6579_v47, %v4495_v46  ;;  %v4524_v55 = vor.u32 %v6582_v43, %v4521_v44  ;;  %s4431_s10 = sshll.u32 %s7675_s9, 4  ;;  %s4432_s10 = int_to_ptr.hbm [resolvable:$true] %s4431_s10 }
  0x33   :  { %423 = vmatpush.bf16.msra.mxu0 %v4528_v40  ;;  %v4463_v53 = vld [vmem:[#allocation5 + $0x10] sm:$0xf]  ;;  %v4487_v56 = vld [vmem:[#allocation5 + $0x48] sm:$0xf]  ;;  %v6574_v58 = vld [vmem:[#allocation5 + $0x4c] sm:$0xf]  ;;  %436 = vmatpush.bf16.msra.mxu1 %v4532_v45  ;;  %v4500_v59 = vor.u32 %v6575_v48, %v4497_v49 }
  0x34   :  { %v6571_v54 = vld [vmem:[#allocation5 + $0x2c] sm:$0xf0]  ;;  %v6578_v57 = vld [vmem:[#allocation5 + $0x64] sm:$0xf0]  ;;  %v4489_v60 = vld [vmem:[#allocation5 + $0x68] sm:$0xf0] }
  0x35   :  { %v6567_v61 = vld [vmem:[#allocation5 + $0x14] sm:$0xf]  ;;  %v4455_v63 = vld [vmem:[#allocation5 + $0x8] sm:$0xf]  ;;  %v4464_v0 = vor.u32 %v6571_v54, %v4463_v53  ;;  %v4488_v1 = vor.u32 %v6578_v57, %v4487_v56  ;;  %v6566_v3 = vld [vmem:[#allocation5 + $0xc] sm:$0xf]  ;;  %v4492_v5 = vor.u32 %v6574_v58, %v4489_v60 }
  0x36   :  { %373 = vmatpush.bf16.msra.mxu2 %v4448_v32  ;;  %386 = vmatpush.bf16.msra.mxu3 %v4452_v36  ;;  %v4465_v62 = vld [vmem:[#allocation5 + $0x30] sm:$0xf0]  ;;  %v6570_v2 = vld [vmem:[#allocation5 + $0x24] sm:$0xf0]  ;;  %v4457_v4 = vld [vmem:[#allocation5 + $0x28] sm:$0xf0] }
  0x37   :  { %424 = vmatpush.bf16.msra.mxu0 %v4496_v51  ;;  %437 = vmatpush.bf16.msra.mxu1 %v4500_v59  ;;  %v4567_v6 = vld [vmem:[#allocation5 + $0xd8] sm:$0xf]  ;;  %v4468_v8 = vor.u32 %v6567_v61, %v4465_v62  ;;  %v4695_v9 = vld [vmem:[#allocation8 + $0xe0] sm:$0xf]  ;;  %v6592_v13 = vld [vmem:[#allocation5 + $0xdc] sm:$0xf]  ;;  %v4456_v18 = vor.u32 %v6570_v2, %v4455_v63  ;;  %v4460_v22 = vor.u32 %v6566_v3, %v4457_v4 }
  0x38   :  { %v6596_v7 = vld [vmem:[#allocation5 + $0xf4] sm:$0xf0]  ;;  %v4823_v11 = vld [vmem:[#allocation8 + $0x1e0] sm:$0xf]  ;;  %v4569_v14 = vld [vmem:[#allocation5 + $0xf8] sm:$0xf0] }
  0x39   :  { %4573 = vmatmul.msk.bf16.vlgmr.msra.gmra.mxu2 %vm362_vm0, %v7434_v50  ;;  %4574 = vmatmul.msk.bf16.vlgmr.msra.gmra.mxu3 %vm362_vm0, %v7434_v50  ;;  %v6627_v10 = vld [vmem:[#allocation8 + $0xec] sm:$0xf0]  ;;  %v4807_v17 = vld [vmem:[#allocation8 + $0x1c0] sm:$0xf]  ;;  %v4568_v23 = vor.u32 %v6596_v7, %v4567_v6  ;;  %v4572_v24 = vor.u32 %v6592_v13, %v4569_v14  ;;  %v6584_v28 = vld [vmem:[#allocation5 + $0x9c] sm:$0xf] }
  0x3a   :  { %396 = vmatpush.bf16.msrb.mxu2 %v4552_v37  ;;  %409 = vmatpush.bf16.msrb.mxu3 %v4556_v42  ;;  %v6659_v12 = vld [vmem:[#allocation8 + $0x1ec] sm:$0xf0]  ;;  %v4696_v15 = vor.u32 %v6627_v10, %v4695_v9  ;;  %v4679_v19 = vld [vmem:[#allocation8 + $0xc0] sm:$0xf]  ;;  %v4537_v29 = vld [vmem:[#allocation5 + $0xb8] sm:$0xf0] }
  0x3b   :  { %425 = vmatpush.bf16.msra.mxu0 %v4464_v0  ;;  %v4824_v16 = vor.u32 %v6659_v12, %v4823_v11  ;;  %v6623_v20 = vld [vmem:[#allocation8 + $0xcc] sm:$0xf0]  ;;  %438 = vmatpush.bf16.msra.mxu1 %v4468_v8  ;;  %v4663_v31 = vld [vmem:[#allocation8 + $0xa0] sm:$0xf]  ;;  %v4540_v36 = vor.u32 %v6584_v28, %v4537_v29  ;;  %v6576_v39 = vld [vmem:[#allocation5 + $0x5c] sm:$0xf] }
  0x3c   :  { %v6655_v21 = vld [vmem:[#allocation8 + $0x1cc] sm:$0xf0]  ;;  %v4680_v30 = vor.u32 %v6623_v20, %v4679_v19  ;;  %v4791_v34 = vld [vmem:[#allocation8 + $0x1a0] sm:$0xf]  ;;  %v4505_v40 = vld [vmem:[#allocation5 + $0x78] sm:$0xf0] }
  0x3d   :  { %v4535_v25 = vld [vmem:[#allocation5 + $0x98] sm:$0xf]  ;;  %v4808_v27 = vor.u32 %v6655_v21, %v4807_v17  ;;  %v4647_v43 = vld [vmem:[#allocation8 + $0x80] sm:$0xf]  ;;  %v4508_v49 = vor.u32 %v6576_v39, %v4505_v40  ;;  %v4473_v53 = vld [vmem:[#allocation5 + $0x38] sm:$0xf0] }
  0x3e   :  { %397 = vmatpush.bf16.msrb.mxu2 %v4520_v52  ;;  %410 = vmatpush.bf16.msrb.mxu3 %v4524_v55  ;;  %v6588_v26 = vld [vmem:[#allocation5 + $0xb4] sm:$0xf0]  ;;  %v4775_v47 = vld [vmem:[#allocation8 + $0x180] sm:$0xf]  ;;  %v6568_v52 = vld [vmem:[#allocation5 + $0x1c] sm:$0xf] }
  0x3f   :  { %4577 = vmatmul.msk.bf16.vlgmr.msra.gmra.mxu0 %vm362_vm0, %v7434_v50  ;;  %2045 = vmatpush.bf16.msrb.mxu1 %v4824_v16  ;;  %v6619_v32 = vld [vmem:[#allocation8 + $0xac] sm:$0xf0]  ;;  %v4536_v33 = vor.u32 %v6588_v26, %v4535_v25  ;;  %v4631_v55 = vld [vmem:[#allocation8 + $0x60] sm:$0xf] }
  0x40   :  { %2032 = vmatpush.bf16.msrb.mxu0 %v4696_v15  ;;  %4578 = vmatmul.msk.bf16.vlgmr.msra.gmra.mxu1 %vm362_vm0, %v7434_v50  ;;  %v6651_v35 = vld [vmem:[#allocation8 + $0x1ac] sm:$0xf0]  ;;  %v4664_v41 = vor.u32 %v6619_v32, %v4663_v31  ;;  %v4951_v56 = vld [vmem:[#allocation8 + $0x2e0] sm:$0xf] }
  0x41   :  { %v4503_v37 = vld [vmem:[#allocation5 + $0x58] sm:$0xf]  ;;  %v4792_v42 = vor.u32 %v6651_v35, %v4791_v34  ;;  %v5079_v60 = vld [vmem:[#allocation8 + $0x3e0] sm:$0xf] }
  0x42   :  { %398 = vmatpush.bf16.msrb.mxu2 %v4488_v1  ;;  %411 = vmatpush.bf16.msrb.mxu3 %v4492_v5  ;;  %v6580_v38 = vld [vmem:[#allocation5 + $0x74] sm:$0xf0]  ;;  %v4759_v63 = vld [vmem:[#allocation8 + $0x160] sm:$0xf]  ;;  %v4476_v1 = vor.u32 %v6568_v52, %v4473_v53 }
  0x43   :  { %2046 = vmatpush.bf16.msrb.mxu1 %v4808_v27  ;;  %v6615_v44 = vld [vmem:[#allocation8 + $0x8c] sm:$0xf0]  ;;  %v4504_v45 = vor.u32 %v6580_v38, %v4503_v37  ;;  %v4615_v5 = vld [vmem:[#allocation8 + $0x40] sm:$0xf] }
  0x44   :  { %2033 = vmatpush.bf16.msrb.mxu0 %v4680_v30  ;;  %v4471_v46 = vld [vmem:[#allocation5 + $0x18] sm:$0xf]  ;;  %v4648_v54 = vor.u32 %v6615_v44, %v4647_v43  ;;  %v4935_v6 = vld [vmem:[#allocation8 + $0x2c0] sm:$0xf] }
  0x45   :  { %v6647_v48 = vld [vmem:[#allocation8 + $0x18c] sm:$0xf0]  ;;  %v5063_v10 = vld [vmem:[#allocation8 + $0x3c0] sm:$0xf] }
  0x46   :  { %399 = vmatpush.bf16.msrb.mxu2 %v4456_v18  ;;  %412 = vmatpush.bf16.msrb.mxu3 %v4460_v22  ;;  %v6572_v51 = vld [vmem:[#allocation5 + $0x34] sm:$0xf0]  ;;  %v4776_v58 = vor.u32 %v6647_v48, %v4775_v47  ;;  %v4743_v12 = vld [vmem:[#allocation8 + $0x140] sm:$0xf] }
  0x47   :  { %v6691_v57 = vld [vmem:[#allocation8 + $0x2ec] sm:$0xf0]  ;;  %2047 = vmatpush.bf16.msrb.mxu1 %v4792_v42  ;;  %v4472_v62 = vor.u32 %v6572_v51, %v4471_v46  ;;  %v4599_v18 = vld [vmem:[#allocation8 + $0x20] sm:$0xf] }
  0x48   :  { %2034 = vmatpush.bf16.msrb.mxu0 %v4664_v41  ;;  %v6611_v59 = vld [vmem:[#allocation8 + $0x6c] sm:$0xf0]  ;;  %v4952_v2 = vor.u32 %v6691_v57, %v4951_v56  ;;  %v4727_v20 = vld [vmem:[#allocation8 + $0x120] sm:$0xf] }
  0x49   :  { %4575 = vmatmul.msk.bf16.vlgmr.msrb.gmra.mxu2 %vm362_vm0, %v7434_v50  ;;  %4576 = vmatmul.msk.bf16.vlgmr.msrb.gmra.mxu3 %vm362_vm0, %v7434_v50  ;;  %v6723_v61 = vld [vmem:[#allocation8 + $0x3ec] sm:$0xf0]  ;;  %v4632_v3 = vor.u32 %v6611_v59, %v4631_v55  ;;  %v4919_v22 = vld [vmem:[#allocation8 + $0x2a0] sm:$0xf] }
  0x4a   :  { %448 = vmatpush.bf16.msra.mxu2 %v4568_v23  ;;  %461 = vmatpush.bf16.msra.mxu3 %v4572_v24  ;;  %v6643_v0 = vld [vmem:[#allocation8 + $0x16c] sm:$0xf0]  ;;  %v5080_v4 = vor.u32 %v6723_v61, %v5079_v60  ;;  %v5047_v24 = vld [vmem:[#allocation8 + $0x3a0] sm:$0xf] }
  0x4b   :  { %v6687_v7 = vld [vmem:[#allocation8 + $0x2cc] sm:$0xf0]  ;;  %2048 = vmatpush.bf16.msrb.mxu1 %v4776_v58  ;;  %v4760_v8 = vor.u32 %v6643_v0, %v4759_v63  ;;  %v4583_v27 = vld [vmem:[#allocation8] sm:$0xf] }
  0x4c   :  { %2035 = vmatpush.bf16.msrb.mxu0 %v4648_v54  ;;  %v6607_v9 = vld [vmem:[#allocation8 + $0x4c] sm:$0xf0]  ;;  %v4936_v14 = vor.u32 %v6687_v7, %v4935_v6  ;;  %v4711_v31 = vld [vmem:[#allocation8 + $0x100] sm:$0xf] }
  0x4d   :  { %v6719_v11 = vld [vmem:[#allocation8 + $0x3cc] sm:$0xf0]  ;;  %v4616_v15 = vor.u32 %v6607_v9, %v4615_v5  ;;  %v4903_v34 = vld [vmem:[#allocation8 + $0x280] sm:$0xf] }
  0x4e   :  { %449 = vmatpush.bf16.msra.mxu2 %v4536_v33  ;;  %462 = vmatpush.bf16.msra.mxu3 %v4540_v36  ;;  %v6639_v13 = vld [vmem:[#allocation8 + $0x14c] sm:$0xf0]  ;;  %v5064_v16 = vor.u32 %v6719_v11, %v5063_v10  ;;  %v5031_v36 = vld [vmem:[#allocation8 + $0x380] sm:$0xf] }
  0x4f   :  { %2049 = vmatpush.bf16.msrb.mxu1 %v4760_v8  ;;  %v4744_v17 = vor.u32 %v6639_v13, %v4743_v12  ;;  %v6603_v19 = vld [vmem:[#allocation8 + $0x2c] sm:$0xf0]  ;;  %v5207_v38 = vld [vmem:[#allocation8 + $0x4e0] sm:$0xf] }
  0x50   :  { %2036 = vmatpush.bf16.msrb.mxu0 %v4632_v3  ;;  %v6635_v21 = vld [vmem:[#allocation8 + $0x12c] sm:$0xf0]  ;;  %v4600_v26 = vor.u32 %v6603_v19, %v4599_v18  ;;  %v5335_v41 = vld [vmem:[#allocation8 + $0x5e0] sm:$0xf] }
  0x51   :  { %v6683_v23 = vld [vmem:[#allocation8 + $0x2ac] sm:$0xf0]  ;;  %v4728_v28 = vor.u32 %v6635_v21, %v4727_v20  ;;  %v5191_v53 = vld [vmem:[#allocation8 + $0x4c0] sm:$0xf] }
  0x52   :  { %450 = vmatpush.bf16.msra.mxu2 %v4504_v45  ;;  %463 = vmatpush.bf16.msra.mxu3 %v4508_v49  ;;  %v6715_v25 = vld [vmem:[#allocation8 + $0x3ac] sm:$0xf0]  ;;  %v4920_v29 = vor.u32 %v6683_v23, %v4919_v22  ;;  %v4887_v45 = vld [vmem:[#allocation8 + $0x260] sm:$0xf] }
  0x53   :  { %2050 = vmatpush.bf16.msrb.mxu1 %v4744_v17  ;;  %v6599_v30 = vld [vmem:[#allocation8 + $0xc] sm:$0xf0]  ;;  %v5048_v33 = vor.u32 %v6715_v25, %v5047_v24  ;;  %v5015_v49 = vld [vmem:[#allocation8 + $0x360] sm:$0xf] }
  0x54   :  { %2037 = vmatpush.bf16.msrb.mxu0 %v4616_v15  ;;  %v6631_v32 = vld [vmem:[#allocation8 + $0x10c] sm:$0xf0]  ;;  %v4584_v40 = vor.u32 %v6599_v30, %v4583_v27  ;;  %v4871_v59 = vld [vmem:[#allocation8 + $0x240] sm:$0xf] }
  0x55   :  { %v6679_v35 = vld [vmem:[#allocation8 + $0x28c] sm:$0xf0]  ;;  %v4712_v43 = vor.u32 %v6631_v32, %v4711_v31  ;;  %v4999_v61 = vld [vmem:[#allocation8 + $0x340] sm:$0xf] }
  0x56   :  { %451 = vmatpush.bf16.msra.mxu2 %v4472_v62  ;;  %464 = vmatpush.bf16.msra.mxu3 %v4476_v1  ;;  %v6711_v37 = vld [vmem:[#allocation8 + $0x38c] sm:$0xf0]  ;;  %v4904_v44 = vor.u32 %v6679_v35, %v4903_v34  ;;  %v5175_v0 = vld [vmem:[#allocation8 + $0x4a0] sm:$0xf] }
  0x57   :  { %v6755_v39 = vld [vmem:[#allocation8 + $0x4ec] sm:$0xf0]  ;;  %2051 = vmatpush.bf16.msrb.mxu1 %v4728_v28  ;;  %v5032_v46 = vor.u32 %v6711_v37, %v5031_v36  ;;  %v4855_v7 = vld [vmem:[#allocation8 + $0x220] sm:$0xf] }
  0x58   :  { %2038 = vmatpush.bf16.msrb.mxu0 %v4600_v26  ;;  %v6787_v42 = vld [vmem:[#allocation8 + $0x5ec] sm:$0xf0]  ;;  %v5208_v47 = vor.u32 %v6755_v39, %v5207_v38  ;;  %v4983_v9 = vld [vmem:[#allocation8 + $0x320] sm:$0xf] }
  0x59   :  { %4579 = vmatmul.msk.bf16.vlgmr.msra.gmra.mxu2 %vm362_vm0, %v7434_v50  ;;  %4580 = vmatmul.msk.bf16.vlgmr.msra.gmra.mxu3 %vm362_vm0, %v7434_v50  ;;  %v6675_v48 = vld [vmem:[#allocation8 + $0x26c] sm:$0xf0]  ;;  %v5336_v52 = vor.u32 %v6787_v42, %v5335_v41  ;;  %v5319_v50 = vld [vmem:[#allocation8 + $0x5c0] sm:$0xf] }
  0x5a   :  { %2058 = vmatpush.bf16.msrb.mxu2 %v4952_v2  ;;  %2071 = vmatpush.bf16.msrb.mxu3 %v5080_v4  ;;  %v6707_v51 = vld [vmem:[#allocation8 + $0x36c] sm:$0xf0]  ;;  %v4888_v56 = vor.u32 %v6675_v48, %v4887_v45  ;;  %v5303_v2 = vld [vmem:[#allocation8 + $0x5a0] sm:$0xf] }
  0x5b   :  { %v6751_v54 = vld [vmem:[#allocation8 + $0x4cc] sm:$0xf0]  ;;  %2052 = vmatpush.bf16.msrb.mxu1 %v4712_v43  ;;  %v5016_v57 = vor.u32 %v6707_v51, %v5015_v49  ;;  %v5159_v12 = vld [vmem:[#allocation8 + $0x480] sm:$0xf] }
  0x5c   :  { %2039 = vmatpush.bf16.msrb.mxu0 %v4584_v40  ;;  %v6783_v55 = vld [vmem:[#allocation8 + $0x5cc] sm:$0xf0]  ;;  %v5192_v58 = vor.u32 %v6751_v54, %v5191_v53  ;;  %v4839_v17 = vld [vmem:[#allocation8 + $0x200] sm:$0xf] }
  0x5d   :  { %v6671_v60 = vld [vmem:[#allocation8 + $0x24c] sm:$0xf0]  ;;  %v5320_v62 = vor.u32 %v6783_v55, %v5319_v50  ;;  %v4967_v21 = vld [vmem:[#allocation8 + $0x300] sm:$0xf] }
  0x5e   :  { %2059 = vmatpush.bf16.msrb.mxu2 %v4936_v14  ;;  %2072 = vmatpush.bf16.msrb.mxu3 %v5064_v16  ;;  %v6703_v63 = vld [vmem:[#allocation8 + $0x34c] sm:$0xf0]  ;;  %v4872_v4 = vor.u32 %v6671_v60, %v4871_v59  ;;  %v5287_v14 = vld [vmem:[#allocation8 + $0x580] sm:$0xf] }
  0x5f   :  { %2097 = vmatpush.bf16.msra.mxu1 %v5336_v52  ;;  %v6747_v1 = vld [vmem:[#allocation8 + $0x4ac] sm:$0xf0]  ;;  %v5000_v5 = vor.u32 %v6703_v63, %v4999_v61  ;;  %v5143_v24 = vld [vmem:[#allocation8 + $0x460] sm:$0xf] }
  0x60   :  { %2084 = vmatpush.bf16.msra.mxu0 %v5208_v47  ;;  %v6779_v3 = vld [vmem:[#allocation8 + $0x5ac] sm:$0xf0]  ;;  %v5176_v6 = vor.u32 %v6747_v1, %v5175_v0  ;;  %v5271_v26 = vld [vmem:[#allocation8 + $0x560] sm:$0xf] }
  0x61   :  { %v6667_v8 = vld [vmem:[#allocation8 + $0x22c] sm:$0xf0]  ;;  %v5304_v10 = vor.u32 %v6779_v3, %v5303_v2  ;;  %v5463_v28 = vld [vmem:[#allocation8 + $0x6e0] sm:$0xf] }
  0x62   :  { %2060 = vmatpush.bf16.msrb.mxu2 %v4920_v29  ;;  %2073 = vmatpush.bf16.msrb.mxu3 %v5048_v33  ;;  %v6699_v11 = vld [vmem:[#allocation8 + $0x32c] sm:$0xf0]  ;;  %v4856_v16 = vor.u32 %v6667_v8, %v4855_v7  ;;  %v5591_v31 = vld [vmem:[#allocation8 + $0x7e0] sm:$0xf] }
  0x63   :  { %2098 = vmatpush.bf16.msra.mxu1 %v5320_v62  ;;  %v6743_v13 = vld [vmem:[#allocation8 + $0x48c] sm:$0xf0]  ;;  %v4984_v18 = vor.u32 %v6699_v11, %v4983_v9  ;;  %v5127_v37 = vld [vmem:[#allocation8 + $0x440] sm:$0xf] }
  0x64   :  { %2085 = vmatpush.bf16.msra.mxu0 %v5192_v58  ;;  %v6775_v15 = vld [vmem:[#allocation8 + $0x58c] sm:$0xf0]  ;;  %v5160_v19 = vor.u32 %v6743_v13, %v5159_v12  ;;  %v5255_v39 = vld [vmem:[#allocation8 + $0x540] sm:$0xf] }
  0x65   :  { %v6663_v20 = vld [vmem:[#allocation8 + $0x20c] sm:$0xf0]  ;;  %v5288_v23 = vor.u32 %v6775_v15, %v5287_v14  ;;  %v5447_v42 = vld [vmem:[#allocation8 + $0x6c0] sm:$0xf] }
  0x66   :  { %2061 = vmatpush.bf16.msrb.mxu2 %v4904_v44  ;;  %2074 = vmatpush.bf16.msrb.mxu3 %v5032_v46  ;;  %v6695_v22 = vld [vmem:[#allocation8 + $0x30c] sm:$0xf0]  ;;  %v4840_v30 = vor.u32 %v6663_v20, %v4839_v17  ;;  %v5575_v44 = vld [vmem:[#allocation8 + $0x7c0] sm:$0xf] }
  0x67   :  { %2099 = vmatpush.bf16.msra.mxu1 %v5304_v10  ;;  %v6739_v25 = vld [vmem:[#allocation8 + $0x46c] sm:$0xf0]  ;;  %v4968_v33 = vor.u32 %v6695_v22, %v4967_v21  ;;  %v5111_v51 = vld [vmem:[#allocation8 + $0x420] sm:$0xf] }
  0x68   :  { %2086 = vmatpush.bf16.msra.mxu0 %v5176_v6  ;;  %v6771_v27 = vld [vmem:[#allocation8 + $0x56c] sm:$0xf0]  ;;  %v5144_v34 = vor.u32 %v6739_v25, %v5143_v24  ;;  %v5239_v54 = vld [vmem:[#allocation8 + $0x520] sm:$0xf] }
  0x69   :  { %v6819_v29 = vld [vmem:[#allocation8 + $0x6ec] sm:$0xf0]  ;;  %v5272_v35 = vor.u32 %v6771_v27, %v5271_v26  ;;  %v5431_v55 = vld [vmem:[#allocation8 + $0x6a0] sm:$0xf] }
  0x6a   :  { %2062 = vmatpush.bf16.msrb.mxu2 %v4888_v56  ;;  %2075 = vmatpush.bf16.msrb.mxu3 %v5016_v57  ;;  %v6851_v32 = vld [vmem:[#allocation8 + $0x7ec] sm:$0xf0]  ;;  %v5464_v36 = vor.u32 %v6819_v29, %v5463_v28  ;;  %v5559_v58 = vld [vmem:[#allocation8 + $0x7a0] sm:$0xf] }
  0x6b   :  { %2100 = vmatpush.bf16.msra.mxu1 %v5288_v23  ;;  %v6735_v38 = vld [vmem:[#allocation8 + $0x44c] sm:$0xf0]  ;;  %v5592_v40 = vor.u32 %v6851_v32, %v5591_v31  ;;  %v5095_v62 = vld [vmem:[#allocation8 + $0x400] sm:$0xf] }
  0x6c   :  { %2087 = vmatpush.bf16.msra.mxu0 %v5160_v19  ;;  %v6767_v41 = vld [vmem:[#allocation8 + $0x54c] sm:$0xf0]  ;;  %v5128_v46 = vor.u32 %v6735_v38, %v5127_v37  ;;  %v5223_v0 = vld [vmem:[#allocation8 + $0x500] sm:$0xf] }
  0x6d   :  { %v6815_v43 = vld [vmem:[#allocation8 + $0x6cc] sm:$0xf0]  ;;  %v5256_v47 = vor.u32 %v6767_v41, %v5255_v39  ;;  %v5415_v3 = vld [vmem:[#allocation8 + $0x680] sm:$0xf]  ;;  %v4697_v41 = vld [vmem:[#allocation8 + $0xf0] sm:$0xf0] }
  0x6e   :  { %2063 = vmatpush.bf16.msrb.mxu2 %v4872_v4  ;;  %2076 = vmatpush.bf16.msrb.mxu3 %v5000_v5  ;;  %v6847_v45 = vld [vmem:[#allocation8 + $0x7cc] sm:$0xf0]  ;;  %v5448_v48 = vor.u32 %v6815_v43, %v5447_v42  ;;  %v5543_v7 = vld [vmem:[#allocation8 + $0x780] sm:$0xf]  ;;  %v6657_v43 = vld [vmem:[#allocation8 + $0x1e4] sm:$0xf] }
  0x6f   :  { %2101 = vmatpush.bf16.msra.mxu1 %v5272_v35  ;;  %v5576_v49 = vor.u32 %v6847_v45, %v5575_v44  ;;  %v6731_v52 = vld [vmem:[#allocation8 + $0x42c] sm:$0xf0]  ;;  %v5399_v10 = vld [vmem:[#allocation8 + $0x660] sm:$0xf]  ;;  %v4825_v44 = vld [vmem:[#allocation8 + $0x1f0] sm:$0xf0] }
  0x70   :  { %2088 = vmatpush.bf16.msra.mxu0 %v5144_v34  ;;  %v5112_v53 = vor.u32 %v6731_v52, %v5111_v51  ;;  %v6763_v50 = vld [vmem:[#allocation8 + $0x52c] sm:$0xf0]  ;;  %v5527_v12 = vld [vmem:[#allocation8 + $0x760] sm:$0xf]  ;;  %v7452_v34 = vld [vmem:[#allocation7] sm:$0xff]  ;;  %v4828_v52 = vor.u32 %v6657_v43, %v4825_v44 }
  0x71   :  { %v5240_v56 = vor.u32 %v6763_v50, %v5239_v54  ;;  %v6811_v57 = vld [vmem:[#allocation8 + $0x6ac] sm:$0xf0]  ;;  %v5367_v22 = vld [vmem:[#allocation8 + $0x620] sm:$0xf]  ;;  %v186_v35 = vperm.slane %v7452_v34, 0 }
  0x72   :  { %2064 = vmatpush.bf16.msrb.mxu2 %v4856_v16  ;;  %2077 = vmatpush.bf16.msrb.mxu3 %v4984_v18  ;;  %v6843_v59 = vld [vmem:[#allocation8 + $0x7ac] sm:$0xf0]  ;;  %v5432_v60 = vor.u32 %v6811_v57, %v5431_v55  ;;  %v5383_v16 = vld [vmem:[#allocation8 + $0x640] sm:$0xf]  ;;  %v4681_v54 = vld [vmem:[#allocation8 + $0xd0] sm:$0xf0] }
  0x73   :  { %2102 = vmatpush.bf16.msra.mxu1 %v5256_v47  ;;  %v5560_v61 = vor.u32 %v6843_v59, %v5559_v58  ;;  %v6727_v63 = vld [vmem:[#allocation8 + $0x40c] sm:$0xf0]  ;;  %v5511_v18 = vld [vmem:[#allocation8 + $0x740] sm:$0xf]  ;;  %v6653_v55 = vld [vmem:[#allocation8 + $0x1c4] sm:$0xf] }
  0x74   :  { %2089 = vmatpush.bf16.msra.mxu0 %v5128_v46  ;;  %v5096_v1 = vor.u32 %v6727_v63, %v5095_v62  ;;  %v6759_v2 = vld [vmem:[#allocation8 + $0x50c] sm:$0xf0]  ;;  %v5495_v24 = vld [vmem:[#allocation8 + $0x720] sm:$0xf]  ;;  %v190_v57 = vperm.slane %v7452_v34, 4 }
  0x75   :  { %v6807_v4 = vld [vmem:[#allocation8 + $0x68c] sm:$0xf0]  ;;  %v5224_v5 = vor.u32 %v6759_v2, %v5223_v0  ;;  %v5351_v28 = vld [vmem:[#allocation8 + $0x600] sm:$0xf]  ;;  %v6617_v63 = vld [vmem:[#allocation8 + $0xa4] sm:$0xf] }
  0x76   :  { %2065 = vmatpush.bf16.msrb.mxu2 %v4840_v30  ;;  %2078 = vmatpush.bf16.msrb.mxu3 %v4968_v33  ;;  %v5416_v6 = vor.u32 %v6807_v4, %v5415_v3  ;;  %v6839_v8 = vld [vmem:[#allocation8 + $0x78c] sm:$0xf0]  ;;  %v5479_v30 = vld [vmem:[#allocation8 + $0x700] sm:$0xf]  ;;  %v4665_v0 = vld [vmem:[#allocation8 + $0xb0] sm:$0xf0] }
  0x77   :  { %2103 = vmatpush.bf16.msra.mxu1 %v5240_v56  ;;  %v5544_v9 = vor.u32 %v6839_v8, %v5543_v7  ;;  %v6803_v11 = vld [vmem:[#allocation8 + $0x66c] sm:$0xf0]  ;;  %v4809_v56 = vld [vmem:[#allocation8 + $0x1d0] sm:$0xf0]  ;;  %v6637_v44 = vld [vmem:[#allocation8 + $0x144] sm:$0xf] }
  0x78   :  { %2090 = vmatpush.bf16.msra.mxu0 %v5112_v53  ;;  %v5400_v13 = vor.u32 %v6803_v11, %v5399_v10  ;;  %v6835_v14 = vld [vmem:[#allocation8 + $0x76c] sm:$0xf0]  ;;  %v6621_v53 = vld [vmem:[#allocation8 + $0xc4] sm:$0xf]  ;;  %v4812_v62 = vor.u32 %v6653_v55, %v4809_v56  ;;  %v4793_v2 = vld [vmem:[#allocation8 + $0x1b0] sm:$0xf0] }
  0x79   :  { %v5528_v15 = vor.u32 %v6835_v14, %v5527_v12  ;;  %v6799_v17 = vld [vmem:[#allocation8 + $0x64c] sm:$0xf0]  ;;  %v4684_v59 = vor.u32 %v6621_v53, %v4681_v54  ;;  %v6613_v10 = vld [vmem:[#allocation8 + $0x84] sm:$0xf]  ;;  %v4649_v11 = vld [vmem:[#allocation8 + $0x90] sm:$0xf0] }
  0x7a   :  { %2110 = vmatpush.bf16.msra.mxu2 %v5464_v36  ;;  %2123 = vmatpush.bf16.msra.mxu3 %v5592_v40  ;;  %v5384_v19 = vor.u32 %v6799_v17, %v5383_v16  ;;  %v6831_v20 = vld [vmem:[#allocation8 + $0x74c] sm:$0xf0]  ;;  %v187_v36 = vperm.slane %v7452_v34, 1  ;;  %v6625_v40 = vld [vmem:[#allocation8 + $0xe4] sm:$0xf]  ;;  %v189_v12 = vperm.slane %v7452_v34, 3 }
  0x7b   :  { %2104 = vmatpush.bf16.msra.mxu1 %v5224_v5  ;;  %v5512_v21 = vor.u32 %v6831_v20, %v5511_v18  ;;  %v6795_v23 = vld [vmem:[#allocation8 + $0x62c] sm:$0xf0]  ;;  %v4668_v5 = vor.u32 %v6617_v63, %v4665_v0  ;;  %v4777_v14 = vld [vmem:[#allocation8 + $0x190] sm:$0xf0]  ;;  %v4652_v18 = vor.u32 %v6613_v10, %v4649_v11  ;;  %v6601_v56 = vld [vmem:[#allocation8 + $0x24] sm:$0xf] }
  0x7c   :  { %2091 = vmatpush.bf16.msra.mxu0 %v5096_v1  ;;  %v6827_v25 = vld [vmem:[#allocation8 + $0x72c] sm:$0xf0]  ;;  %v5368_v26 = vor.u32 %v6795_v23, %v5367_v22  ;;  %v6649_v1 = vld [vmem:[#allocation8 + $0x1a4] sm:$0xf]  ;;  %v4633_v23 = vld [vmem:[#allocation8 + $0x70] sm:$0xf0] }
  0x7d   :  { %v5496_v27 = vor.u32 %v6827_v25, %v5495_v24  ;;  %v6791_v29 = vld [vmem:[#allocation8 + $0x60c] sm:$0xf0]  ;;  %v4796_v8 = vor.u32 %v6649_v1, %v4793_v2  ;;  %v6609_v22 = vld [vmem:[#allocation8 + $0x64] sm:$0xf]  ;;  %v4921_v63 = vld [vmem:[#allocation8 + $0x2b0] sm:$0xf0] }
  0x7e   :  { %2111 = vmatpush.bf16.msra.mxu2 %v5448_v48  ;;  %2124 = vmatpush.bf16.msra.mxu3 %v5576_v49  ;;  %v5352_v31 = vor.u32 %v6791_v29, %v5351_v28  ;;  %v6823_v32 = vld [vmem:[#allocation8 + $0x70c] sm:$0xf0]  ;;  %v4700_v48 = vor.u32 %v6625_v40, %v4697_v41  ;;  %v6641_v24 = vld [vmem:[#allocation8 + $0x164] sm:$0xf]  ;;  %v4953_v28 = vld [vmem:[#allocation8 + $0x2f0] sm:$0xf0] }
  0x7f   :  { %v5480_v33 = vor.u32 %v6823_v32, %v5479_v30  ;;  %v5081_v32 = vld [vmem:[#allocation8 + $0x3f0] sm:$0xf0]  ;;  %v6713_v0 = vld [vmem:[#allocation8 + $0x3a4] sm:$0xf]  ;;  %v192_v2 = vperm.slane %v7452_v34, 6 }
  0x80   :  { %v4617_v40 = vld [vmem:[#allocation8 + $0x50] sm:$0xf0] }
  0x81   :  { %v5049_v1 = vld [vmem:[#allocation8 + $0x3b0] sm:$0xf0] }
  0x82   :  { %2112 = vmatpush.bf16.msra.mxu2 %v5432_v60  ;;  %2125 = vmatpush.bf16.msra.mxu3 %v5560_v61  ;;  %v191_v60 = vperm.slane %v7452_v34, 5  ;;  %v5052_v10 = vor.u32 %v6713_v0, %v5049_v1  ;;  %v4713_v11 = vld [vmem:[#allocation8 + $0x110] sm:$0xf0]  ;;  %v6665_v0 = vld [vmem:[#allocation8 + $0x224] sm:$0xf] }
  0x83   :  { %v4857_v1 = vld [vmem:[#allocation8 + $0x230] sm:$0xf0] }
  0x86   :  { %2113 = vmatpush.bf16.msra.mxu2 %v5416_v6  ;;  %2126 = vmatpush.bf16.msra.mxu3 %v5544_v9  ;;  %v188_v9 = vperm.slane %v7452_v34, 2 }
  0x8a   :  { %2114 = vmatpush.bf16.msra.mxu2 %v5400_v13  ;;  %2127 = vmatpush.bf16.msra.mxu3 %v5528_v15  ;;  %v6645_v13 = vld [vmem:[#allocation8 + $0x184] sm:$0xf] }
  0x8e   :  { %2115 = vmatpush.bf16.msra.mxu2 %v5384_v19  ;;  %2128 = vmatpush.bf16.msra.mxu3 %v5512_v21  ;;  %v4780_v21 = vor.u32 %v6645_v13, %v4777_v14  ;;  %v4905_v13 = vld [vmem:[#allocation8 + $0x290] sm:$0xf0]  ;;  %v6709_v14 = vld [vmem:[#allocation8 + $0x384] sm:$0xf] }
  0x92   :  { %2116 = vmatpush.bf16.msra.mxu2 %v5368_v26  ;;  %2129 = vmatpush.bf16.msra.mxu3 %v5496_v27  ;;  %v4761_v26 = vld [vmem:[#allocation8 + $0x170] sm:$0xf0]  ;;  %v6689_v27 = vld [vmem:[#allocation8 + $0x2e4] sm:$0xf] }
  0x96   :  { %2117 = vmatpush.bf16.msra.mxu2 %v5352_v31  ;;  %2130 = vmatpush.bf16.msra.mxu3 %v5480_v33  ;;  %v6721_v31 = vld [vmem:[#allocation8 + $0x3e4] sm:$0xf] }
  0x97   :  { %v5084_v43 = vor.u32 %v6721_v31, %v5081_v32  ;;  %v5017_v31 = vld [vmem:[#allocation8 + $0x370] sm:$0xf0] }
  0xbc   :  { %v375_v37 = vpop.f32.mrf.mxu2  ;;  %v388_v39 = vpop.f32.mrf.mxu3 }
  0xbd   :  { %v376_v38 = vadd.f32 %v375_v37, %v186_v35  ;;  %v389_v42 = vadd.f32 %v388_v39, %v187_v36  ;;  %v427_v45 = vpop.f32.mrf.mxu0  ;;  %v440_v49 = vpop.f32.mrf.mxu1  ;;  %v4636_v37 = vor.u32 %v6609_v22, %v4633_v23  ;;  %v6605_v39 = vld [vmem:[#allocation8 + $0x44] sm:$0xf] }
  0xbe   :  { %v428_v4 = vadd.f32 %v427_v45, %v190_v57  ;;  %v441_v6 = vadd.f32 %v440_v49, %v191_v60  ;;  %v4745_v45 = vld [vmem:[#allocation8 + $0x150] sm:$0xf0]  ;;  %v4620_v54 = vor.u32 %v6605_v39, %v4617_v40  ;;  %v6633_v60 = vld [vmem:[#allocation8 + $0x124] sm:$0xf] }
  0xbf   :  { %v470_v46 = vmax.f32 %v376_v38, 0.0  ;;  %v471_v47 = vmax.f32 %v389_v42, 0.0  ;;  %v4764_v38 = vor.u32 %v6641_v24, %v4761_v26  ;;  %v4956_v42 = vor.u32 %v6689_v27, %v4953_v28  ;;  %v5065_v49 = vld [vmem:[#allocation8 + $0x3d0] sm:$0xf0]  ;;  %v6673_v24 = vld [vmem:[#allocation8 + $0x264] sm:$0xf] }
  0xc0   :  { %v474_v15 = vmax.f32 %v428_v4, 0.0  ;;  %v475_v17 = vmax.f32 %v441_v6, 0.0  ;;  %v4748_v55 = vor.u32 %v6637_v44, %v4745_v45  ;;  %v4601_v57 = vld [vmem:[#allocation8 + $0x30] sm:$0xf0]  ;;  %v6597_v6 = vld [vmem:[#allocation8 + $0x4] sm:$0xf] }
  0xc1   :  { %v7456_v51 = vpack.c.bf16 %v470_v46, %v470_v46  ;;  %v7458_v50 = vpack.c.bf16 %v471_v47, %v471_v47  ;;  %v6685_v46 = vld [vmem:[#allocation8 + $0x2c4] sm:$0xf]  ;;  %v4937_v47 = vld [vmem:[#allocation8 + $0x2d0] sm:$0xf0]  ;;  %v4604_v4 = vor.u32 %v6601_v56, %v4601_v57 }
  0xc2   :  { %v7466_v30 = vpack.c.bf16 %v474_v15, %v474_v15  ;;  %v7468_v35 = vpack.c.bf16 %v475_v17, %v475_v17  ;;  %v5033_v15 = vld [vmem:[#allocation8 + $0x390] sm:$0xf0]  ;;  %v6745_v56 = vld [vmem:[#allocation8 + $0x4a4] sm:$0xf] }
  0xc3   :  { %2040 = vmatmul.bf16.vlgmr.msrb.gmra.mxu0 %v7456_v51  ;;  %2053 = vmatmul.bf16.vlgmr.msrb.gmra.mxu1 %v7458_v50  ;;  %v5036_v27 = vor.u32 %v6709_v14, %v5033_v15  ;;  %v4889_v28 = vld [vmem:[#allocation8 + $0x270] sm:$0xf0]  ;;  %v6693_v14 = vld [vmem:[#allocation8 + $0x304] sm:$0xf] }
  0xc4   :  { %2136 = vmatpush.bf16.msrb.mxu0 %v4700_v48  ;;  %v377_v58 = vpop.f32.mrf.mxu2  ;;  %2149 = vmatpush.bf16.msrb.mxu1 %v4828_v52  ;;  %v390_v61 = vpop.f32.mrf.mxu3  ;;  %v6717_v48 = vld [vmem:[#allocation8 + $0x3c4] sm:$0xf]  ;;  %v5193_v39 = vld [vmem:[#allocation8 + $0x4d0] sm:$0xf0] }
  0xc5   :  { %v429_v3 = vpop.f32.mrf.mxu0  ;;  %v442_v7 = vpop.f32.mrf.mxu1  ;;  %v4940_v58 = vor.u32 %v6685_v46, %v4937_v47  ;;  %v4729_v61 = vld [vmem:[#allocation8 + $0x130] sm:$0xf0]  ;;  %v4892_v46 = vor.u32 %v6673_v24, %v4889_v28 }
  0xc6   :  { %v193_v3 = vperm.slane %v7452_v34, 7  ;;  %v4585_v7 = vld [vmem:[#allocation8 + $0x10] sm:$0xf0]  ;;  %v6785_v34 = vld [vmem:[#allocation8 + $0x5e4] sm:$0xf] }
  0xc7   :  { %v4588_v22 = vor.u32 %v6597_v6, %v4585_v7  ;;  %v5177_v57 = vld [vmem:[#allocation8 + $0x4b0] sm:$0xf0]  ;;  %v6741_v6 = vld [vmem:[#allocation8 + $0x484] sm:$0xf] }
  0xc8   :  { %2137 = vmatpush.bf16.msrb.mxu0 %v4684_v59  ;;  %2150 = vmatpush.bf16.msrb.mxu1 %v4812_v62  ;;  %v5068_v59 = vor.u32 %v6717_v48, %v5065_v49  ;;  %v6681_v62 = vld [vmem:[#allocation8 + $0x2a4] sm:$0xf]  ;;  %v4873_v49 = vld [vmem:[#allocation8 + $0x250] sm:$0xf0] }
  0xc9   :  { %v6669_v48 = vld [vmem:[#allocation8 + $0x244] sm:$0xf]  ;;  %v5161_v7 = vld [vmem:[#allocation8 + $0x490] sm:$0xf0] }
  0xca   :  { %v5164_v15 = vor.u32 %v6741_v6, %v5161_v7  ;;  %v5593_v24 = vld [vmem:[#allocation8 + $0x7f0] sm:$0xf0]  ;;  %v6837_v6 = vld [vmem:[#allocation8 + $0x784] sm:$0xf] }
  0xcb   :  { %v5545_v7 = vld [vmem:[#allocation8 + $0x790] sm:$0xf0] }
  0xcc   :  { %2138 = vmatpush.bf16.msrb.mxu0 %v4668_v5  ;;  %v401_v16 = vpop.f32.mrf.mxu2  ;;  %2151 = vmatpush.bf16.msrb.mxu1 %v4796_v8  ;;  %v414_v20 = vpop.f32.mrf.mxu3  ;;  %v4732_v5 = vor.u32 %v6633_v60, %v4729_v61  ;;  %v6629_v8 = vld [vmem:[#allocation8 + $0x104] sm:$0xf] }
  0xcd   :  { %v402_v19 = vadd.f32 %v401_v16, %v188_v9  ;;  %v415_v25 = vadd.f32 %v414_v20, %v189_v12  ;;  %v4924_v9 = vor.u32 %v6681_v62, %v4921_v63  ;;  %v6677_v12 = vld [vmem:[#allocation8 + $0x284] sm:$0xf]  ;;  %v4716_v23 = vor.u32 %v6629_v8, %v4713_v11 }
  0xce   :  { %v6753_v16 = vld [vmem:[#allocation8 + $0x4e4] sm:$0xf]  ;;  %v4908_v26 = vor.u32 %v6677_v12, %v4905_v13  ;;  %v4876_v62 = vor.u32 %v6669_v48, %v4873_v49  ;;  %v4841_v13 = vld [vmem:[#allocation8 + $0x210] sm:$0xf0] }
  0xcf   :  { %v472_v29 = vmax.f32 %v402_v19, 0.0  ;;  %v473_v33 = vmax.f32 %v415_v25, 0.0  ;;  %v5337_v19 = vld [vmem:[#allocation8 + $0x5f0] sm:$0xf0]  ;;  %v6773_v8 = vld [vmem:[#allocation8 + $0x584] sm:$0xf] }
  0xd0   :  { %2139 = vmatpush.bf16.msrb.mxu0 %v4652_v18  ;;  %2152 = vmatpush.bf16.msrb.mxu1 %v4780_v21  ;;  %v5209_v18 = vld [vmem:[#allocation8 + $0x4f0] sm:$0xf0]  ;;  %v6661_v12 = vld [vmem:[#allocation8 + $0x204] sm:$0xf] }
  0xd1   :  { %v7470_v36 = vpack.c.bf16 %v472_v29, %v472_v29  ;;  %v7472_v41 = vpack.c.bf16 %v473_v33, %v473_v33  ;;  %v6705_v29 = vld [vmem:[#allocation8 + $0x364] sm:$0xf]  ;;  %v5212_v33 = vor.u32 %v6753_v16, %v5209_v18  ;;  %v5113_v49 = vld [vmem:[#allocation8 + $0x430] sm:$0xf0] }
  0xd2   :  { %v5020_v47 = vor.u32 %v6705_v29, %v5017_v31  ;;  %v6737_v18 = vld [vmem:[#allocation8 + $0x464] sm:$0xf]  ;;  %v5129_v31 = vld [vmem:[#allocation8 + $0x450] sm:$0xf0] }
  0xd3   :  { %2066 = vmatmul.bf16.vlgmr.msrb.gmra.mxu2 %v7470_v36  ;;  %2092 = vmatmul.bf16.vlgmr.msra.gmra.mxu0 %v7466_v30  ;;  %v6733_v29 = vld [vmem:[#allocation8 + $0x444] sm:$0xf] }
  0xd4   :  { %2079 = vmatmul.bf16.vlgmr.msrb.gmra.mxu3 %v7472_v41  ;;  %2105 = vmatmul.bf16.vlgmr.msra.gmra.mxu1 %v7468_v35  ;;  %v403_v52 = vpop.f32.mrf.mxu2  ;;  %v416_v53 = vpop.f32.mrf.mxu3  ;;  %v6729_v48 = vld [vmem:[#allocation8 + $0x424] sm:$0xf] }
  0xd5   :  { %2140 = vmatpush.bf16.msrb.mxu0 %v4636_v37  ;;  %2153 = vmatpush.bf16.msrb.mxu1 %v4764_v38  ;;  %v5340_v37 = vor.u32 %v6785_v34, %v5337_v19  ;;  %v6749_v38 = vld [vmem:[#allocation8 + $0x4c4] sm:$0xf]  ;;  %v5145_v34 = vld [vmem:[#allocation8 + $0x470] sm:$0xf0] }
  0xd6   :  { %2162 = vmatpush.bf16.msrb.mxu2 %v4956_v42  ;;  %2175 = vmatpush.bf16.msrb.mxu3 %v5084_v43  ;;  %v6781_v42 = vld [vmem:[#allocation8 + $0x5c4] sm:$0xf]  ;;  %v5321_v43 = vld [vmem:[#allocation8 + $0x5d0] sm:$0xf0]  ;;  %v5196_v52 = vor.u32 %v6749_v38, %v5193_v39 }
  0xd7   :  { %v5324_v53 = vor.u32 %v6781_v42, %v5321_v43  ;;  %v6769_v19 = vld [vmem:[#allocation8 + $0x564] sm:$0xf]  ;;  %v5257_v38 = vld [vmem:[#allocation8 + $0x550] sm:$0xf0] }
  0xd8   :  { %v6813_v39 = vld [vmem:[#allocation8 + $0x6c4] sm:$0xf]  ;;  %v5577_v43 = vld [vmem:[#allocation8 + $0x7d0] sm:$0xf0] }
  0xd9   :  { %2141 = vmatpush.bf16.msrb.mxu0 %v4620_v54  ;;  %2154 = vmatpush.bf16.msrb.mxu1 %v4748_v55  ;;  %v6701_v54 = vld [vmem:[#allocation8 + $0x344] sm:$0xf]  ;;  %v5001_v55 = vld [vmem:[#allocation8 + $0x350] sm:$0xf0] }
  0xda   :  { %2163 = vmatpush.bf16.msrb.mxu2 %v4940_v58  ;;  %2176 = vmatpush.bf16.msrb.mxu3 %v5068_v59  ;;  %v6777_v58 = vld [vmem:[#allocation8 + $0x5a4] sm:$0xf]  ;;  %v5305_v59 = vld [vmem:[#allocation8 + $0x5b0] sm:$0xf0]  ;;  %v5004_v63 = vor.u32 %v6701_v54, %v5001_v55 }
  0xdb   :  { %v6845_v42 = vld [vmem:[#allocation8 + $0x7c4] sm:$0xf]  ;;  %v5241_v55 = vld [vmem:[#allocation8 + $0x530] sm:$0xf0] }
  0xdc   :  { %v453_v17 = vpop.f32.mrf.mxu2  ;;  %v466_v21 = vpop.f32.mrf.mxu3  ;;  %v6761_v54 = vld [vmem:[#allocation8 + $0x524] sm:$0xf] }
  0xdd   :  { %2142 = vmatpush.bf16.msrb.mxu0 %v4604_v4  ;;  %2155 = vmatpush.bf16.msrb.mxu1 %v4732_v5  ;;  %v454_v20 = vadd.f32 %v453_v17, %v192_v2  ;;  %v467_v25 = vadd.f32 %v466_v21, %v193_v3  ;;  %v5180_v2 = vor.u32 %v6745_v56, %v5177_v57  ;;  %v6697_v4 = vld [vmem:[#allocation8 + $0x324] sm:$0xf]  ;;  %v4985_v5 = vld [vmem:[#allocation8 + $0x330] sm:$0xf0] }
  0xde   :  { %2164 = vmatpush.bf16.msrb.mxu2 %v4924_v9  ;;  %2177 = vmatpush.bf16.msrb.mxu3 %v5052_v10  ;;  %v5308_v3 = vor.u32 %v6777_v58, %v5305_v59  ;;  %v5289_v9 = vld [vmem:[#allocation8 + $0x590] sm:$0xf0]  ;;  %v4860_v10 = vor.u32 %v6665_v0, %v4857_v1  ;;  %v4988_v11 = vor.u32 %v6697_v4, %v4985_v5  ;;  %v6817_v21 = vld [vmem:[#allocation8 + $0x6e4] sm:$0xf] }
  0xdf   :  { %v476_v32 = vmax.f32 %v454_v20, 0.0  ;;  %v477_v40 = vmax.f32 %v467_v25, 0.0  ;;  %v5292_v16 = vor.u32 %v6773_v8, %v5289_v9  ;;  %v4969_v17 = vld [vmem:[#allocation8 + $0x310] sm:$0xf0]  ;;  %v4844_v25 = vor.u32 %v6661_v12, %v4841_v13  ;;  %v6809_v56 = vld [vmem:[#allocation8 + $0x6a4] sm:$0xf] }
  0xe0   :  { %v5273_v20 = vld [vmem:[#allocation8 + $0x570] sm:$0xf0]  ;;  %v6841_v58 = vld [vmem:[#allocation8 + $0x7a4] sm:$0xf]  ;;  %v4703_v8 = vld [vmem:[#allocation8 + $0xe8] sm:$0xf] }
  0xe1   :  { %v7480_v44 = vpack.c.bf16 %v476_v32, %v476_v32  ;;  %2143 = vmatpush.bf16.msrb.mxu0 %v4588_v22  ;;  %2156 = vmatpush.bf16.msrb.mxu1 %v4716_v23  ;;  %v7482_v45 = vpack.c.bf16 %v477_v40, %v477_v40  ;;  %v5465_v22 = vld [vmem:[#allocation8 + $0x6f0] sm:$0xf0]  ;;  %v6849_v23 = vld [vmem:[#allocation8 + $0x7e4] sm:$0xf]  ;;  %v5276_v28 = vor.u32 %v6769_v19, %v5273_v20  ;;  %v6628_v9 = vld [vmem:[#allocation8 + $0xf4] sm:$0xf0] }
  0xe2   :  { %2165 = vmatpush.bf16.msrb.mxu2 %v4908_v26  ;;  %2178 = vmatpush.bf16.msrb.mxu3 %v5036_v27  ;;  %v4972_v26 = vor.u32 %v6693_v14, %v4969_v17  ;;  %v5148_v27 = vor.u32 %v6737_v18, %v5145_v34  ;;  %v5468_v32 = vor.u32 %v6817_v21, %v5465_v22  ;;  %v5449_v40 = vld [vmem:[#allocation8 + $0x6d0] sm:$0xf0]  ;;  %v6757_v0 = vld [vmem:[#allocation8 + $0x504] sm:$0xf]  ;;  %v4687_v21 = vld [vmem:[#allocation8 + $0xc8] sm:$0xf] }
  0xe3   :  { %2118 = vmatmul.bf16.vlgmr.msra.gmra.mxu2 %v7480_v44  ;;  %v5433_v57 = vld [vmem:[#allocation8 + $0x6b0] sm:$0xf0]  ;;  %v6805_v4 = vld [vmem:[#allocation8 + $0x684] sm:$0xf]  ;;  %v4704_v18 = vor.u32 %v6628_v9, %v4703_v8  ;;  %v6624_v22 = vld [vmem:[#allocation8 + $0xd4] sm:$0xf0] }
  0xe4   :  { %2131 = vmatmul.bf16.vlgmr.msra.gmra.mxu3 %v7482_v45  ;;  %v455_v60 = vpop.f32.mrf.mxu2  ;;  %2144 = vmatmul.bf16.vlgmr.msrb.gmra.mxu0 %v7456_v51  ;;  %v468_v61 = vpop.f32.mrf.mxu3  ;;  %v5561_v59 = vld [vmem:[#allocation8 + $0x7b0] sm:$0xf0]  ;;  %v5436_v1 = vor.u32 %v6809_v56, %v5433_v57  ;;  %v6833_v19 = vld [vmem:[#allocation8 + $0x764] sm:$0xf]  ;;  %v4783_v56 = vld [vmem:[#allocation8 + $0x188] sm:$0xf] }
  0xe5   :  { %2188 = vmatpush.bf16.msra.mxu0 %v5212_v33  ;;  %2201 = vmatpush.bf16.msra.mxu1 %v5340_v37  ;;  %v5596_v33 = vor.u32 %v6849_v23, %v5593_v24  ;;  %v6765_v37 = vld [vmem:[#allocation8 + $0x544] sm:$0xf]  ;;  %v5116_v60 = vor.u32 %v6729_v48, %v5113_v49  ;;  %v5244_v61 = vor.u32 %v6761_v54, %v5241_v55  ;;  %v5417_v5 = vld [vmem:[#allocation8 + $0x690] sm:$0xf0]  ;;  %v4815_v23 = vld [vmem:[#allocation8 + $0x1c8] sm:$0xf] }
  0xe6   :  { %2157 = vmatmul.bf16.vlgmr.msrb.gmra.mxu1 %v7458_v50  ;;  %2166 = vmatpush.bf16.msrb.mxu2 %v4892_v46  ;;  %v5132_v46 = vor.u32 %v6733_v29, %v5129_v31  ;;  %v5420_v14 = vor.u32 %v6805_v4, %v5417_v5  ;;  %v5401_v17 = vld [vmem:[#allocation8 + $0x670] sm:$0xf0]  ;;  %v6656_v24 = vld [vmem:[#allocation8 + $0x1d4] sm:$0xf0]  ;;  %v4688_v29 = vor.u32 %v6624_v22, %v4687_v21  ;;  %v4655_v54 = vld [vmem:[#allocation8 + $0x88] sm:$0xf] }
  0xe7   :  { %2179 = vmatpush.bf16.msrb.mxu3 %v5020_v47  ;;  %v5260_v47 = vor.u32 %v6765_v37, %v5257_v38  ;;  %v5529_v20 = vld [vmem:[#allocation8 + $0x770] sm:$0xf0]  ;;  %v4816_v31 = vor.u32 %v6656_v24, %v4815_v23  ;;  %v4671_v37 = vld [vmem:[#allocation8 + $0xa8] sm:$0xf]  ;;  %v6620_v38 = vld [vmem:[#allocation8 + $0xb4] sm:$0xf0] }
  0xe8   :  { %v4672_v48 = vor.u32 %v6620_v38, %v4671_v37  ;;  %v6616_v55 = vld [vmem:[#allocation8 + $0x94] sm:$0xf0]  ;;  %v4767_v4 = vld [vmem:[#allocation8 + $0x168] sm:$0xf] }
  0xe9   :  { %2189 = vmatpush.bf16.msra.mxu0 %v5196_v52  ;;  %2202 = vmatpush.bf16.msra.mxu1 %v5324_v53  ;;  %v5452_v52 = vor.u32 %v6813_v39, %v5449_v40  ;;  %v5580_v53 = vor.u32 %v6845_v42, %v5577_v43  ;;  %v4799_v39 = vld [vmem:[#allocation8 + $0x1a8] sm:$0xf]  ;;  %v6652_v40 = vld [vmem:[#allocation8 + $0x1b4] sm:$0xf0] }
  0xea   :  { %2167 = vmatpush.bf16.msrb.mxu2 %v4876_v62  ;;  %v6725_v62 = vld [vmem:[#allocation8 + $0x404] sm:$0xf]  ;;  %v4800_v49 = vor.u32 %v6652_v40, %v4799_v39  ;;  %v6648_v57 = vld [vmem:[#allocation8 + $0x194] sm:$0xf0]  ;;  %v5087_v8 = vld [vmem:[#allocation8 + $0x3e8] sm:$0xf] }
  0xeb   :  { %2180 = vmatpush.bf16.msrb.mxu3 %v5004_v63  ;;  %v5097_v63 = vld [vmem:[#allocation8 + $0x410] sm:$0xf0]  ;;  %v6644_v5 = vld [vmem:[#allocation8 + $0x174] sm:$0xf0]  ;;  %v5071_v21 = vld [vmem:[#allocation8 + $0x3c8] sm:$0xf] }
  0xec   :  { %v5100_v12 = vor.u32 %v6725_v62, %v5097_v63  ;;  %v6821_v62 = vld [vmem:[#allocation8 + $0x704] sm:$0xf]  ;;  %v4656_v63 = vor.u32 %v6616_v55, %v4655_v54  ;;  %v6724_v9 = vld [vmem:[#allocation8 + $0x3f4] sm:$0xf0]  ;;  %v5055_v37 = vld [vmem:[#allocation8 + $0x3a8] sm:$0xf] }
  0xed   :  { %2190 = vmatpush.bf16.msra.mxu0 %v5180_v2  ;;  %2203 = vmatpush.bf16.msra.mxu1 %v5308_v3  ;;  %v5564_v2 = vor.u32 %v6841_v58, %v5561_v59  ;;  %v5225_v3 = vld [vmem:[#allocation8 + $0x510] sm:$0xf0]  ;;  %v6720_v22 = vld [vmem:[#allocation8 + $0x3d4] sm:$0xf0]  ;;  %v5039_v54 = vld [vmem:[#allocation8 + $0x388] sm:$0xf] }
  0xee   :  { %2168 = vmatpush.bf16.msrb.mxu2 %v4860_v10  ;;  %v4831_v10 = vld [vmem:[#allocation8 + $0x1e8] sm:$0xf]  ;;  %v5228_v13 = vor.u32 %v6757_v0, %v5225_v3  ;;  %v4784_v0 = vor.u32 %v6648_v57, %v4783_v56  ;;  %v6612_v3 = vld [vmem:[#allocation8 + $0x74] sm:$0xf0] }
  0xef   :  { %2181 = vmatpush.bf16.msrb.mxu3 %v4988_v11  ;;  %v6660_v11 = vld [vmem:[#allocation8 + $0x1f4] sm:$0xf0]  ;;  %v5215_v56 = vld [vmem:[#allocation8 + $0x4e8] sm:$0xf] }
  0xf0   :  { %v4832_v34 = vor.u32 %v6660_v11, %v4831_v10  ;;  %v6716_v38 = vld [vmem:[#allocation8 + $0x3b4] sm:$0xf0] }
  0xf1   :  { %2191 = vmatpush.bf16.msra.mxu0 %v5164_v15  ;;  %2204 = vmatpush.bf16.msra.mxu1 %v5292_v16  ;;  %v5548_v15 = vor.u32 %v6837_v6, %v5545_v7  ;;  %v6801_v16 = vld [vmem:[#allocation8 + $0x664] sm:$0xf]  ;;  %v4959_v6 = vld [vmem:[#allocation8 + $0x2e8] sm:$0xf]  ;;  %v6692_v7 = vld [vmem:[#allocation8 + $0x2f4] sm:$0xf0] }
  0xf2   :  { %2169 = vmatpush.bf16.msrb.mxu2 %v4844_v25  ;;  %v5404_v25 = vor.u32 %v6801_v16, %v5401_v17  ;;  %v4960_v16 = vor.u32 %v6692_v7, %v4959_v6  ;;  %v5088_v17 = vor.u32 %v6724_v9, %v5087_v8  ;;  %v6712_v55 = vld [vmem:[#allocation8 + $0x394] sm:$0xf0]  ;;  %v5199_v6 = vld [vmem:[#allocation8 + $0x4c8] sm:$0xf] }
  0xf3   :  { %2182 = vmatpush.bf16.msrb.mxu3 %v4972_v26  ;;  %v5532_v26 = vor.u32 %v6833_v19, %v5529_v20  ;;  %v4943_v19 = vld [vmem:[#allocation8 + $0x2c8] sm:$0xf]  ;;  %v6688_v20 = vld [vmem:[#allocation8 + $0x2d4] sm:$0xf0] }
  0xf4   :  { %v6756_v57 = vld [vmem:[#allocation8 + $0x4f4] sm:$0xf0]  ;;  %v5327_v8 = vld [vmem:[#allocation8 + $0x5c8] sm:$0xf] }
  0xf5   :  { %2192 = vmatpush.bf16.msra.mxu0 %v5148_v27  ;;  %2205 = vmatpush.bf16.msra.mxu1 %v5276_v28  ;;  %v6797_v27 = vld [vmem:[#allocation8 + $0x644] sm:$0xf]  ;;  %v5385_v28 = vld [vmem:[#allocation8 + $0x650] sm:$0xf0]  ;;  %v6752_v7 = vld [vmem:[#allocation8 + $0x4d4] sm:$0xf0] }
  0xf6   :  { %2214 = vmatpush.bf16.msra.mxu2 %v5468_v32  ;;  %2183 = vmatmul.bf16.vlgmr.msrb.gmra.mxu3 %v7472_v41  ;;  %v6829_v32 = vld [vmem:[#allocation8 + $0x744] sm:$0xf]  ;;  %v5388_v42 = vor.u32 %v6797_v27, %v5385_v28  ;;  %v4944_v27 = vor.u32 %v6688_v20, %v4943_v19  ;;  %v5072_v28 = vor.u32 %v6720_v22, %v5071_v21  ;;  %v6784_v9 = vld [vmem:[#allocation8 + $0x5d4] sm:$0xf0]  ;;  %v5311_v19 = vld [vmem:[#allocation8 + $0x5a8] sm:$0xf] }
  0xf7   :  { %2227 = vmatpush.bf16.msra.mxu3 %v5596_v33  ;;  %2170 = vmatmul.bf16.vlgmr.msrb.gmra.mxu2 %v7470_v36  ;;  %v5513_v33 = vld [vmem:[#allocation8 + $0x750] sm:$0xf0]  ;;  %v6780_v20 = vld [vmem:[#allocation8 + $0x5b4] sm:$0xf0] }
  0xf8   :  { %v5516_v43 = vor.u32 %v6829_v32, %v5513_v33  ;;  %v4927_v32 = vld [vmem:[#allocation8 + $0x2a8] sm:$0xf]  ;;  %v6684_v33 = vld [vmem:[#allocation8 + $0x2b4] sm:$0xf0] }
  0xf9   :  { %2193 = vmatpush.bf16.msra.mxu0 %v5132_v46  ;;  %2206 = vmatpush.bf16.msra.mxu1 %v5260_v47  ;;  %v6793_v46 = vld [vmem:[#allocation8 + $0x624] sm:$0xf]  ;;  %v5369_v47 = vld [vmem:[#allocation8 + $0x630] sm:$0xf0] }
  0xfa   :  { %2215 = vmatpush.bf16.msra.mxu2 %v5452_v52  ;;  %v6825_v52 = vld [vmem:[#allocation8 + $0x724] sm:$0xf]  ;;  %v5372_v58 = vor.u32 %v6793_v46, %v5369_v47  ;;  %v4719_v46 = vld [vmem:[#allocation8 + $0x108] sm:$0xf]  ;;  %v4928_v47 = vor.u32 %v6684_v33, %v4927_v32  ;;  %v6776_v33 = vld [vmem:[#allocation8 + $0x594] sm:$0xf0] }
  0xfb   :  { %2228 = vmatpush.bf16.msra.mxu3 %v5580_v53  ;;  %v5497_v53 = vld [vmem:[#allocation8 + $0x730] sm:$0xf0]  ;;  %v5295_v32 = vld [vmem:[#allocation8 + $0x588] sm:$0xf] }
  0xfc   :  { %v5500_v59 = vor.u32 %v6825_v52, %v5497_v53  ;;  %v4911_v52 = vld [vmem:[#allocation8 + $0x288] sm:$0xf]  ;;  %v6680_v53 = vld [vmem:[#allocation8 + $0x294] sm:$0xf0] }
  0xfd   :  { %2194 = vmatpush.bf16.msra.mxu0 %v5116_v60  ;;  %2207 = vmatpush.bf16.msra.mxu1 %v5244_v61  ;;  %v6789_v60 = vld [vmem:[#allocation8 + $0x604] sm:$0xf]  ;;  %v5353_v61 = vld [vmem:[#allocation8 + $0x610] sm:$0xf0] }
  0xfe   :  { %2216 = vmatpush.bf16.msra.mxu2 %v5436_v1  ;;  %v5481_v1 = vld [vmem:[#allocation8 + $0x710] sm:$0xf0]  ;;  %v5356_v10 = vor.u32 %v6789_v60, %v5353_v61 }
  0xff   :  { %2229 = vmatpush.bf16.msra.mxu3 %v5564_v2  ;;  %v4639_v2 = vld [vmem:[#allocation8 + $0x68] sm:$0xf]  ;;  %v5484_v11 = vor.u32 %v6821_v62, %v5481_v1  ;;  %v4912_v62 = vor.u32 %v6680_v53, %v4911_v52  ;;  %v6676_v1 = vld [vmem:[#allocation8 + $0x274] sm:$0xf0] }
 0x100   :  { %v5279_v52 = vld [vmem:[#allocation8 + $0x568] sm:$0xf]  ;;  %v6772_v53 = vld [vmem:[#allocation8 + $0x574] sm:$0xf0] }
 0x101   :  { %2195 = vmatpush.bf16.msra.mxu0 %v5100_v12  ;;  %2208 = vmatpush.bf16.msra.mxu1 %v5228_v13  ;;  %v4640_v12 = vor.u32 %v6612_v3, %v4639_v2  ;;  %v4768_v13 = vor.u32 %v6644_v5, %v4767_v4  ;;  %v5216_v2 = vor.u32 %v6756_v57, %v5215_v56  ;;  %v5023_v4 = vld [vmem:[#allocation8 + $0x368] sm:$0xf]  ;;  %v6708_v5 = vld [vmem:[#allocation8 + $0x374] sm:$0xf0] }
 0x102   :  { %2217 = vmatpush.bf16.msra.mxu2 %v5420_v14  ;;  %v4623_v14 = vld [vmem:[#allocation8 + $0x48] sm:$0xf]  ;;  %v6852_v57 = vld [vmem:[#allocation8 + $0x7f4] sm:$0xf0] }
 0x103   :  { %2230 = vmatpush.bf16.msra.mxu3 %v5548_v15  ;;  %v6608_v15 = vld [vmem:[#allocation8 + $0x54] sm:$0xf0]  ;;  %v5599_v56 = vld [vmem:[#allocation8 + $0x7e8] sm:$0xf] }
 0x104   :  { %2196 = vmatmul.bf16.vlgmr.msra.gmra.mxu0 %v7466_v30  ;;  %2209 = vmatmul.bf16.vlgmr.msra.gmra.mxu1 %v7468_v35  ;;  %v4624_v23 = vor.u32 %v6608_v15, %v4623_v14  ;;  %v5200_v14 = vor.u32 %v6752_v7, %v5199_v6  ;;  %v5328_v15 = vor.u32 %v6784_v9, %v5327_v8  ;;  %v5583_v6 = vld [vmem:[#allocation8 + $0x7c8] sm:$0xf]  ;;  %v6848_v7 = vld [vmem:[#allocation8 + $0x7d4] sm:$0xf0] }
 0x105   :  { %2240 = vmatpush.bf16.msrb.mxu0 %v4704_v18  ;;  %2253 = vmatpush.bf16.msrb.mxu1 %v4832_v34  ;;  %v4751_v18 = vld [vmem:[#allocation8 + $0x148] sm:$0xf]  ;;  %v6640_v34 = vld [vmem:[#allocation8 + $0x154] sm:$0xf0] }
 0x106   :  { %2218 = vmatpush.bf16.msra.mxu2 %v5404_v25  ;;  %v4752_v24 = vor.u32 %v6640_v34, %v4751_v18  ;;  %v4607_v25 = vld [vmem:[#allocation8 + $0x28] sm:$0xf]  ;;  %v6748_v34 = vld [vmem:[#allocation8 + $0x4b4] sm:$0xf0] }
 0x107   :  { %2231 = vmatpush.bf16.msra.mxu3 %v5532_v26  ;;  %v6604_v26 = vld [vmem:[#allocation8 + $0x34] sm:$0xf0]  ;;  %v5183_v18 = vld [vmem:[#allocation8 + $0x4a8] sm:$0xf] }
 0x108   :  { %v4608_v39 = vor.u32 %v6604_v26, %v4607_v25  ;;  %v5184_v25 = vor.u32 %v6748_v34, %v5183_v18  ;;  %v5312_v26 = vor.u32 %v6780_v20, %v5311_v19  ;;  %v5567_v18 = vld [vmem:[#allocation8 + $0x7a8] sm:$0xf]  ;;  %v6844_v34 = vld [vmem:[#allocation8 + $0x7b4] sm:$0xf0] }
 0x109   :  { %2241 = vmatpush.bf16.msrb.mxu0 %v4688_v29  ;;  %2254 = vmatpush.bf16.msrb.mxu1 %v4816_v31  ;;  %v4735_v29 = vld [vmem:[#allocation8 + $0x128] sm:$0xf]  ;;  %v6636_v31 = vld [vmem:[#allocation8 + $0x134] sm:$0xf0] }
 0x10a   :  { %2219 = vmatpush.bf16.msra.mxu2 %v5388_v42  ;;  %v4736_v40 = vor.u32 %v6636_v31, %v4735_v29  ;;  %v4591_v42 = vld [vmem:[#allocation8 + $0x8] sm:$0xf]  ;;  %v6744_v31 = vld [vmem:[#allocation8 + $0x494] sm:$0xf0] }
 0x10b   :  { %2232 = vmatpush.bf16.msra.mxu3 %v5516_v43  ;;  %v6600_v43 = vld [vmem:[#allocation8 + $0x14] sm:$0xf0]  ;;  %v5167_v29 = vld [vmem:[#allocation8 + $0x488] sm:$0xf] }
 0x10c   :  { %v4592_v60 = vor.u32 %v6600_v43, %v4591_v42  ;;  %v4975_v42 = vld [vmem:[#allocation8 + $0x308] sm:$0xf]  ;;  %v5168_v43 = vor.u32 %v6744_v31, %v5167_v29  ;;  %v6840_v31 = vld [vmem:[#allocation8 + $0x794] sm:$0xf0] }
 0x10d   :  { %2242 = vmatpush.bf16.msrb.mxu0 %v4672_v48  ;;  %2255 = vmatpush.bf16.msrb.mxu1 %v4800_v49  ;;  %v5056_v48 = vor.u32 %v6716_v38, %v5055_v37  ;;  %v6632_v49 = vld [vmem:[#allocation8 + $0x114] sm:$0xf0]  ;;  %v5551_v29 = vld [vmem:[#allocation8 + $0x788] sm:$0xf] }
 0x10e   :  { %2220 = vmatpush.bf16.msra.mxu2 %v5372_v58  ;;  %v5343_v58 = vld [vmem:[#allocation8 + $0x5e8] sm:$0xf]  ;;  %v4720_v61 = vor.u32 %v6632_v49, %v4719_v46  ;;  %v5296_v46 = vor.u32 %v6776_v33, %v5295_v32  ;;  %v6740_v49 = vld [vmem:[#allocation8 + $0x474] sm:$0xf0]  ;;  %v6626_v32 = vld [vmem:[#allocation8 + $0xec] sm:$0xf] }
 0x10f   :  { %2233 = vmatpush.bf16.msra.mxu3 %v5500_v59  ;;  %v6788_v59 = vld [vmem:[#allocation8 + $0x5f4] sm:$0xf0]  ;;  %v4705_v33 = vld [vmem:[#allocation8 + $0xf8] sm:$0xf0] }
 0x110   :  { %v5344_v3 = vor.u32 %v6788_v59, %v5343_v58 }
 0x111   :  { %2243 = vmatpush.bf16.msrb.mxu0 %v4656_v63  ;;  %2256 = vmatpush.bf16.msrb.mxu1 %v4784_v0  ;;  %v5040_v63 = vor.u32 %v6712_v55, %v5039_v54  ;;  %v4895_v0 = vld [vmem:[#allocation8 + $0x268] sm:$0xf]  ;;  %v6820_v55 = vld [vmem:[#allocation8 + $0x6f4] sm:$0xf0] }
 0x112   :  { %2221 = vmatpush.bf16.msra.mxu2 %v5356_v10  ;;  %v4896_v10 = vor.u32 %v6676_v1, %v4895_v0  ;;  %v5471_v54 = vld [vmem:[#allocation8 + $0x6e8] sm:$0xf]  ;;  %v5600_v1 = vor.u32 %v6852_v57, %v5599_v56  ;;  %v6654_v56 = vld [vmem:[#allocation8 + $0x1cc] sm:$0xf]  ;;  %v4817_v57 = vld [vmem:[#allocation8 + $0x1d8] sm:$0xf0] }
 0x113   :  { %2234 = vmatpush.bf16.msra.mxu3 %v5484_v11  ;;  %v5024_v11 = vor.u32 %v6708_v5, %v5023_v4  ;;  %v5472_v0 = vor.u32 %v6820_v55, %v5471_v54  ;;  %v5455_v4 = vld [vmem:[#allocation8 + $0x6c8] sm:$0xf]  ;;  %v6816_v5 = vld [vmem:[#allocation8 + $0x6d4] sm:$0xf0]  ;;  %v6622_v54 = vld [vmem:[#allocation8 + $0xcc] sm:$0xf] }
 0x114   :  { %v4689_v55 = vld [vmem:[#allocation8 + $0xd8] sm:$0xf0] }
 0x115   :  { %2244 = vmatpush.bf16.msrb.mxu0 %v4640_v12  ;;  %2257 = vmatpush.bf16.msrb.mxu1 %v4768_v13  ;;  %v4879_v12 = vld [vmem:[#allocation8 + $0x248] sm:$0xf]  ;;  %v6672_v13 = vld [vmem:[#allocation8 + $0x254] sm:$0xf0] }
 0x116   :  { %2266 = vmatpush.bf16.msrb.mxu2 %v4960_v16  ;;  %2235 = vmatmul.bf16.vlgmr.msra.gmra.mxu3 %v7482_v45  ;;  %v5007_v16 = vld [vmem:[#allocation8 + $0x348] sm:$0xf]  ;;  %v4880_v21 = vor.u32 %v6672_v13, %v4879_v12  ;;  %v5456_v12 = vor.u32 %v6816_v5, %v5455_v4  ;;  %v5584_v13 = vor.u32 %v6848_v7, %v5583_v6  ;;  %v4673_v5 = vld [vmem:[#allocation8 + $0xb8] sm:$0xf0]  ;;  %v6650_v6 = vld [vmem:[#allocation8 + $0x1ac] sm:$0xf] }
 0x117   :  { %2279 = vmatpush.bf16.msrb.mxu3 %v5088_v17  ;;  %2222 = vmatmul.bf16.vlgmr.msra.gmra.mxu2 %v7480_v44  ;;  %v6704_v17 = vld [vmem:[#allocation8 + $0x354] sm:$0xf0]  ;;  %v4801_v7 = vld [vmem:[#allocation8 + $0x1b8] sm:$0xf0] }
 0x118   :  { %v5008_v22 = vor.u32 %v6704_v17, %v5007_v16  ;;  %v5439_v16 = vld [vmem:[#allocation8 + $0x6a8] sm:$0xf]  ;;  %v6812_v17 = vld [vmem:[#allocation8 + $0x6b4] sm:$0xf0] }
 0x119   :  { %2245 = vmatpush.bf16.msrb.mxu0 %v4624_v23  ;;  %2258 = vmatpush.bf16.msrb.mxu1 %v4752_v24  ;;  %v4863_v23 = vld [vmem:[#allocation8 + $0x228] sm:$0xf]  ;;  %v6668_v24 = vld [vmem:[#allocation8 + $0x234] sm:$0xf0] }
 0x11a   :  { %2267 = vmatpush.bf16.msrb.mxu2 %v4944_v27  ;;  %v4991_v27 = vld [vmem:[#allocation8 + $0x328] sm:$0xf]  ;;  %v4864_v37 = vor.u32 %v6668_v24, %v4863_v23  ;;  %v5440_v24 = vor.u32 %v6812_v17, %v5439_v16 }
 0x11b   :  { %2280 = vmatpush.bf16.msrb.mxu3 %v5072_v28  ;;  %v6700_v28 = vld [vmem:[#allocation8 + $0x334] sm:$0xf0]  ;;  %v5231_v23 = vld [vmem:[#allocation8 + $0x508] sm:$0xf] }
 0x11c   :  { %v4992_v38 = vor.u32 %v6700_v28, %v4991_v27  ;;  %v5423_v27 = vld [vmem:[#allocation8 + $0x688] sm:$0xf]  ;;  %v6808_v28 = vld [vmem:[#allocation8 + $0x694] sm:$0xf0] }
 0x11d   :  { %2246 = vmatpush.bf16.msrb.mxu0 %v4608_v39  ;;  %2259 = vmatpush.bf16.msrb.mxu1 %v4736_v40  ;;  %v4847_v39 = vld [vmem:[#allocation8 + $0x208] sm:$0xf]  ;;  %v6664_v40 = vld [vmem:[#allocation8 + $0x214] sm:$0xf0] }
 0x11e   :  { %2268 = vmatpush.bf16.msrb.mxu2 %v4928_v47  ;;  %v6696_v47 = vld [vmem:[#allocation8 + $0x314] sm:$0xf0]  ;;  %v4848_v58 = vor.u32 %v6664_v40, %v4847_v39  ;;  %v5503_v17 = vld [vmem:[#allocation8 + $0x728] sm:$0xf] }
 0x11f   :  { %2281 = vmatpush.bf16.msrb.mxu3 %v5056_v48  ;;  %v5151_v48 = vld [vmem:[#allocation8 + $0x468] sm:$0xf]  ;;  %v4976_v59 = vor.u32 %v6696_v47, %v4975_v42  ;;  %v5424_v42 = vor.u32 %v6808_v28, %v5423_v27  ;;  %v6804_v47 = vld [vmem:[#allocation8 + $0x674] sm:$0xf0] }
 0x120   :  { %v5487_v27 = vld [vmem:[#allocation8 + $0x708] sm:$0xf] }
 0x121   :  { %2247 = vmatpush.bf16.msrb.mxu0 %v4592_v60  ;;  %2260 = vmatpush.bf16.msrb.mxu1 %v4720_v61  ;;  %v5152_v60 = vor.u32 %v6740_v49, %v5151_v48  ;;  %v5280_v61 = vor.u32 %v6772_v53, %v5279_v52  ;;  %v5535_v48 = vld [vmem:[#allocation8 + $0x768] sm:$0xf]  ;;  %v4708_v49 = vor.u32 %v6626_v32, %v4705_v33  ;;  %v6836_v53 = vld [vmem:[#allocation8 + $0x774] sm:$0xf0]  ;;  %v6610_v32 = vld [vmem:[#allocation8 + $0x6c] sm:$0xf] }
 0x122   :  { %2269 = vmatpush.bf16.msrb.mxu2 %v4912_v62  ;;  %v5135_v62 = vld [vmem:[#allocation8 + $0x448] sm:$0xf]  ;;  %v4641_v33 = vld [vmem:[#allocation8 + $0x78] sm:$0xf0] }
 0x123   :  { %2282 = vmatpush.bf16.msrb.mxu3 %v5040_v63  ;;  %v6736_v63 = vld [vmem:[#allocation8 + $0x454] sm:$0xf0] }
 0x124   :  { %2248 = vmatmul.bf16.vlgmr.msrb.gmra.mxu0 %v7456_v51  ;;  %2261 = vmatmul.bf16.vlgmr.msrb.gmra.mxu1 %v7458_v50  ;;  %v5136_v8 = vor.u32 %v6736_v63, %v5135_v62  ;;  %v6800_v62 = vld [vmem:[#allocation8 + $0x654] sm:$0xf0]  ;;  %v5519_v63 = vld [vmem:[#allocation8 + $0x748] sm:$0xf] }
 0x125   :  { %2292 = vmatpush.bf16.msra.mxu0 %v5216_v2  ;;  %2305 = vmatpush.bf16.msra.mxu1 %v5344_v3  ;;  %v5263_v2 = vld [vmem:[#allocation8 + $0x548] sm:$0xf]  ;;  %v6768_v3 = vld [vmem:[#allocation8 + $0x554] sm:$0xf0] }
 0x126   :  { %2270 = vmatpush.bf16.msrb.mxu2 %v4896_v10  ;;  %v5264_v9 = vor.u32 %v6768_v3, %v5263_v2  ;;  %v5119_v10 = vld [vmem:[#allocation8 + $0x428] sm:$0xf]  ;;  %v6832_v2 = vld [vmem:[#allocation8 + $0x754] sm:$0xf0]  ;;  %v6618_v3 = vld [vmem:[#allocation8 + $0xac] sm:$0xf] }
 0x127   :  { %2283 = vmatpush.bf16.msrb.mxu3 %v5024_v11  ;;  %v6732_v11 = vld [vmem:[#allocation8 + $0x434] sm:$0xf0] }
 0x128   :  { %v5120_v19 = vor.u32 %v6732_v11, %v5119_v10  ;;  %v5375_v11 = vld [vmem:[#allocation8 + $0x628] sm:$0xf] }
 0x129   :  { %2293 = vmatpush.bf16.msra.mxu0 %v5200_v14  ;;  %2306 = vmatpush.bf16.msra.mxu1 %v5328_v15  ;;  %v5247_v14 = vld [vmem:[#allocation8 + $0x528] sm:$0xf]  ;;  %v6764_v15 = vld [vmem:[#allocation8 + $0x534] sm:$0xf0] }
 0x12a   :  { %2271 = vmatpush.bf16.msrb.mxu2 %v4880_v21  ;;  %v5248_v20 = vor.u32 %v6764_v15, %v5247_v14  ;;  %v5103_v21 = vld [vmem:[#allocation8 + $0x408] sm:$0xf]  ;;  %v4804_v14 = vor.u32 %v6650_v6, %v4801_v7  ;;  %v6634_v7 = vld [vmem:[#allocation8 + $0x12c] sm:$0xf] }
 0x12b   :  { %2284 = vmatpush.bf16.msrb.mxu3 %v5008_v22  ;;  %v6728_v22 = vld [vmem:[#allocation8 + $0x414] sm:$0xf0] }
 0x12c   :  { %v5104_v39 = vor.u32 %v6728_v22, %v5103_v21  ;;  %v4785_v21 = vld [vmem:[#allocation8 + $0x198] sm:$0xf0] }
 0x12d   :  { %2294 = vmatpush.bf16.msra.mxu0 %v5184_v25  ;;  %2307 = vmatpush.bf16.msra.mxu1 %v5312_v26  ;;  %v5568_v25 = vor.u32 %v6844_v34, %v5567_v18  ;;  %v6760_v26 = vld [vmem:[#allocation8 + $0x514] sm:$0xf0]  ;;  %v6614_v34 = vld [vmem:[#allocation8 + $0x8c] sm:$0xf] }
 0x12e   :  { %2272 = vmatpush.bf16.msrb.mxu2 %v4864_v37  ;;  %v6658_v37 = vld [vmem:[#allocation8 + $0x1ec] sm:$0xf]  ;;  %v5232_v40 = vor.u32 %v6760_v26, %v5231_v23  ;;  %v6828_v18 = vld [vmem:[#allocation8 + $0x734] sm:$0xf0] }
 0x12f   :  { %2285 = vmatpush.bf16.msrb.mxu3 %v4992_v38  ;;  %v4833_v38 = vld [vmem:[#allocation8 + $0x1f8] sm:$0xf0]  ;;  %v6792_v26 = vld [vmem:[#allocation8 + $0x614] sm:$0xf0] }
 0x130   :  { %v4836_v52 = vor.u32 %v6658_v37, %v4833_v38  ;;  %v6642_v37 = vld [vmem:[#allocation8 + $0x16c] sm:$0xf]  ;;  %v4769_v38 = vld [vmem:[#allocation8 + $0x178] sm:$0xf0] }
 0x131   :  { %2295 = vmatpush.bf16.msra.mxu0 %v5168_v43  ;;  %2308 = vmatpush.bf16.msra.mxu1 %v5296_v46  ;;  %v5552_v43 = vor.u32 %v6840_v31, %v5551_v29  ;;  %v5407_v46 = vld [vmem:[#allocation8 + $0x668] sm:$0xf]  ;;  %v6824_v31 = vld [vmem:[#allocation8 + $0x714] sm:$0xf0] }
 0x132   :  { %2273 = vmatpush.bf16.msrb.mxu2 %v4848_v58  ;;  %v7498_v58 = vld [vmem:[#allocation10] sm:$0xf] }
 0x133   :  { %2286 = vmatpush.bf16.msrb.mxu3 %v4976_v59  ;;  %v5408_v59 = vor.u32 %v6804_v47, %v5407_v46  ;;  %v744_v4 = vperm.slane %v7498_v58, 0  ;;  %v5488_v47 = vor.u32 %v6824_v31, %v5487_v27  ;;  %v6754_v27 = vld [vmem:[#allocation8 + $0x4ec] sm:$0xf]  ;;  %v5345_v31 = vld [vmem:[#allocation8 + $0x5f8] sm:$0xf0] }
 0x135   :  { %2296 = vmatpush.bf16.msra.mxu0 %v5152_v60  ;;  %2309 = vmatpush.bf16.msra.mxu1 %v5280_v61  ;;  %v5536_v60 = vor.u32 %v6836_v53, %v5535_v48  ;;  %v5391_v61 = vld [vmem:[#allocation8 + $0x648] sm:$0xf] }
 0x136   :  { %2318 = vmatpush.bf16.msra.mxu2 %v5472_v0  ;;  %2287 = vmatmul.bf16.vlgmr.msrb.gmra.mxu3 %v7472_v41  ;;  %v4692_v0 = vor.u32 %v6622_v54, %v4689_v55  ;;  %v6606_v54 = vld [vmem:[#allocation8 + $0x4c] sm:$0xf]  ;;  %v4625_v55 = vld [vmem:[#allocation8 + $0x58] sm:$0xf0] }
 0x137   :  { %2331 = vmatpush.bf16.msra.mxu3 %v5600_v1  ;;  %2274 = vmatmul.bf16.vlgmr.msrb.gmra.mxu2 %v7470_v36  ;;  %v4820_v1 = vor.u32 %v6654_v56, %v4817_v57 }
 0x139   :  { %2297 = vmatpush.bf16.msra.mxu0 %v5136_v8  ;;  %2310 = vmatpush.bf16.msra.mxu1 %v5264_v9  ;;  %v5392_v8 = vor.u32 %v6800_v62, %v5391_v61  ;;  %v5520_v9 = vor.u32 %v6832_v2, %v5519_v63  ;;  %v6686_v61 = vld [vmem:[#allocation8 + $0x2cc] sm:$0xf]  ;;  %v4945_v62 = vld [vmem:[#allocation8 + $0x2d8] sm:$0xf0] }
 0x13a   :  { %2319 = vmatpush.bf16.msra.mxu2 %v5456_v12  ;;  %v6796_v12 = vld [vmem:[#allocation8 + $0x634] sm:$0xf0]  ;;  %v6718_v63 = vld [vmem:[#allocation8 + $0x3cc] sm:$0xf] }
 0x13b   :  { %2332 = vmatpush.bf16.msra.mxu3 %v5584_v13  ;;  %v4676_v13 = vor.u32 %v6618_v3, %v4673_v5  ;;  %v5376_v23 = vor.u32 %v6796_v12, %v5375_v11  ;;  %v6602_v3 = vld [vmem:[#allocation8 + $0x2c] sm:$0xf]  ;;  %v4948_v5 = vor.u32 %v6686_v61, %v4945_v62  ;;  %v5057_v12 = vld [vmem:[#allocation8 + $0x3b8] sm:$0xf0] }
 0x13c   :  { %v6714_v11 = vld [vmem:[#allocation8 + $0x3ac] sm:$0xf]  ;;  %v4881_v62 = vld [vmem:[#allocation8 + $0x258] sm:$0xf0] }
 0x13d   :  { %2298 = vmatpush.bf16.msra.mxu0 %v5120_v19  ;;  %2311 = vmatpush.bf16.msra.mxu1 %v5248_v20  ;;  %v4657_v19 = vld [vmem:[#allocation8 + $0x98] sm:$0xf0]  ;;  %v6646_v20 = vld [vmem:[#allocation8 + $0x18c] sm:$0xf] }
 0x13e   :  { %2320 = vmatpush.bf16.msra.mxu2 %v5440_v24  ;;  %v5504_v24 = vor.u32 %v6828_v18, %v5503_v17  ;;  %v4660_v28 = vor.u32 %v6614_v34, %v4657_v19  ;;  %v4788_v29 = vor.u32 %v6646_v20, %v4785_v21  ;;  %v6598_v17 = vld [vmem:[#allocation8 + $0xc] sm:$0xf]  ;;  %v4593_v18 = vld [vmem:[#allocation8 + $0x18] sm:$0xf0]  ;;  %v5060_v20 = vor.u32 %v6714_v11, %v5057_v12 }
 0x13f   :  { %2333 = vmatpush.bf16.msra.mxu3 %v5568_v25  ;;  %v5359_v25 = vld [vmem:[#allocation8 + $0x608] sm:$0xf]  ;;  %v6630_v34 = vld [vmem:[#allocation8 + $0x10c] sm:$0xf]  ;;  %v4721_v21 = vld [vmem:[#allocation8 + $0x118] sm:$0xf0] }
 0x140   :  { %v2041_v10 = vpop.f32.mrf.mxu0  ;;  %v2054_v16 = vpop.f32.mrf.mxu1  ;;  %v5360_v46 = vor.u32 %v6792_v26, %v5359_v25  ;;  %v6710_v25 = vld [vmem:[#allocation8 + $0x38c] sm:$0xf]  ;;  %v5041_v26 = vld [vmem:[#allocation8 + $0x398] sm:$0xf0] }
 0x141   :  { %2299 = vmatpush.bf16.msra.mxu0 %v5104_v39  ;;  %2312 = vmatpush.bf16.msra.mxu1 %v5232_v40  ;;  %v2042_v15 = vadd.f32 %v2041_v10, %v744_v4  ;;  %v6690_v39 = vld [vmem:[#allocation8 + $0x2ec] sm:$0xf]  ;;  %v4961_v40 = vld [vmem:[#allocation8 + $0x2f8] sm:$0xf0] }
 0x142   :  { %2321 = vmatpush.bf16.msra.mxu2 %v5424_v42  ;;  %v6722_v42 = vld [vmem:[#allocation8 + $0x3ec] sm:$0xf]  ;;  %v4964_v56 = vor.u32 %v6690_v39, %v4961_v40  ;;  %v4609_v4 = vld [vmem:[#allocation8 + $0x38] sm:$0xf0] }
 0x143   :  { %2334 = vmatpush.bf16.msra.mxu3 %v5552_v43  ;;  %v7503_v22 = vadd.f32 %v2054_v16, %v2042_v15  ;;  %v5089_v43 = vld [vmem:[#allocation8 + $0x3f8] sm:$0xf0]  ;;  %v6674_v40 = vld [vmem:[#allocation8 + $0x26c] sm:$0xf] }
 0x144   :  { %2300 = vmatmul.bf16.vlgmr.msra.gmra.mxu0 %v7466_v30  ;;  %2313 = vmatmul.bf16.vlgmr.msra.gmra.mxu1 %v7468_v35  ;;  %v5092_v57 = vor.u32 %v6722_v42, %v5089_v43  ;;  %v4929_v10 = vld [vmem:[#allocation8 + $0x2b8] sm:$0xf0]  ;;  %v6670_v61 = vld [vmem:[#allocation8 + $0x24c] sm:$0xf] }
 0x145   :  { %2344 = vmatpush.bf16.msrb.mxu0 %v4708_v49  ;;  %2357 = vmatpush.bf16.msrb.mxu1 %v4836_v52  ;;  %v4644_v49 = vor.u32 %v6610_v32, %v4641_v33  ;;  %v4772_v52 = vor.u32 %v6642_v37, %v4769_v38  ;;  %v4596_v32 = vor.u32 %v6598_v17, %v4593_v18  ;;  %v4897_v42 = vld [vmem:[#allocation8 + $0x278] sm:$0xf0]  ;;  %v6698_v17 = vld [vmem:[#allocation8 + $0x32c] sm:$0xf] }
 0x146   :  { %2322 = vmatpush.bf16.msra.mxu2 %v5408_v59  ;;  %v6638_v59 = vld [vmem:[#allocation8 + $0x14c] sm:$0xf]  ;;  %v4724_v33 = vor.u32 %v6630_v34, %v4721_v21  ;;  %v5044_v38 = vor.u32 %v6710_v25, %v5041_v26  ;;  %v4865_v11 = vld [vmem:[#allocation8 + $0x238] sm:$0xf0] }
 0x147   :  { %2335 = vmatpush.bf16.msra.mxu3 %v5536_v60  ;;  %v4753_v60 = vld [vmem:[#allocation8 + $0x158] sm:$0xf0]  ;;  %v6662_v25 = vld [vmem:[#allocation8 + $0x20c] sm:$0xf] }
 0x148   :  { %v2043_v48 = vpop.f32.mrf.mxu0  ;;  %v2056_v53 = vpop.f32.mrf.mxu1  ;;  %v4756_v2 = vor.u32 %v6638_v59, %v4753_v60  ;;  %v4900_v59 = vor.u32 %v6674_v40, %v4897_v42  ;;  %v4993_v18 = vld [vmem:[#allocation8 + $0x338] sm:$0xf0]  ;;  %v6818_v40 = vld [vmem:[#allocation8 + $0x6ec] sm:$0xf] }
 0x149   :  { %2345 = vmatpush.bf16.msrb.mxu0 %v4692_v0  ;;  %2358 = vmatpush.bf16.msrb.mxu1 %v4820_v1  ;;  %v5073_v0 = vld [vmem:[#allocation8 + $0x3d8] sm:$0xf0]  ;;  %v4628_v1 = vor.u32 %v6606_v54, %v4625_v55  ;;  %v6706_v48 = vld [vmem:[#allocation8 + $0x36c] sm:$0xf]  ;;  %v4996_v21 = vor.u32 %v6698_v17, %v4993_v18 }
 0x14a   :  { %2323 = vmatpush.bf16.msra.mxu2 %v5392_v8  ;;  %v5076_v6 = vor.u32 %v6718_v63, %v5073_v0  ;;  %v4737_v8 = vld [vmem:[#allocation8 + $0x138] sm:$0xf0]  ;;  %v6782_v55 = vld [vmem:[#allocation8 + $0x5cc] sm:$0xf] }
 0x14b   :  { %2336 = vmatpush.bf16.msra.mxu3 %v5520_v9  ;;  %v6682_v9 = vld [vmem:[#allocation8 + $0x2ac] sm:$0xf]  ;;  %v4740_v15 = vor.u32 %v6634_v7, %v4737_v8  ;;  %v5201_v54 = vld [vmem:[#allocation8 + $0x4d8] sm:$0xf0]  ;;  %v4884_v7 = vor.u32 %v6670_v61, %v4881_v62 }
 0x14c   :  { %v4932_v19 = vor.u32 %v6682_v9, %v4929_v10  ;;  %v6666_v10 = vld [vmem:[#allocation8 + $0x22c] sm:$0xf]  ;;  %v5169_v34 = vld [vmem:[#allocation8 + $0x498] sm:$0xf0] }
 0x14d   :  { %2346 = vmatpush.bf16.msrb.mxu0 %v4676_v13  ;;  %2359 = vmatpush.bf16.msrb.mxu1 %v4804_v14  ;;  %v4612_v14 = vor.u32 %v6602_v3, %v4609_v4  ;;  %v6746_v3 = vld [vmem:[#allocation8 + $0x4ac] sm:$0xf]  ;;  %v5185_v4 = vld [vmem:[#allocation8 + $0x4b8] sm:$0xf0] }
 0x14e   :  { %2324 = vmatpush.bf16.msra.mxu2 %v5376_v23  ;;  %v6678_v23 = vld [vmem:[#allocation8 + $0x28c] sm:$0xf]  ;;  %v5188_v12 = vor.u32 %v6746_v3, %v5185_v4  ;;  %v4849_v26 = vld [vmem:[#allocation8 + $0x218] sm:$0xf0] }
 0x14f   :  { %2337 = vmatpush.bf16.msra.mxu3 %v5504_v24  ;;  %v4913_v24 = vld [vmem:[#allocation8 + $0x298] sm:$0xf0]  ;;  %v6766_v61 = vld [vmem:[#allocation8 + $0x54c] sm:$0xf] }
 0x150   :  { %v7507_v13 = vpop.f32.mrf.mxu0  ;;  %v4916_v37 = vor.u32 %v6678_v23, %v4913_v24  ;;  %v5473_v42 = vld [vmem:[#allocation8 + $0x6f8] sm:$0xf0]  ;;  %v6842_v17 = vld [vmem:[#allocation8 + $0x7ac] sm:$0xf] }
 0x151   :  { %2347 = vmatpush.bf16.msrb.mxu0 %v4660_v28  ;;  %2360 = vmatpush.bf16.msrb.mxu1 %v4788_v29  ;;  %v7509_v16 = vpop.f32.mrf.mxu1  ;;  %v5217_v28 = vld [vmem:[#allocation8 + $0x4f8] sm:$0xf0]  ;;  %v6786_v29 = vld [vmem:[#allocation8 + $0x5ec] sm:$0xf] }
 0x152   :  { %2325 = vmatpush.bf16.msra.mxu2 %v5360_v46  ;;  %v5220_v43 = vor.u32 %v6754_v27, %v5217_v28  ;;  %v5348_v46 = vor.u32 %v6786_v29, %v5345_v31  ;;  %v6694_v27 = vld [vmem:[#allocation8 + $0x30c] sm:$0xf]  ;;  %v4977_v31 = vld [vmem:[#allocation8 + $0x318] sm:$0xf0] }
 0x153   :  { %2338 = vmatpush.bf16.msra.mxu3 %v5488_v47  ;;  %v5265_v62 = vld [vmem:[#allocation8 + $0x558] sm:$0xf0] }
 0x154   :  { %v5569_v18 = vld [vmem:[#allocation8 + $0x7b8] sm:$0xf0] }
 0x155   :  { %2348 = vmatpush.bf16.msrb.mxu0 %v4644_v49  ;;  %2361 = vmatpush.bf16.msrb.mxu1 %v4772_v52  ;;  %v5025_v49 = vld [vmem:[#allocation8 + $0x378] sm:$0xf0]  ;;  %v6750_v52 = vld [vmem:[#allocation8 + $0x4cc] sm:$0xf] }
 0x156   :  { %2370 = vmatpush.bf16.msrb.mxu2 %v4964_v56  ;;  %2339 = vmatmul.bf16.vlgmr.msra.gmra.mxu3 %v7482_v45  ;;  %v7511_v39 = vpop.f32.mrf.mxu2  ;;  %v5329_v56 = vld [vmem:[#allocation8 + $0x5d8] sm:$0xf0]  ;;  %v5028_v60 = vor.u32 %v6706_v48, %v5025_v49  ;;  %v5204_v63 = vor.u32 %v6750_v52, %v5201_v54  ;;  %v4852_v48 = vor.u32 %v6662_v25, %v4849_v26  ;;  %v6758_v25 = vld [vmem:[#allocation8 + $0x50c] sm:$0xf] }
 0x157   :  { %2383 = vmatpush.bf16.msrb.mxu3 %v5092_v57  ;;  %2326 = vmatmul.bf16.vlgmr.msra.gmra.mxu2 %v7480_v44  ;;  %v7513_v47 = vpop.f32.mrf.mxu3  ;;  %v5332_v0 = vor.u32 %v6782_v55, %v5329_v56  ;;  %v4980_v49 = vor.u32 %v6694_v27, %v4977_v31  ;;  %v6734_v56 = vld [vmem:[#allocation8 + $0x44c] sm:$0xf]  ;;  %v5572_v27 = vor.u32 %v6842_v17, %v5569_v18  ;;  %v5553_v31 = vld [vmem:[#allocation8 + $0x798] sm:$0xf0] }
 0x158   :  { %v2095_v53 = vpop.f32.mrf.mxu0  ;;  %v6794_v18 = vld [vmem:[#allocation8 + $0x62c] sm:$0xf] }
 0x159   :  { %2349 = vmatpush.bf16.msrb.mxu0 %v4628_v1  ;;  %2362 = vmatpush.bf16.msrb.mxu1 %v4756_v2  ;;  %v2108_v57 = vpop.f32.mrf.mxu1  ;;  %v6702_v1 = vld [vmem:[#allocation8 + $0x34c] sm:$0xf]  ;;  %v5009_v2 = vld [vmem:[#allocation8 + $0x358] sm:$0xf0] }
 0x15a   :  { %2371 = vmatpush.bf16.msrb.mxu2 %v4948_v5  ;;  %v6778_v5 = vld [vmem:[#allocation8 + $0x5ac] sm:$0xf]  ;;  %v5012_v8 = vor.u32 %v6702_v1, %v5009_v2  ;;  %v5137_v57 = vld [vmem:[#allocation8 + $0x458] sm:$0xf0] }
 0x15b   :  { %2384 = vmatpush.bf16.msrb.mxu3 %v5076_v6  ;;  %v5313_v6 = vld [vmem:[#allocation8 + $0x5b8] sm:$0xf0]  ;;  %v6846_v1 = vld [vmem:[#allocation8 + $0x7cc] sm:$0xf] }
 0x15c   :  { %v5585_v2 = vld [vmem:[#allocation8 + $0x7d8] sm:$0xf0] }
 0x15d   :  { %2350 = vmatpush.bf16.msrb.mxu0 %v4612_v14  ;;  %2363 = vmatpush.bf16.msrb.mxu1 %v4740_v15  ;;  %v5316_v14 = vor.u32 %v6778_v5, %v5313_v6  ;;  %v5140_v5 = vor.u32 %v6734_v56, %v5137_v57  ;;  %v5268_v6 = vor.u32 %v6766_v61, %v5265_v62  ;;  %v6834_v56 = vld [vmem:[#allocation8 + $0x76c] sm:$0xf]  ;;  %v5537_v57 = vld [vmem:[#allocation8 + $0x778] sm:$0xf0]  ;;  %v5943_v61 = vld [vmem:[#allocation11 + $0x2a0] sm:$0xf] }
 0x15e   :  { %2372 = vmatpush.bf16.msrb.mxu2 %v4932_v19  ;;  %v2069_v9 = vpop.f32.mrf.mxu2  ;;  %v5297_v19 = vld [vmem:[#allocation8 + $0x598] sm:$0xf0] }
 0x15f   :  { %2385 = vmatpush.bf16.msrb.mxu3 %v5060_v20  ;;  %v2082_v15 = vpop.f32.mrf.mxu3  ;;  %v4868_v20 = vor.u32 %v6666_v10, %v4865_v11  ;;  %v5588_v10 = vor.u32 %v6846_v1, %v5585_v2  ;;  %v6762_v11 = vld [vmem:[#allocation8 + $0x52c] sm:$0xf]  ;;  %v6940_v62 = vld [vmem:[#allocation11 + $0x2b4] sm:$0xf0] }
 0x160   :  { %v5441_v15 = vld [vmem:[#allocation8 + $0x6b8] sm:$0xf0] }
 0x161   :  { %2351 = vmatpush.bf16.msrb.mxu0 %v4596_v32  ;;  %2364 = vmatpush.bf16.msrb.mxu1 %v4724_v33  ;;  %v7517_v23 = vpop.f32.mrf.mxu0  ;;  %v6738_v32 = vld [vmem:[#allocation8 + $0x46c] sm:$0xf]  ;;  %v5153_v33 = vld [vmem:[#allocation8 + $0x478] sm:$0xf0] }
 0x162   :  { %2373 = vmatpush.bf16.msrb.mxu2 %v4916_v37  ;;  %v6770_v37 = vld [vmem:[#allocation8 + $0x56c] sm:$0xf]  ;;  %v5156_v52 = vor.u32 %v6738_v32, %v5153_v33  ;;  %v5775_v32 = vld [vmem:[#allocation11 + $0x150] sm:$0xf] }
 0x163   :  { %2386 = vmatpush.bf16.msrb.mxu3 %v5044_v38  ;;  %v7519_v24 = vpop.f32.mrf.mxu1  ;;  %v5281_v38 = vld [vmem:[#allocation8 + $0x578] sm:$0xf0]  ;;  %v6898_v33 = vld [vmem:[#allocation11 + $0x164] sm:$0xf0] }
 0x164   :  { %2352 = vmatmul.bf16.vlgmr.msrb.gmra.mxu0 %v7456_v51  ;;  %2365 = vmatmul.bf16.vlgmr.msrb.gmra.mxu1 %v7458_v50  ;;  %v6742_v51 = vld [vmem:[#allocation8 + $0x48c] sm:$0xf]  ;;  %v5284_v53 = vor.u32 %v6770_v37, %v5281_v38  ;;  %v5967_v37 = vld [vmem:[#allocation11 + $0x2d0] sm:$0xf] }
 0x165   :  { %2396 = vmatpush.bf16.msra.mxu0 %v5220_v43  ;;  %2409 = vmatpush.bf16.msra.mxu1 %v5348_v46  ;;  %v6774_v50 = vld [vmem:[#allocation8 + $0x58c] sm:$0xf]  ;;  %v5172_v28 = vor.u32 %v6742_v51, %v5169_v34  ;;  %v5601_v46 = vld [vmem:[#allocation8 + $0x7f8] sm:$0xf0] }
 0x166   :  { %2374 = vmatpush.bf16.msrb.mxu2 %v4900_v59  ;;  %v5300_v29 = vor.u32 %v6774_v50, %v5297_v19  ;;  %v6850_v43 = vld [vmem:[#allocation8 + $0x7ec] sm:$0xf]  ;;  %v7521_v54 = vpop.f32.mrf.mxu2  ;;  %v5476_v59 = vor.u32 %v6818_v40, %v5473_v42 }
 0x167   :  { %2387 = vmatpush.bf16.msrb.mxu3 %v5028_v60  ;;  %v7523_v55 = vpop.f32.mrf.mxu3  ;;  %v5604_v60 = vor.u32 %v6850_v43, %v5601_v46  ;;  %v6946_v38 = vld [vmem:[#allocation11 + $0x2e4] sm:$0xf0] }
 0x169   :  { %2397 = vmatpush.bf16.msra.mxu0 %v5204_v63  ;;  %2410 = vmatpush.bf16.msra.mxu1 %v5332_v0  ;;  %v6814_v63 = vld [vmem:[#allocation8 + $0x6cc] sm:$0xf]  ;;  %v5457_v0 = vld [vmem:[#allocation8 + $0x6d8] sm:$0xf0]  ;;  %v2147_v3 = vpop.f32.mrf.mxu0 }
 0x16a   :  { %2375 = vmatpush.bf16.msrb.mxu2 %v4884_v7  ;;  %v6730_v7 = vld [vmem:[#allocation8 + $0x42c] sm:$0xf]  ;;  %v5460_v9 = vor.u32 %v6814_v63, %v5457_v0  ;;  %v5540_v0 = vor.u32 %v6834_v56, %v5537_v57 }
 0x16b   :  { %2388 = vmatpush.bf16.msrb.mxu3 %v5012_v8  ;;  %v2160_v4 = vpop.f32.mrf.mxu1  ;;  %v5121_v8 = vld [vmem:[#allocation8 + $0x438] sm:$0xf0]  ;;  %v6798_v3 = vld [vmem:[#allocation8 + $0x64c] sm:$0xf] }
 0x16c   :  { %v5124_v51 = vor.u32 %v6730_v7, %v5121_v8  ;;  %v5393_v4 = vld [vmem:[#allocation8 + $0x658] sm:$0xf0]  ;;  %v6830_v7 = vld [vmem:[#allocation8 + $0x74c] sm:$0xf] }
 0x16d   :  { %2398 = vmatpush.bf16.msra.mxu0 %v5188_v12  ;;  %2411 = vmatpush.bf16.msra.mxu1 %v5316_v14  ;;  %v5249_v12 = vld [vmem:[#allocation8 + $0x538] sm:$0xf0]  ;;  %v6810_v14 = vld [vmem:[#allocation8 + $0x6ac] sm:$0xf] }
 0x16e   :  { %2376 = vmatpush.bf16.msrb.mxu2 %v4868_v20  ;;  %v5252_v34 = vor.u32 %v6762_v11, %v5249_v12  ;;  %v2121_v50 = vpop.f32.mrf.mxu2  ;;  %v6726_v20 = vld [vmem:[#allocation8 + $0x40c] sm:$0xf]  ;;  %v5444_v26 = vor.u32 %v6810_v14, %v5441_v15  ;;  %v5521_v8 = vld [vmem:[#allocation8 + $0x758] sm:$0xf0]  ;;  %v5919_v11 = vld [vmem:[#allocation11 + $0x270] sm:$0xf]  ;;  %v2068_v14 = vadd.f32 %v7511_v39, %v7503_v22  ;;  %v5396_v15 = vor.u32 %v6798_v3, %v5393_v4 }
 0x16f   :  { %2389 = vmatpush.bf16.msrb.mxu3 %v4996_v21  ;;  %v2134_v19 = vpop.f32.mrf.mxu3  ;;  %v5105_v21 = vld [vmem:[#allocation8 + $0x418] sm:$0xf0]  ;;  %v6934_v12 = vld [vmem:[#allocation11 + $0x284] sm:$0xf0]  ;;  %v5524_v17 = vor.u32 %v6830_v7, %v5521_v8  ;;  %v745_v39 = vperm.slane %v7498_v58, 1 }
 0x170   :  { %v5108_v40 = vor.u32 %v6726_v20, %v5105_v21  ;;  %v5920_v50 = vor.u32 %v6934_v12, %v5919_v11  ;;  %v6826_v19 = vld [vmem:[#allocation8 + $0x72c] sm:$0xf]  ;;  %v5703_v20 = vld [vmem:[#allocation11 + $0xc0] sm:$0xf]  ;;  %v2081_v22 = vadd.f32 %v7513_v47, %v2068_v14  ;;  %v5823_v12 = vld [vmem:[#allocation11 + $0x1b0] sm:$0xf] }
 0x171   :  { %2399 = vmatpush.bf16.msra.mxu0 %v5172_v28  ;;  %2412 = vmatpush.bf16.msra.mxu1 %v5300_v29  ;;  %v5233_v28 = vld [vmem:[#allocation8 + $0x518] sm:$0xf0]  ;;  %v5895_v21 = vld [vmem:[#allocation11 + $0x240] sm:$0xf]  ;;  %v6922_v47 = vld [vmem:[#allocation11 + $0x224] sm:$0xf0]  ;;  %v2146_v56 = vadd.f32 %v7517_v23, %v745_v39 }
 0x172   :  { %2377 = vmatpush.bf16.msrb.mxu2 %v4852_v48  ;;  %v5425_v29 = vld [vmem:[#allocation8 + $0x698] sm:$0xf0]  ;;  %v5236_v42 = vor.u32 %v6758_v25, %v5233_v28  ;;  %v6802_v48 = vld [vmem:[#allocation8 + $0x66c] sm:$0xf] }
 0x173   :  { %2390 = vmatpush.bf16.msrb.mxu3 %v4980_v49  ;;  %v5409_v49 = vld [vmem:[#allocation8 + $0x678] sm:$0xf0]  ;;  %v6994_v58 = vld [vmem:[#allocation11 + $0x464] sm:$0xf0]  ;;  %v2159_v7 = vadd.f32 %v7519_v24, %v2146_v56  ;;  %v5921_v56 = vld [vmem:[#allocation11 + $0x288] sm:$0xf0] }
 0x174   :  { %v5412_v63 = vor.u32 %v6802_v48, %v5409_v49  ;;  %v6928_v25 = vld [vmem:[#allocation11 + $0x254] sm:$0xf0]  ;;  %v6159_v48 = vld [vmem:[#allocation11 + $0x450] sm:$0xf]  ;;  %v2094_v49 = vadd.f32 %v7507_v13, %v2081_v22  ;;  %v6862_v11 = vld [vmem:[#allocation11 + $0x44] sm:$0xf0] }
 0x175   :  { %2400 = vmatpush.bf16.msra.mxu0 %v5156_v52  ;;  %2413 = vmatpush.bf16.msra.mxu1 %v5284_v53  ;;  %v5776_v52 = vor.u32 %v6898_v33, %v5775_v32  ;;  %v5968_v53 = vor.u32 %v6946_v38, %v5967_v37  ;;  %v5361_v32 = vld [vmem:[#allocation8 + $0x618] sm:$0xf0]  ;;  %v5896_v37 = vor.u32 %v6928_v25, %v5895_v21  ;;  %v6822_v38 = vld [vmem:[#allocation8 + $0x70c] sm:$0xf]  ;;  %v6943_v21 = vld [vmem:[#allocation11 + $0x2d4] sm:$0xf] }
 0x176   :  { %2422 = vmatpush.bf16.msra.mxu2 %v5476_v59  ;;  %2391 = vmatmul.bf16.vlgmr.msrb.gmra.mxu3 %v7472_v41  ;;  %v6838_v41 = vld [vmem:[#allocation8 + $0x78c] sm:$0xf]  ;;  %v5751_v59 = vld [vmem:[#allocation11 + $0x120] sm:$0xf]  ;;  %v2107_v13 = vadd.f32 %v7509_v16, %v2094_v49  ;;  %v6111_v16 = vld [vmem:[#allocation11 + $0x3f0] sm:$0xf] }
 0x177   :  { %2435 = vmatpush.bf16.msra.mxu3 %v5604_v60  ;;  %2378 = vmatmul.bf16.vlgmr.msrb.gmra.mxu2 %v7470_v36  ;;  %v6806_v36 = vld [vmem:[#allocation8 + $0x68c] sm:$0xf]  ;;  %v5556_v46 = vor.u32 %v6838_v41, %v5553_v31  ;;  %v6892_v60 = vld [vmem:[#allocation11 + $0x134] sm:$0xf0]  ;;  %v6087_v25 = vld [vmem:[#allocation11 + $0x3c0] sm:$0xf] }
 0x178   :  { %v5428_v43 = vor.u32 %v6806_v36, %v5425_v29  ;;  %v6790_v31 = vld [vmem:[#allocation8 + $0x60c] sm:$0xf]  ;;  %v6976_v22 = vld [vmem:[#allocation11 + $0x3d4] sm:$0xf0] }
 0x179   :  { %2401 = vmatpush.bf16.msra.mxu0 %v5140_v5  ;;  %2414 = vmatpush.bf16.msra.mxu1 %v5268_v6  ;;  %v7529_v2 = vpop.f32.mrf.mxu3  ;;  %v5752_v5 = vor.u32 %v6892_v60, %v5751_v59  ;;  %v5944_v6 = vor.u32 %v6940_v62, %v5943_v61  ;;  %v5655_v60 = vld [vmem:[#allocation11 + $0x60] sm:$0xf]  ;;  %v6868_v61 = vld [vmem:[#allocation11 + $0x74] sm:$0xf0]  ;;  %v6910_v14 = vld [vmem:[#allocation11 + $0x1c4] sm:$0xf0] }
 0x17a   :  { %2423 = vmatpush.bf16.msra.mxu2 %v5460_v9  ;;  %v7527_v1 = vpop.f32.mrf.mxu2  ;;  %v5727_v9 = vld [vmem:[#allocation11 + $0xf0] sm:$0xf]  ;;  %v5847_v62 = vld [vmem:[#allocation11 + $0x1e0] sm:$0xf]  ;;  %v5656_v23 = vor.u32 %v6868_v61, %v5655_v60  ;;  %v6982_v24 = vld [vmem:[#allocation11 + $0x404] sm:$0xf0] }
 0x17b   :  { %2436 = vmatpush.bf16.msra.mxu3 %v5588_v10  ;;  %v6886_v10 = vld [vmem:[#allocation11 + $0x104] sm:$0xf0] }
 0x17d   :  { %2402 = vmatpush.bf16.msra.mxu0 %v5124_v51  ;;  %2415 = vmatpush.bf16.msra.mxu1 %v5252_v34  ;;  %v5377_v51 = vld [vmem:[#allocation8 + $0x638] sm:$0xf0]  ;;  %v5728_v34 = vor.u32 %v6886_v10, %v5727_v9  ;;  %v5631_v9 = vld [vmem:[#allocation11 + $0x30] sm:$0xf]  ;;  %v2120_v10 = vadd.f32 %v7521_v54, %v2107_v13 }
 0x17e   :  { %2424 = vmatpush.bf16.msra.mxu2 %v5444_v26  ;;  %v5380_v28 = vor.u32 %v6794_v18, %v5377_v51  ;;  %v5632_v18 = vor.u32 %v6862_v11, %v5631_v9  ;;  %v5824_v51 = vor.u32 %v6910_v14, %v5823_v12  ;;  %v6015_v13 = vld [vmem:[#allocation11 + $0x330] sm:$0xf] }
 0x17f   :  { %2437 = vmatpush.bf16.msra.mxu3 %v5572_v27  ;;  %v2133_v54 = vadd.f32 %v7523_v55, %v2120_v10 }
 0x181   :  { %2403 = vmatpush.bf16.msra.mxu0 %v5108_v40  ;;  %2416 = vmatpush.bf16.msra.mxu1 %v5236_v42  ;;  %v7535_v26 = vpop.f32.mrf.mxu0  ;;  %v7537_v27 = vpop.f32.mrf.mxu1  ;;  %v5489_v40 = vld [vmem:[#allocation8 + $0x718] sm:$0xf0]  ;;  %v5679_v42 = vld [vmem:[#allocation11 + $0x90] sm:$0xf] }
 0x182   :  { %2425 = vmatpush.bf16.msra.mxu2 %v5428_v43  ;;  %v2173_v29 = vpop.f32.mrf.mxu2  ;;  %v2186_v41 = vpop.f32.mrf.mxu3  ;;  %v6874_v43 = vld [vmem:[#allocation11 + $0xa4] sm:$0xf0] }
 0x183   :  { %2438 = vmatpush.bf16.msra.mxu3 %v5556_v46  ;;  %v5871_v46 = vld [vmem:[#allocation11 + $0x210] sm:$0xf]  ;;  %v5680_v57 = vor.u32 %v6874_v43, %v5679_v42  ;;  %v2448_v29 = vmax.f32 %v2133_v54, 0.0  ;;  %v6161_v54 = vld [vmem:[#allocation11 + $0x468] sm:$0xf0] }
 0x184   :  { %2404 = vmatmul.bf16.vlgmr.msra.gmra.mxu0 %v7466_v30  ;;  %2417 = vmatmul.bf16.vlgmr.msra.gmra.mxu1 %v7468_v35  ;;  %v5505_v30 = vld [vmem:[#allocation8 + $0x738] sm:$0xf0]  ;;  %v5872_v59 = vor.u32 %v6922_v47, %v5871_v46 }
 0x185   :  { %3622 = vmatpush.bf16.msrb.mxu0 %v5776_v52  ;;  %3635 = vmatpush.bf16.msrb.mxu1 %v5968_v53  ;;  %v6880_v35 = vld [vmem:[#allocation11 + $0xd4] sm:$0xf0]  ;;  %v5508_v36 = vor.u32 %v6826_v19, %v5505_v30  ;;  %v5364_v52 = vor.u32 %v6790_v31, %v5361_v32  ;;  %v5492_v53 = vor.u32 %v6822_v38, %v5489_v40  ;;  %v5799_v19 = vld [vmem:[#allocation11 + $0x180] sm:$0xf]  ;;  %v6889_v31 = vld [vmem:[#allocation11 + $0x124] sm:$0xf] }
 0x186   :  { %2426 = vmatpush.bf16.msra.mxu2 %v5412_v63  ;;  %v5704_v33 = vor.u32 %v6880_v35, %v5703_v20  ;;  %v6916_v63 = vld [vmem:[#allocation11 + $0x1f4] sm:$0xf0]  ;;  %v6895_v20 = vld [vmem:[#allocation11 + $0x154] sm:$0xf]  ;;  %v6112_v35 = vor.u32 %v6982_v24, %v6111_v16  ;;  %v5753_v32 = vld [vmem:[#allocation11 + $0x138] sm:$0xf0] }
 0x187   :  { %2439 = vmatpush.bf16.msra.mxu3 %v5540_v0  ;;  %v6160_v0 = vor.u32 %v6994_v58, %v6159_v48  ;;  %v5848_v8 = vor.u32 %v6916_v63, %v5847_v62  ;;  %v6904_v30 = vld [vmem:[#allocation11 + $0x194] sm:$0xf0]  ;;  %v6063_v38 = vld [vmem:[#allocation11 + $0x390] sm:$0xf]  ;;  %v6970_v40 = vld [vmem:[#allocation11 + $0x3a4] sm:$0xf0]  ;;  %v5756_v47 = vor.u32 %v6889_v31, %v5753_v32 }
 0x188   :  { %v6883_v58 = vld [vmem:[#allocation11 + $0xf4] sm:$0xf]  ;;  %v6877_v63 = vld [vmem:[#allocation11 + $0xc4] sm:$0xf]  ;;  %v5873_v24 = vld [vmem:[#allocation11 + $0x228] sm:$0xf0] }
 0x189   :  { %3623 = vmatpush.bf16.msrb.mxu0 %v5752_v5  ;;  %3636 = vmatpush.bf16.msrb.mxu1 %v5944_v6  ;;  %v2199_v3 = vpop.f32.mrf.mxu0  ;;  %v2212_v4 = vpop.f32.mrf.mxu1  ;;  %v6135_v5 = vld [vmem:[#allocation11 + $0x420] sm:$0xf]  ;;  %v6988_v6 = vld [vmem:[#allocation11 + $0x434] sm:$0xf0]  ;;  %v6919_v16 = vld [vmem:[#allocation11 + $0x214] sm:$0xf] }
 0x18a   :  { %2427 = vmatpush.bf16.msra.mxu2 %v5396_v15  ;;  %v6136_v15 = vor.u32 %v6988_v6, %v6135_v5  ;;  %v6925_v4 = vld [vmem:[#allocation11 + $0x244] sm:$0xf]  ;;  %v5897_v5 = vld [vmem:[#allocation11 + $0x258] sm:$0xf0]  ;;  %v6907_v31 = vld [vmem:[#allocation11 + $0x1b4] sm:$0xf] }
 0x18b   :  { %2440 = vmatpush.bf16.msra.mxu3 %v5524_v17  ;;  %v2172_v17 = vadd.f32 %v7527_v1, %v2159_v7  ;;  %v6958_v7 = vld [vmem:[#allocation11 + $0x344] sm:$0xf0]  ;;  %v5900_v14 = vor.u32 %v6925_v4, %v5897_v5  ;;  %v5825_v32 = vld [vmem:[#allocation11 + $0x1c8] sm:$0xf0]  ;;  %v6967_v5 = vld [vmem:[#allocation11 + $0x394] sm:$0xf] }
 0x18d   :  { %3624 = vmatpush.bf16.msrb.mxu0 %v5728_v34  ;;  %3637 = vmatpush.bf16.msrb.mxu1 %v5920_v50  ;;  %v5607_v34 = vld [vmem:[#allocation11] sm:$0xf]  ;;  %v6856_v50 = vld [vmem:[#allocation11 + $0x14] sm:$0xf0]  ;;  %v2185_v1 = vadd.f32 %v7529_v2, %v2172_v17  ;;  %v6088_v2 = vor.u32 %v6976_v22, %v6087_v25  ;;  %v5681_v17 = vld [vmem:[#allocation11 + $0xa8] sm:$0xf0] }
 0x18e   :  { %2428 = vmatpush.bf16.msra.mxu2 %v5380_v28  ;;  %v5608_v28 = vor.u32 %v6856_v50, %v5607_v34  ;;  %v6952_v34 = vld [vmem:[#allocation11 + $0x314] sm:$0xf0]  ;;  %v6991_v50 = vld [vmem:[#allocation11 + $0x454] sm:$0xf] }
 0x18f   :  { %2441 = vmatpush.bf16.msra.mxu3 %v5508_v36  ;;  %v2198_v39 = vadd.f32 %v7535_v26, %v2185_v1  ;;  %v5800_v36 = vor.u32 %v6904_v30, %v5799_v19  ;;  %v7553_v26 = vpack.c.bf16 %v2448_v29, %v2448_v29  ;;  %v5876_v30 = vor.u32 %v6919_v16, %v5873_v24  ;;  %v6913_v1 = vld [vmem:[#allocation11 + $0x1e4] sm:$0xf] }
 0x190   :  { %v6961_v24 = vld [vmem:[#allocation11 + $0x364] sm:$0xf] }
 0x191   :  { %3625 = vmatpush.bf16.msrb.mxu0 %v5704_v33  ;;  %3638 = vmatpush.bf16.msrb.mxu1 %v5896_v37  ;;  %v6937_v33 = vld [vmem:[#allocation11 + $0x2a4] sm:$0xf]  ;;  %v5945_v37 = vld [vmem:[#allocation11 + $0x2b8] sm:$0xf0]  ;;  %v2211_v42 = vadd.f32 %v7537_v27, %v2198_v39  ;;  %v6039_v27 = vld [vmem:[#allocation11 + $0x360] sm:$0xf] }
 0x192   :  { %2429 = vmatpush.bf16.msra.mxu2 %v5364_v52  ;;  %v5948_v48 = vor.u32 %v6937_v33, %v5945_v37  ;;  %v5729_v52 = vld [vmem:[#allocation11 + $0x108] sm:$0xf0]  ;;  %v6985_v39 = vld [vmem:[#allocation11 + $0x424] sm:$0xf]  ;;  %v6979_v37 = vld [vmem:[#allocation11 + $0x3f4] sm:$0xf] }
 0x193   :  { %2442 = vmatpush.bf16.msra.mxu3 %v5492_v53  ;;  %v6931_v53 = vld [vmem:[#allocation11 + $0x274] sm:$0xf]  ;;  %v5732_v61 = vor.u32 %v6883_v58, %v5729_v52  ;;  %v6899_v58 = vld [vmem:[#allocation11 + $0x16c] sm:$0xf0] }
 0x194   :  { %v5924_v62 = vor.u32 %v6931_v53, %v5921_v56  ;;  %v6947_v52 = vld [vmem:[#allocation11 + $0x2ec] sm:$0xf0]  ;;  %v6973_v56 = vld [vmem:[#allocation11 + $0x3c4] sm:$0xf] }
 0x195   :  { %3626 = vmatpush.bf16.msrb.mxu0 %v5680_v57  ;;  %3639 = vmatpush.bf16.msrb.mxu1 %v5872_v59  ;;  %v6064_v57 = vor.u32 %v6970_v40, %v6063_v38  ;;  %v6964_v59 = vld [vmem:[#allocation11 + $0x374] sm:$0xf0]  ;;  %v5828_v40 = vor.u32 %v6907_v31, %v5825_v32  ;;  %v6923_v31 = vld [vmem:[#allocation11 + $0x22c] sm:$0xf0] }
 0x196   :  { %3648 = vmatpush.bf16.msrb.mxu2 %v6160_v0  ;;  %2443 = vmatmul.bf16.vlgmr.msra.gmra.mxu3 %v7482_v45  ;;  %v5969_v45 = vld [vmem:[#allocation11 + $0x2e8] sm:$0xf0]  ;;  %v5705_v0 = vld [vmem:[#allocation11 + $0xd8] sm:$0xf0]  ;;  %v6040_v6 = vor.u32 %v6964_v59, %v6039_v27 }
 0x197   :  { %2430 = vmatmul.bf16.vlgmr.msra.gmra.mxu2 %v7480_v44  ;;  %v5777_v44 = vld [vmem:[#allocation11 + $0x168] sm:$0xf0]  ;;  %v5972_v41 = vor.u32 %v6943_v21, %v5969_v45  ;;  %v5708_v12 = vor.u32 %v6877_v63, %v5705_v0  ;;  %v6164_v45 = vor.u32 %v6991_v50, %v6161_v54  ;;  %v6893_v63 = vld [vmem:[#allocation11 + $0x13c] sm:$0xf0]  ;;  %v5951_v0 = vld [vmem:[#allocation11 + $0x2a8] sm:$0xf] }
 0x198   :  { %v5780_v55 = vor.u32 %v6895_v20, %v5777_v44  ;;  %v6865_v20 = vld [vmem:[#allocation11 + $0x64] sm:$0xf]  ;;  %v5849_v44 = vld [vmem:[#allocation11 + $0x1f8] sm:$0xf0]  ;;  %v5711_v50 = vld [vmem:[#allocation11 + $0xc8] sm:$0xf] }
 0x199   :  { %3627 = vmatpush.bf16.msrb.mxu0 %v5656_v23  ;;  %3640 = vmatpush.bf16.msrb.mxu1 %v5848_v8  ;;  %v2236_v46 = vpop.f32.mrf.mxu3  ;;  %v5852_v29 = vor.u32 %v6913_v1, %v5849_v44  ;;  %v6881_v54 = vld [vmem:[#allocation11 + $0xdc] sm:$0xf0]  ;;  %v6017_v1 = vld [vmem:[#allocation11 + $0x348] sm:$0xf0] }
 0x19a   :  { %3649 = vmatpush.bf16.msrb.mxu2 %v6136_v15  ;;  %v2223_v43 = vpop.f32.mrf.mxu2  ;;  %v6871_v15 = vld [vmem:[#allocation11 + $0x94] sm:$0xf] }
 0x19b   :  { %v2224_v49 = vadd.f32 %v2223_v43, %v2211_v42  ;;  %v5684_v19 = vor.u32 %v6871_v15, %v5681_v17  ;;  %v6853_v42 = vld [vmem:[#allocation11 + $0x4] sm:$0xf]  ;;  %v5609_v43 = vld [vmem:[#allocation11 + $0x18] sm:$0xf0]  ;;  %v5927_v15 = vld [vmem:[#allocation11 + $0x278] sm:$0xf] }
 0x19c   :  { %v5612_v27 = vor.u32 %v6853_v42, %v5609_v43  ;;  %v6935_v17 = vld [vmem:[#allocation11 + $0x28c] sm:$0xf0]  ;;  %v6327_v42 = vld [vmem:[#allocation11 + $0x5a0] sm:$0xf]  ;;  %v7036_v43 = vld [vmem:[#allocation11 + $0x5b4] sm:$0xf0] }
 0x19d   :  { %3628 = vmatpush.bf16.msrb.mxu0 %v5632_v18  ;;  %3641 = vmatpush.bf16.msrb.mxu1 %v5824_v51  ;;  %v2237_v60 = vadd.f32 %v2236_v46, %v2224_v49  ;;  %v6016_v18 = vor.u32 %v6958_v7, %v6015_v13  ;;  %v5991_v51 = vld [vmem:[#allocation11 + $0x300] sm:$0xf]  ;;  %v6901_v46 = vld [vmem:[#allocation11 + $0x184] sm:$0xf]  ;;  %v5975_v49 = vld [vmem:[#allocation11 + $0x2d8] sm:$0xf] }
 0x19e   :  { %3650 = vmatpush.bf16.msrb.mxu2 %v6112_v35  ;;  %v5657_v35 = vld [vmem:[#allocation11 + $0x78] sm:$0xf0]  ;;  %v5992_v21 = vor.u32 %v6952_v34, %v5991_v51  ;;  %v5928_v34 = vor.u32 %v6935_v17, %v5927_v15  ;;  %v5615_v17 = vld [vmem:[#allocation11 + $0x8] sm:$0xf] }
 0x19f   :  { %v2449_v3 = vmax.f32 %v2237_v60, 0.0 }
 0x1a1   :  { %3629 = vmatpush.bf16.msrb.mxu0 %v5608_v28  ;;  %3642 = vmatpush.bf16.msrb.mxu1 %v5800_v36  ;;  %v7556_v23 = vpack.c.bf16 %v2449_v3, %v2449_v3  ;;  %v7558_v8 = vpop.f32.mrf.mxu0  ;;  %v7560_v9 = vpop.f32.mrf.mxu1  ;;  %v6137_v28 = vld [vmem:[#allocation11 + $0x438] sm:$0xf0]  ;;  %v5660_v36 = vor.u32 %v6865_v20, %v5657_v35  ;;  %v6941_v3 = vld [vmem:[#allocation11 + $0x2bc] sm:$0xf0]  ;;  %v6955_v35 = vld [vmem:[#allocation11 + $0x334] sm:$0xf] }
 0x1a2   :  { %3651 = vmatpush.bf16.msrb.mxu2 %v6088_v2  ;;  %v2225_v10 = vpop.f32.mrf.mxu2  ;;  %v2238_v11 = vpop.f32.mrf.mxu3  ;;  %v6140_v33 = vor.u32 %v6985_v39, %v6137_v28  ;;  %v6113_v2 = vld [vmem:[#allocation11 + $0x408] sm:$0xf0]  ;;  %v5952_v7 = vor.u32 %v6941_v3, %v5951_v0  ;;  %v6351_v39 = vld [vmem:[#allocation11 + $0x5d0] sm:$0xf]  ;;  %v7042_v28 = vld [vmem:[#allocation11 + $0x5e4] sm:$0xf0]  ;;  %v6020_v32 = vor.u32 %v6955_v35, %v6017_v1 }
 0x1a3   :  { %v6116_v53 = vor.u32 %v6979_v37, %v6113_v2  ;;  %v5735_v10 = vld [vmem:[#allocation11 + $0xf8] sm:$0xf]  ;;  %v7573_v37 = vld [vmem:[#allocation10] sm:$0xf]  ;;  %v6863_v3 = vld [vmem:[#allocation11 + $0x4c] sm:$0xf0] }
 0x1a4   :  { %3630 = vmatmul.bf16.vlgmr.msrb.gmra.mxu0 %v7553_v26  ;;  %3643 = vmatmul.bf16.vlgmr.msrb.gmra.mxu1 %v7556_v23  ;;  %v746_v2 = vperm.slane %v7573_v37, 2  ;;  %v5639_v0 = vld [vmem:[#allocation11 + $0x38] sm:$0xf] }
 0x1a5   :  { %3674 = vmatpush.bf16.msra.mxu0 %v5780_v55  ;;  %3687 = vmatpush.bf16.msra.mxu1 %v5972_v41  ;;  %v6859_v55 = vld [vmem:[#allocation11 + $0x34] sm:$0xf]  ;;  %v5633_v41 = vld [vmem:[#allocation11 + $0x48] sm:$0xf0] }
 0x1a6   :  { %3652 = vmatpush.bf16.msrb.mxu2 %v6064_v57  ;;  %v5636_v38 = vor.u32 %v6859_v55, %v5633_v41  ;;  %v6089_v57 = vld [vmem:[#allocation11 + $0x3d8] sm:$0xf0]  ;;  %v6875_v55 = vld [vmem:[#allocation11 + $0xac] sm:$0xf0]  ;;  %v5879_v41 = vld [vmem:[#allocation11 + $0x218] sm:$0xf] }
 0x1a7   :  { %v6092_v4 = vor.u32 %v6973_v56, %v6089_v57  ;;  %v2250_v57 = vadd.f32 %v7558_v8, %v746_v2  ;;  %v6279_v8 = vld [vmem:[#allocation11 + $0x540] sm:$0xf] }
 0x1a9   :  { %3675 = vmatpush.bf16.msra.mxu0 %v5756_v47  ;;  %3688 = vmatpush.bf16.msra.mxu1 %v5948_v48  ;;  %v2251_v25 = vpop.f32.mrf.mxu0  ;;  %v2264_v22 = vpop.f32.mrf.mxu1  ;;  %v5801_v47 = vld [vmem:[#allocation11 + $0x198] sm:$0xf0]  ;;  %v5783_v48 = vld [vmem:[#allocation11 + $0x158] sm:$0xf] }
 0x1aa   :  { %3653 = vmatpush.bf16.msrb.mxu2 %v6040_v6  ;;  %v5804_v59 = vor.u32 %v6901_v46, %v5801_v47  ;;  %v5784_v60 = vor.u32 %v6899_v58, %v5783_v48  ;;  %v6065_v6 = vld [vmem:[#allocation11 + $0x3a8] sm:$0xf0]  ;;  %v5687_v22 = vld [vmem:[#allocation11 + $0x98] sm:$0xf]  ;;  %v5880_v47 = vor.u32 %v6923_v31, %v5879_v41  ;;  %v5663_v48 = vld [vmem:[#allocation11 + $0x68] sm:$0xf]  ;;  %v6328_v58 = vor.u32 %v7036_v43, %v6327_v42 }
 0x1ab   :  { %v6068_v16 = vor.u32 %v6967_v5, %v6065_v6  ;;  %v5688_v46 = vor.u32 %v6875_v55, %v5687_v22  ;;  %v5831_v5 = vld [vmem:[#allocation11 + $0x1b8] sm:$0xf]  ;;  %v6911_v6 = vld [vmem:[#allocation11 + $0x1cc] sm:$0xf0]  ;;  %v6890_v22 = vld [vmem:[#allocation11 + $0x12c] sm:$0xf] }
 0x1ac   :  { %v5832_v15 = vor.u32 %v6911_v6, %v5831_v5  ;;  %v6231_v55 = vld [vmem:[#allocation11 + $0x4e0] sm:$0xf]  ;;  %v7012_v41 = vld [vmem:[#allocation11 + $0x4f4] sm:$0xf0]  ;;  %v5929_v42 = vld [vmem:[#allocation11 + $0x290] sm:$0xf0] }
 0x1ad   :  { %3676 = vmatpush.bf16.msra.mxu0 %v5732_v61  ;;  %3689 = vmatpush.bf16.msra.mxu1 %v5924_v62  ;;  %v5976_v61 = vor.u32 %v6947_v52, %v5975_v49  ;;  %v5759_v62 = vld [vmem:[#allocation11 + $0x128] sm:$0xf]  ;;  %v6869_v49 = vld [vmem:[#allocation11 + $0x7c] sm:$0xf0]  ;;  %v5689_v5 = vld [vmem:[#allocation11 + $0xb0] sm:$0xf0] }
 0x1ae   :  { %3654 = vmatpush.bf16.msrb.mxu2 %v6016_v18  ;;  %v5760_v13 = vor.u32 %v6893_v63, %v5759_v62  ;;  %v6041_v18 = vld [vmem:[#allocation11 + $0x378] sm:$0xf0]  ;;  %v5855_v52 = vld [vmem:[#allocation11 + $0x1e8] sm:$0xf]  ;;  %v5664_v62 = vor.u32 %v6869_v49, %v5663_v48 }
 0x1af   :  { %v6044_v20 = vor.u32 %v6961_v24, %v6041_v18  ;;  %v5807_v18 = vld [vmem:[#allocation11 + $0x188] sm:$0xf] }
 0x1b0   :  { %v7006_v48 = vld [vmem:[#allocation11 + $0x4c4] sm:$0xf0] }
 0x1b1   :  { %3677 = vmatpush.bf16.msra.mxu0 %v5708_v12  ;;  %3690 = vmatpush.bf16.msra.mxu1 %v5900_v14  ;;  %v6887_v14 = vld [vmem:[#allocation11 + $0x10c] sm:$0xf0] }
 0x1b2   :  { %3655 = vmatpush.bf16.msrb.mxu2 %v5992_v21  ;;  %v5736_v51 = vor.u32 %v6887_v14, %v5735_v10  ;;  %v7024_v10 = vld [vmem:[#allocation11 + $0x554] sm:$0xf0] }
 0x1b3   :  { %v6280_v24 = vor.u32 %v7024_v10, %v6279_v8 }
 0x1b5   :  { %3678 = vmatpush.bf16.msra.mxu0 %v5684_v19  ;;  %3691 = vmatpush.bf16.msra.mxu1 %v5876_v30  ;;  %v5903_v19 = vld [vmem:[#allocation11 + $0x248] sm:$0xf]  ;;  %v6929_v30 = vld [vmem:[#allocation11 + $0x25c] sm:$0xf0] }
 0x1b6   :  { %3700 = vmatpush.bf16.msra.mxu2 %v6164_v45  ;;  %v5712_v45 = vor.u32 %v6881_v54, %v5711_v50  ;;  %v5904_v25 = vor.u32 %v6929_v30, %v5903_v19  ;;  %v5785_v50 = vld [vmem:[#allocation11 + $0x170] sm:$0xf0]  ;;  %v6944_v54 = vld [vmem:[#allocation11 + $0x2dc] sm:$0xf] }
 0x1b7   :  { %v5977_v19 = vld [vmem:[#allocation11 + $0x2f0] sm:$0xf0] }
 0x1b9   :  { %3679 = vmatpush.bf16.msra.mxu0 %v5660_v36  ;;  %3692 = vmatpush.bf16.msra.mxu1 %v5852_v29  ;;  %v7565_v12 = vpop.f32.mrf.mxu3 }
 0x1ba   :  { %3701 = vmatpush.bf16.msra.mxu2 %v6140_v33  ;;  %v7563_v11 = vpop.f32.mrf.mxu2  ;;  %v6352_v33 = vor.u32 %v7042_v28, %v6351_v39  ;;  %v5761_v28 = vld [vmem:[#allocation11 + $0x140] sm:$0xf0] }
 0x1bc   :  { %3661 = vmatpush.bf16.msrb.mxu3 %v6352_v33  ;;  %v6232_v33 = vor.u32 %v7012_v41, %v6231_v55  ;;  %v7027_v55 = vld [vmem:[#allocation11 + $0x574] sm:$0xf]  ;;  %v6305_v41 = vld [vmem:[#allocation11 + $0x588] sm:$0xf0] }
 0x1bd   :  { %3680 = vmatpush.bf16.msra.mxu0 %v5636_v38  ;;  %3693 = vmatpush.bf16.msra.mxu1 %v5828_v40  ;;  %v6949_v38 = vld [vmem:[#allocation11 + $0x304] sm:$0xf]  ;;  %v5993_v40 = vld [vmem:[#allocation11 + $0x318] sm:$0xf0] }
 0x1be   :  { %3702 = vmatpush.bf16.msra.mxu2 %v6116_v53  ;;  %v6917_v53 = vld [vmem:[#allocation11 + $0x1fc] sm:$0xf0]  ;;  %v5996_v56 = vor.u32 %v6949_v38, %v5993_v40  ;;  %v5737_v38 = vld [vmem:[#allocation11 + $0x110] sm:$0xf0]  ;;  %v6932_v40 = vld [vmem:[#allocation11 + $0x27c] sm:$0xf] }
 0x1bf   :  { %v5856_v63 = vor.u32 %v6917_v53, %v5855_v52  ;;  %v5932_v49 = vor.u32 %v6932_v40, %v5929_v42  ;;  %v6878_v52 = vld [vmem:[#allocation11 + $0xcc] sm:$0xf]  ;;  %v6308_v40 = vor.u32 %v7027_v55, %v6305_v41  ;;  %v6095_v42 = vld [vmem:[#allocation11 + $0x3c8] sm:$0xf] }
 0x1c0   :  { %3662 = vmatpush.bf16.msrb.mxu3 %v6328_v58  ;;  %v5999_v41 = vld [vmem:[#allocation11 + $0x308] sm:$0xf] }
 0x1c1   :  { %3681 = vmatpush.bf16.msra.mxu0 %v5612_v27  ;;  %3694 = vmatpush.bf16.msra.mxu1 %v5804_v59  ;;  %v7569_v44 = vpop.f32.mrf.mxu0  ;;  %v7571_v21 = vpop.f32.mrf.mxu1  ;;  %v6303_v27 = vld [vmem:[#allocation11 + $0x570] sm:$0xf]  ;;  %v7030_v59 = vld [vmem:[#allocation11 + $0x584] sm:$0xf0] }
 0x1c2   :  { %3703 = vmatpush.bf16.msra.mxu2 %v6092_v4  ;;  %v2277_v36 = vpop.f32.mrf.mxu2  ;;  %v2290_v29 = vpop.f32.mrf.mxu3  ;;  %v6304_v4 = vor.u32 %v7030_v59, %v6303_v27  ;;  %v5905_v27 = vld [vmem:[#allocation11 + $0x260] sm:$0xf0]  ;;  %v6167_v59 = vld [vmem:[#allocation11 + $0x458] sm:$0xf] }
 0x1c3   :  { %v6938_v36 = vld [vmem:[#allocation11 + $0x2ac] sm:$0xf]  ;;  %v5953_v29 = vld [vmem:[#allocation11 + $0x2c0] sm:$0xf0] }
 0x1c4   :  { %3682 = vmatmul.bf16.vlgmr.msra.gmra.mxu0 %v7553_v26  ;;  %3695 = vmatmul.bf16.vlgmr.msra.gmra.mxu1 %v7556_v23  ;;  %v5956_v31 = vor.u32 %v6938_v36, %v5953_v29  ;;  %v6860_v29 = vld [vmem:[#allocation11 + $0x3c] sm:$0xf] }
 0x1c5   :  { %3726 = vmatpush.bf16.msrb.mxu0 %v5784_v60  ;;  %3739 = vmatpush.bf16.msrb.mxu1 %v5976_v61 }
 0x1c6   :  { %3704 = vmatpush.bf16.msra.mxu2 %v6068_v16  ;;  %3663 = vmatpush.bf16.msrb.mxu3 %v6304_v4  ;;  %v6857_v16 = vld [vmem:[#allocation11 + $0x1c] sm:$0xf0]  ;;  %v6872_v4 = vld [vmem:[#allocation11 + $0x9c] sm:$0xf] }
 0x1c7   :  { %v5616_v30 = vor.u32 %v6857_v16, %v5615_v17  ;;  %v6143_v17 = vld [vmem:[#allocation11 + $0x428] sm:$0xf] }
 0x1c9   :  { %3727 = vmatpush.bf16.msrb.mxu0 %v5760_v13  ;;  %3740 = vmatpush.bf16.msrb.mxu1 %v5952_v7  ;;  %v2303_v60 = vpop.f32.mrf.mxu0  ;;  %v2316_v61 = vpop.f32.mrf.mxu1  ;;  %v2263_v13 = vadd.f32 %v7560_v9, %v2250_v57  ;;  %v5640_v7 = vor.u32 %v6863_v3, %v5639_v0  ;;  %v6255_v9 = vld [vmem:[#allocation11 + $0x510] sm:$0xf]  ;;  %v6926_v57 = vld [vmem:[#allocation11 + $0x24c] sm:$0xf] }
 0x1ca   :  { %3705 = vmatpush.bf16.msra.mxu2 %v6044_v20  ;;  %3664 = vmatpush.bf16.msrb.mxu3 %v6280_v24  ;;  %v7018_v20 = vld [vmem:[#allocation11 + $0x524] sm:$0xf0]  ;;  %v6995_v60 = vld [vmem:[#allocation11 + $0x46c] sm:$0xf0]  ;;  %v5908_v3 = vor.u32 %v6926_v57, %v5905_v27 }
 0x1cb   :  { %v2276_v14 = vadd.f32 %v7563_v11, %v2263_v13  ;;  %v6256_v1 = vor.u32 %v7018_v20, %v6255_v9  ;;  %v6168_v10 = vor.u32 %v6995_v60, %v6167_v59  ;;  %v5665_v9 = vld [vmem:[#allocation11 + $0x80] sm:$0xf0]  ;;  %v6971_v27 = vld [vmem:[#allocation11 + $0x3ac] sm:$0xf0]  ;;  %v5791_v59 = vld [vmem:[#allocation11 + $0x160] sm:$0xf] }
 0x1cc   :  { %v7033_v20 = vld [vmem:[#allocation11 + $0x5a4] sm:$0xf]  ;;  %v6900_v60 = vld [vmem:[#allocation11 + $0x174] sm:$0xf0] }
 0x1cd   :  { %3728 = vmatpush.bf16.msrb.mxu0 %v5736_v51  ;;  %3741 = vmatpush.bf16.msrb.mxu1 %v5928_v34  ;;  %v6905_v51 = vld [vmem:[#allocation11 + $0x19c] sm:$0xf0]  ;;  %v6896_v34 = vld [vmem:[#allocation11 + $0x15c] sm:$0xf]  ;;  %v2289_v35 = vadd.f32 %v7565_v12, %v2276_v14  ;;  %v5764_v12 = vor.u32 %v6890_v22, %v5761_v28  ;;  %v6983_v22 = vld [vmem:[#allocation11 + $0x40c] sm:$0xf0] }
 0x1ce   :  { %3706 = vmatpush.bf16.msra.mxu2 %v6020_v32  ;;  %v5808_v11 = vor.u32 %v6905_v51, %v5807_v18  ;;  %3665 = vmatpush.bf16.msrb.mxu3 %v6256_v1  ;;  %v6884_v32 = vld [vmem:[#allocation11 + $0xfc] sm:$0xf]  ;;  %v6989_v18 = vld [vmem:[#allocation11 + $0x43c] sm:$0xf0]  ;;  %v7039_v51 = vld [vmem:[#allocation11 + $0x5d4] sm:$0xf] }
 0x1cf   :  { %v2302_v39 = vadd.f32 %v7569_v44, %v2289_v35  ;;  %v5740_v58 = vor.u32 %v6884_v32, %v5737_v38  ;;  %v6920_v14 = vld [vmem:[#allocation11 + $0x21c] sm:$0xf]  ;;  %v6144_v35 = vor.u32 %v6989_v18, %v6143_v17  ;;  %v5857_v1 = vld [vmem:[#allocation11 + $0x200] sm:$0xf0]  ;;  %v5833_v38 = vld [vmem:[#allocation11 + $0x1d0] sm:$0xf0] }
 0x1d0   :  { %v5767_v17 = vld [vmem:[#allocation11 + $0x130] sm:$0xf] }
 0x1d1   :  { %3729 = vmatpush.bf16.msrb.mxu0 %v5712_v45  ;;  %3742 = vmatpush.bf16.msrb.mxu1 %v5904_v25  ;;  %v5788_v45 = vor.u32 %v6896_v34, %v5785_v50  ;;  %v5980_v25 = vor.u32 %v6944_v54, %v5977_v19  ;;  %v2315_v2 = vadd.f32 %v7571_v21, %v2302_v39  ;;  %v6353_v34 = vld [vmem:[#allocation11 + $0x5e8] sm:$0xf0]  ;;  %v5959_v18 = vld [vmem:[#allocation11 + $0x2b0] sm:$0xf] }
 0x1d2   :  { %3707 = vmatpush.bf16.msra.mxu2 %v5996_v56  ;;  %3666 = vmatpush.bf16.msrb.mxu3 %v6232_v33  ;;  %v5713_v56 = vld [vmem:[#allocation11 + $0xe0] sm:$0xf0]  ;;  %v6356_v50 = vor.u32 %v7039_v51, %v6353_v34  ;;  %v5692_v54 = vor.u32 %v6872_v4, %v5689_v5  ;;  %v5641_v33 = vld [vmem:[#allocation11 + $0x50] sm:$0xf0]  ;;  %v6257_v4 = vld [vmem:[#allocation11 + $0x528] sm:$0xf0] }
 0x1d3   :  { %v5716_v0 = vor.u32 %v6878_v52, %v5713_v56  ;;  %v6071_v56 = vld [vmem:[#allocation11 + $0x398] sm:$0xf]  ;;  %v6942_v51 = vld [vmem:[#allocation11 + $0x2c4] sm:$0xf0]  ;;  %v7009_v34 = vld [vmem:[#allocation11 + $0x4e4] sm:$0xf] }
 0x1d4   :  { %v6072_v5 = vor.u32 %v6971_v27, %v6071_v56  ;;  %v6924_v27 = vld [vmem:[#allocation11 + $0x234] sm:$0xf0] }
 0x1d5   :  { %3730 = vmatpush.bf16.msrb.mxu0 %v5688_v46  ;;  %3743 = vmatpush.bf16.msrb.mxu1 %v5880_v47  ;;  %v6207_v47 = vld [vmem:[#allocation11 + $0x4b0] sm:$0xf] }
 0x1d6   :  { %v6208_v53 = vor.u32 %v7006_v48, %v6207_v47  ;;  %v5617_v48 = vld [vmem:[#allocation11 + $0x20] sm:$0xf0] }
 0x1d8   :  { %3667 = vmatpush.bf16.msrb.mxu3 %v6208_v53  ;;  %v6902_v53 = vld [vmem:[#allocation11 + $0x18c] sm:$0xf] }
 0x1d9   :  { %3731 = vmatpush.bf16.msrb.mxu0 %v5664_v62  ;;  %3744 = vmatpush.bf16.msrb.mxu1 %v5856_v63  ;;  %v2340_v43 = vpop.f32.mrf.mxu3  ;;  %v6183_v62 = vld [vmem:[#allocation11 + $0x480] sm:$0xf]  ;;  %v7000_v63 = vld [vmem:[#allocation11 + $0x494] sm:$0xf0] }
 0x1da   :  { %v2327_v44 = vpop.f32.mrf.mxu2  ;;  %v6184_v6 = vor.u32 %v7000_v63, %v6183_v62  ;;  %v6948_v62 = vld [vmem:[#allocation11 + $0x2f4] sm:$0xf0] }
 0x1db   :  { %v2328_v46 = vadd.f32 %v2327_v44, %v2315_v2  ;;  %v6908_v2 = vld [vmem:[#allocation11 + $0x1bc] sm:$0xf]  ;;  %v6977_v44 = vld [vmem:[#allocation11 + $0x3dc] sm:$0xf0] }
 0x1dc   :  { %3668 = vmatpush.bf16.msrb.mxu3 %v6184_v6  ;;  %v5836_v47 = vor.u32 %v6908_v2, %v5833_v38  ;;  %v6096_v52 = vor.u32 %v6977_v44, %v6095_v42  ;;  %v5792_v6 = vor.u32 %v6900_v60, %v5791_v59  ;;  %v5911_v2 = vld [vmem:[#allocation11 + $0x250] sm:$0xf]  ;;  %v6992_v42 = vld [vmem:[#allocation11 + $0x45c] sm:$0xf]  ;;  %v6169_v44 = vld [vmem:[#allocation11 + $0x470] sm:$0xf0] }
 0x1dd   :  { %3732 = vmatpush.bf16.msrb.mxu0 %v5640_v7  ;;  %3745 = vmatpush.bf16.msrb.mxu1 %v5832_v15  ;;  %v2341_v21 = vadd.f32 %v2340_v43, %v2328_v46  ;;  %v5881_v15 = vld [vmem:[#allocation11 + $0x230] sm:$0xf0]  ;;  %v6854_v43 = vld [vmem:[#allocation11 + $0xc] sm:$0xf]  ;;  %v5644_v46 = vor.u32 %v6860_v29, %v5641_v33  ;;  %v6882_v33 = vld [vmem:[#allocation11 + $0xe4] sm:$0xf0] }
 0x1de   :  { %v5884_v19 = vor.u32 %v6920_v14, %v5881_v15  ;;  %v5620_v63 = vor.u32 %v6854_v43, %v5617_v48  ;;  %v6965_v15 = vld [vmem:[#allocation11 + $0x37c] sm:$0xf0]  ;;  %v6997_v43 = vld [vmem:[#allocation11 + $0x484] sm:$0xf]  ;;  %v6986_v59 = vld [vmem:[#allocation11 + $0x42c] sm:$0xf] }
 0x1df   :  { %v2450_v61 = vmax.f32 %v2341_v21, 0.0  ;;  %v5809_v21 = vld [vmem:[#allocation11 + $0x1a0] sm:$0xf0] }
 0x1e0   :  { %3713 = vmatpush.bf16.msra.mxu3 %v6356_v50  ;;  %v6233_v50 = vld [vmem:[#allocation11 + $0x4f8] sm:$0xf0]  ;;  %v6145_v60 = vld [vmem:[#allocation11 + $0x440] sm:$0xf0] }
 0x1e1   :  { %3733 = vmatpush.bf16.msrb.mxu0 %v5616_v30  ;;  %3746 = vmatpush.bf16.msrb.mxu1 %v5808_v11  ;;  %v7584_v13 = vpack.c.bf16 %v2450_v61, %v2450_v61  ;;  %v7586_v7 = vpop.f32.mrf.mxu0  ;;  %v7588_v8 = vpop.f32.mrf.mxu1  ;;  %v6866_v30 = vld [vmem:[#allocation11 + $0x6c] sm:$0xf]  ;;  %v5983_v61 = vld [vmem:[#allocation11 + $0x2e0] sm:$0xf] }
 0x1e2   :  { %v2329_v16 = vpop.f32.mrf.mxu2  ;;  %v2342_v24 = vpop.f32.mrf.mxu3  ;;  %v6914_v11 = vld [vmem:[#allocation11 + $0x1ec] sm:$0xf]  ;;  %v5668_v28 = vor.u32 %v6866_v30, %v5665_v9  ;;  %v5984_v14 = vor.u32 %v6948_v62, %v5983_v61  ;;  %v6023_v30 = vld [vmem:[#allocation11 + $0x338] sm:$0xf]  ;;  %v5960_v9 = vor.u32 %v6942_v51, %v5959_v18 }
 0x1e3   :  { %3656 = vmatmul.bf16.vlgmr.msrb.gmra.mxu2 %v7584_v13  ;;  %v5860_v36 = vor.u32 %v6914_v11, %v5857_v1  ;;  %v6894_v16 = vld [vmem:[#allocation11 + $0x144] sm:$0xf0]  ;;  %v6888_v11 = vld [vmem:[#allocation11 + $0x114] sm:$0xf0]  ;;  %v6236_v1 = vor.u32 %v7009_v34, %v6233_v50  ;;  %v5647_v34 = vld [vmem:[#allocation11 + $0x40] sm:$0xf] }
 0x1e4   :  { %3734 = vmatmul.bf16.vlgmr.msrb.gmra.mxu0 %v7553_v26  ;;  %3747 = vmatmul.bf16.vlgmr.msrb.gmra.mxu1 %v7556_v23  ;;  %v6864_v50 = vld [vmem:[#allocation11 + $0x54] sm:$0xf0] }
 0x1e5   :  { %3778 = vmatpush.bf16.msra.mxu0 %v5788_v45  ;;  %3791 = vmatpush.bf16.msra.mxu1 %v5980_v25  ;;  %v6329_v45 = vld [vmem:[#allocation11 + $0x5b8] sm:$0xf0]  ;;  %v6119_v25 = vld [vmem:[#allocation11 + $0x3f8] sm:$0xf] }
 0x1e6   :  { %3752 = vmatpush.bf16.msrb.mxu2 %v6168_v10  ;;  %v6332_v39 = vor.u32 %v7033_v20, %v6329_v45  ;;  %v6120_v32 = vor.u32 %v6983_v22, %v6119_v25  ;;  %v6047_v10 = vld [vmem:[#allocation11 + $0x368] sm:$0xf]  ;;  %v6959_v20 = vld [vmem:[#allocation11 + $0x34c] sm:$0xf0]  ;;  %v5935_v45 = vld [vmem:[#allocation11 + $0x280] sm:$0xf] }
 0x1e7   :  { %v6936_v25 = vld [vmem:[#allocation11 + $0x294] sm:$0xf0]  ;;  %v6024_v29 = vor.u32 %v6959_v20, %v6023_v30  ;;  %v6974_v20 = vld [vmem:[#allocation11 + $0x3cc] sm:$0xf] }
 0x1e8   :  { %3714 = vmatpush.bf16.msra.mxu3 %v6332_v39 }
 0x1e9   :  { %3779 = vmatpush.bf16.msra.mxu0 %v5764_v12  ;;  %3792 = vmatpush.bf16.msra.mxu1 %v5956_v31  ;;  %v2355_v12 = vpop.f32.mrf.mxu0  ;;  %v2368_v31 = vpop.f32.mrf.mxu1 }
 0x1ea   :  { %3753 = vmatpush.bf16.msrb.mxu2 %v6144_v35  ;;  %v5743_v35 = vld [vmem:[#allocation11 + $0x100] sm:$0xf]  ;;  %v5936_v31 = vor.u32 %v6936_v25, %v5935_v45  ;;  %v5623_v45 = vld [vmem:[#allocation11 + $0x10] sm:$0xf] }
 0x1eb   :  { %v5744_v55 = vor.u32 %v6888_v11, %v5743_v35  ;;  %v6953_v12 = vld [vmem:[#allocation11 + $0x31c] sm:$0xf0]  ;;  %v6097_v35 = vld [vmem:[#allocation11 + $0x3e0] sm:$0xf0] }
 0x1ec   :  { %3715 = vmatpush.bf16.msra.mxu3 %v6308_v40  ;;  %v6930_v40 = vld [vmem:[#allocation11 + $0x264] sm:$0xf0]  ;;  %v6100_v25 = vor.u32 %v6974_v20, %v6097_v35  ;;  %v6873_v35 = vld [vmem:[#allocation11 + $0xa4] sm:$0xf] }
 0x1ed   :  { %3780 = vmatpush.bf16.msra.mxu0 %v5740_v58  ;;  %3793 = vmatpush.bf16.msra.mxu1 %v5932_v49  ;;  %v7021_v58 = vld [vmem:[#allocation11 + $0x544] sm:$0xf]  ;;  %v6281_v49 = vld [vmem:[#allocation11 + $0x558] sm:$0xf0] }
 0x1ee   :  { %3754 = vmatpush.bf16.msrb.mxu2 %v6120_v32  ;;  %v6284_v57 = vor.u32 %v7021_v58, %v6281_v49  ;;  %v5719_v32 = vld [vmem:[#allocation11 + $0xd0] sm:$0xf]  ;;  %v5912_v58 = vor.u32 %v6930_v40, %v5911_v2  ;;  %v6172_v49 = vor.u32 %v6992_v42, %v6169_v44  ;;  %v5985_v2 = vld [vmem:[#allocation11 + $0x2f8] sm:$0xf0] }
 0x1ef   :  { %v5720_v48 = vor.u32 %v6882_v33, %v5719_v32  ;;  %v5793_v32 = vld [vmem:[#allocation11 + $0x178] sm:$0xf0]  ;;  %v6945_v33 = vld [vmem:[#allocation11 + $0x2e4] sm:$0xf] }
 0x1f0   :  { %3716 = vmatpush.bf16.msra.mxu3 %v6284_v57 }
 0x1f1   :  { %3781 = vmatpush.bf16.msra.mxu0 %v5716_v0  ;;  %3794 = vmatpush.bf16.msra.mxu1 %v5908_v3  ;;  %v5812_v0 = vor.u32 %v6902_v53, %v5809_v21  ;;  %v7015_v3 = vld [vmem:[#allocation11 + $0x514] sm:$0xf]  ;;  %v6876_v53 = vld [vmem:[#allocation11 + $0xb4] sm:$0xf0]  ;;  %v5887_v21 = vld [vmem:[#allocation11 + $0x220] sm:$0xf] }
 0x1f2   :  { %3755 = vmatpush.bf16.msrb.mxu2 %v6096_v52  ;;  %v6260_v24 = vor.u32 %v7015_v3, %v6257_v4  ;;  %v5695_v52 = vld [vmem:[#allocation11 + $0xa0] sm:$0xf]  ;;  %v5888_v4 = vor.u32 %v6924_v27, %v5887_v21 }
 0x1f3   :  { %3708 = vmatmul.bf16.vlgmr.msra.gmra.mxu2 %v7584_v13  ;;  %v5696_v3 = vor.u32 %v6876_v53, %v5695_v52 }
 0x1f4   :  { %3717 = vmatpush.bf16.msra.mxu3 %v6260_v24 }
 0x1f5   :  { %3782 = vmatpush.bf16.msra.mxu0 %v5692_v54  ;;  %3795 = vmatpush.bf16.msra.mxu1 %v5884_v19  ;;  %v6048_v54 = vor.u32 %v6965_v15, %v6047_v10  ;;  %v5768_v19 = vor.u32 %v6894_v16, %v5767_v17  ;;  %v6870_v10 = vld [vmem:[#allocation11 + $0x84] sm:$0xf0]  ;;  %v6980_v17 = vld [vmem:[#allocation11 + $0x3fc] sm:$0xf]  ;;  %v6121_v16 = vld [vmem:[#allocation11 + $0x410] sm:$0xf0] }
 0x1f6   :  { %3756 = vmatpush.bf16.msrb.mxu2 %v6072_v5  ;;  %v6148_v5 = vor.u32 %v6986_v59, %v6145_v60  ;;  %v6918_v15 = vld [vmem:[#allocation11 + $0x204] sm:$0xf0]  ;;  %v6124_v51 = vor.u32 %v6980_v17, %v6121_v16  ;;  %v6956_v59 = vld [vmem:[#allocation11 + $0x33c] sm:$0xf]  ;;  %v6885_v60 = vld [vmem:[#allocation11 + $0x104] sm:$0xf] }
 0x1f7   :  { %v6879_v17 = vld [vmem:[#allocation11 + $0xd4] sm:$0xf]  ;;  %v5721_v16 = vld [vmem:[#allocation11 + $0xe8] sm:$0xf0] }
 0x1f8   :  { %3718 = vmatpush.bf16.msra.mxu3 %v6236_v1  ;;  %v5648_v1 = vor.u32 %v6864_v50, %v5647_v34  ;;  %v6359_v50 = vld [vmem:[#allocation11 + $0x5d8] sm:$0xf] }
 0x1f9   :  { %3783 = vmatpush.bf16.msra.mxu0 %v5668_v28  ;;  %3796 = vmatpush.bf16.msra.mxu1 %v5860_v36  ;;  %v7596_v39 = vpop.f32.mrf.mxu3  ;;  %v7003_v28 = vld [vmem:[#allocation11 + $0x4b4] sm:$0xf]  ;;  %v6209_v36 = vld [vmem:[#allocation11 + $0x4c8] sm:$0xf0] }
 0x1fa   :  { %v7594_v22 = vpop.f32.mrf.mxu2  ;;  %3757 = vmatpush.bf16.msrb.mxu2 %v6048_v54  ;;  %v6212_v38 = vor.u32 %v7003_v28, %v6209_v36  ;;  %v5839_v54 = vld [vmem:[#allocation11 + $0x1c0] sm:$0xf]  ;;  %v6858_v28 = vld [vmem:[#allocation11 + $0x24] sm:$0xf0]  ;;  %v5815_v36 = vld [vmem:[#allocation11 + $0x190] sm:$0xf] }
 0x1fc   :  { %3719 = vmatpush.bf16.msra.mxu3 %v6212_v38 }
 0x1fd   :  { %3784 = vmatpush.bf16.msra.mxu0 %v5644_v46  ;;  %3797 = vmatpush.bf16.msra.mxu1 %v5836_v47  ;;  %v6185_v46 = vld [vmem:[#allocation11 + $0x498] sm:$0xf0]  ;;  %v6000_v47 = vor.u32 %v6953_v12, %v5999_v41  ;;  %v6073_v12 = vld [vmem:[#allocation11 + $0x3b0] sm:$0xf0] }
 0x1fe   :  { %3758 = vmatpush.bf16.msrb.mxu2 %v6024_v29  ;;  %v6188_v61 = vor.u32 %v6997_v43, %v6185_v46  ;;  %v6906_v29 = vld [vmem:[#allocation11 + $0x1a4] sm:$0xf0]  ;;  %v6968_v41 = vld [vmem:[#allocation11 + $0x39c] sm:$0xf]  ;;  %v5988_v43 = vor.u32 %v6945_v33, %v5985_v2  ;;  %v6962_v46 = vld [vmem:[#allocation11 + $0x36c] sm:$0xf] }
 0x1ff   :  { %v5816_v38 = vor.u32 %v6906_v29, %v5815_v36  ;;  %v6076_v40 = vor.u32 %v6968_v41, %v6073_v12  ;;  %v6151_v29 = vld [vmem:[#allocation11 + $0x430] sm:$0xf] }
 0x200   :  { %3720 = vmatpush.bf16.msra.mxu3 %v6188_v61  ;;  %v5745_v61 = vld [vmem:[#allocation11 + $0x118] sm:$0xf0] }
 0x201   :  { %3785 = vmatpush.bf16.msra.mxu0 %v5620_v63  ;;  %3798 = vmatpush.bf16.msra.mxu1 %v5812_v0  ;;  %v7598_v56 = vpop.f32.mrf.mxu0  ;;  %v7600_v57 = vpop.f32.mrf.mxu1  ;;  %v747_v0 = vperm.slane %v7573_v37, 3 }
 0x202   :  { %v2381_v62 = vpop.f32.mrf.mxu2  ;;  %v2394_v63 = vpop.f32.mrf.mxu3  ;;  %3759 = vmatpush.bf16.msrb.mxu2 %v6000_v47  ;;  %v6049_v47 = vld [vmem:[#allocation11 + $0x380] sm:$0xf0] }
 0x203   :  { %v2354_v24 = vadd.f32 %v7586_v7, %v747_v0  ;;  %v6052_v53 = vor.u32 %v6962_v46, %v6049_v47  ;;  %v6933_v62 = vld [vmem:[#allocation11 + $0x284] sm:$0xf]  ;;  %v5937_v63 = vld [vmem:[#allocation11 + $0x298] sm:$0xf0]  ;;  %v6127_v47 = vld [vmem:[#allocation11 + $0x400] sm:$0xf] }
 0x204   :  { %3786 = vmatmul.bf16.vlgmr.msra.gmra.mxu0 %v7553_v26  ;;  %3799 = vmatmul.bf16.vlgmr.msra.gmra.mxu1 %v7556_v23 }
 0x205   :  { %3830 = vmatpush.bf16.msrb.mxu0 %v5792_v6  ;;  %3843 = vmatpush.bf16.msrb.mxu1 %v5984_v14  ;;  %v5671_v6 = vld [vmem:[#allocation11 + $0x70] sm:$0xf]  ;;  %v2367_v11 = vadd.f32 %v7588_v8, %v2354_v24  ;;  %v5624_v8 = vor.u32 %v6858_v28, %v5623_v45  ;;  %v6927_v24 = vld [vmem:[#allocation11 + $0x254] sm:$0xf]  ;;  %v6921_v45 = vld [vmem:[#allocation11 + $0x224] sm:$0xf] }
 0x206   :  { %3804 = vmatpush.bf16.msra.mxu2 %v6172_v49  ;;  %v5863_v14 = vld [vmem:[#allocation11 + $0x1f0] sm:$0xf]  ;;  %v5672_v37 = vor.u32 %v6870_v10, %v5671_v6  ;;  %v5961_v49 = vld [vmem:[#allocation11 + $0x2c8] sm:$0xf0]  ;;  %v5748_v6 = vor.u32 %v6885_v60, %v5745_v61  ;;  %v5940_v10 = vor.u32 %v6933_v62, %v5937_v63  ;;  %v6909_v60 = vld [vmem:[#allocation11 + $0x1c4] sm:$0xf] }
 0x207   :  { %3760 = vmatmul.bf16.vlgmr.msrb.gmra.mxu2 %v7584_v13  ;;  %v5864_v18 = vor.u32 %v6918_v15, %v5863_v14  ;;  %v6950_v14 = vld [vmem:[#allocation11 + $0x30c] sm:$0xf]  ;;  %v6001_v15 = vld [vmem:[#allocation11 + $0x320] sm:$0xf0]  ;;  %v5841_v61 = vld [vmem:[#allocation11 + $0x1d8] sm:$0xf0] }
 0x208   :  { %v6004_v34 = vor.u32 %v6950_v14, %v6001_v15  ;;  %v6855_v14 = vld [vmem:[#allocation11 + $0x14] sm:$0xf] }
 0x209   :  { %3831 = vmatpush.bf16.msrb.mxu0 %v5768_v19  ;;  %3844 = vmatpush.bf16.msrb.mxu1 %v5960_v9  ;;  %v2407_v19 = vpop.f32.mrf.mxu0  ;;  %v2420_v30 = vpop.f32.mrf.mxu1  ;;  %v6912_v9 = vld [vmem:[#allocation11 + $0x1d4] sm:$0xf0] }
 0x20a   :  { %3805 = vmatpush.bf16.msra.mxu2 %v6148_v5  ;;  %v5840_v7 = vor.u32 %v6912_v9, %v5839_v54  ;;  %v7043_v54 = vld [vmem:[#allocation11 + $0x5ec] sm:$0xf0]  ;;  %v7612_v30 = vld [vmem:[#allocation13] sm:$0x3f]  ;;  %v5724_v9 = vor.u32 %v6879_v17, %v5721_v16  ;;  %v5625_v17 = vld [vmem:[#allocation11 + $0x28] sm:$0xf0] }
 0x20b   :  { %v6360_v36 = vor.u32 %v7043_v54, %v6359_v50  ;;  %v2650_v33 = vperm.slane %v7612_v30, 0  ;;  %v6903_v16 = vld [vmem:[#allocation11 + $0x194] sm:$0xf]  ;;  %v5628_v50 = vor.u32 %v6855_v14, %v5625_v17  ;;  %v7022_v14 = vld [vmem:[#allocation11 + $0x54c] sm:$0xf] }
 0x20d   :  { %3832 = vmatpush.bf16.msrb.mxu0 %v5744_v55  ;;  %3845 = vmatpush.bf16.msrb.mxu1 %v5936_v31  ;;  %v2380_v55 = vadd.f32 %v7594_v22, %v2367_v11  ;;  %v6897_v31 = vld [vmem:[#allocation11 + $0x164] sm:$0xf]  ;;  %v5769_v22 = vld [vmem:[#allocation11 + $0x148] sm:$0xf0] }
 0x20e   :  { %3806 = vmatpush.bf16.msra.mxu2 %v6124_v51  ;;  %v5796_v44 = vor.u32 %v6897_v31, %v5793_v32  ;;  %v6175_v51 = vld [vmem:[#allocation11 + $0x460] sm:$0xf]  ;;  %v6335_v31 = vld [vmem:[#allocation11 + $0x5a8] sm:$0xf] }
 0x20f   :  { %v2393_v42 = vadd.f32 %v7596_v39, %v2380_v55  ;;  %v6025_v39 = vld [vmem:[#allocation11 + $0x350] sm:$0xf0]  ;;  %v6990_v55 = vld [vmem:[#allocation11 + $0x444] sm:$0xf0]  ;;  %v7037_v32 = vld [vmem:[#allocation11 + $0x5bc] sm:$0xf0] }
 0x210   :  { %v6336_v46 = vor.u32 %v7037_v32, %v6335_v31  ;;  %v6191_v32 = vld [vmem:[#allocation11 + $0x488] sm:$0xf] }
 0x211   :  { %3833 = vmatpush.bf16.msrb.mxu0 %v5720_v48  ;;  %3846 = vmatpush.bf16.msrb.mxu1 %v5912_v58  ;;  %v6891_v48 = vld [vmem:[#allocation11 + $0x134] sm:$0xf]  ;;  %v2406_v52 = vadd.f32 %v7598_v56, %v2393_v42  ;;  %v5673_v42 = vld [vmem:[#allocation11 + $0x88] sm:$0xf0] }
 0x212   :  { %3807 = vmatpush.bf16.msra.mxu2 %v6100_v25  ;;  %v6939_v58 = vld [vmem:[#allocation11 + $0x2b4] sm:$0xf]  ;;  %v5772_v21 = vor.u32 %v6891_v48, %v5769_v22  ;;  %v6984_v48 = vld [vmem:[#allocation11 + $0x414] sm:$0xf0] }
 0x213   :  { %v5964_v27 = vor.u32 %v6939_v58, %v5961_v49  ;;  %v2419_v0 = vadd.f32 %v7600_v57, %v2406_v52  ;;  %v6996_v57 = vld [vmem:[#allocation11 + $0x474] sm:$0xf0]  ;;  %v7031_v58 = vld [vmem:[#allocation11 + $0x58c] sm:$0xf0] }
 0x214   :  { %v6176_v11 = vor.u32 %v6996_v57, %v6175_v51  ;;  %v6311_v22 = vld [vmem:[#allocation11 + $0x578] sm:$0xf] }
 0x215   :  { %3834 = vmatpush.bf16.msrb.mxu0 %v5696_v3  ;;  %3847 = vmatpush.bf16.msrb.mxu1 %v5888_v4  ;;  %v6028_v4 = vor.u32 %v6956_v59, %v6025_v39  ;;  %v5649_v39 = vld [vmem:[#allocation11 + $0x58] sm:$0xf0]  ;;  %v6312_v63 = vor.u32 %v7031_v58, %v6311_v22  ;;  %v6972_v51 = vld [vmem:[#allocation11 + $0x3b4] sm:$0xf0]  ;;  %v6987_v58 = vld [vmem:[#allocation11 + $0x434] sm:$0xf] }
 0x216   :  { %3808 = vmatpush.bf16.msra.mxu2 %v6076_v40  ;;  %v6152_v40 = vor.u32 %v6990_v55, %v6151_v29  ;;  %v6263_v57 = vld [vmem:[#allocation11 + $0x518] sm:$0xf] }
 0x217   :  { %v6960_v29 = vld [vmem:[#allocation11 + $0x354] sm:$0xf0] }
 0x218   :  { %v6215_v55 = vld [vmem:[#allocation11 + $0x4b8] sm:$0xf] }
 0x219   :  { %3835 = vmatpush.bf16.msrb.mxu0 %v5672_v37  ;;  %3848 = vmatpush.bf16.msrb.mxu1 %v5864_v18  ;;  %v2444_v3 = vpop.f32.mrf.mxu3  ;;  %v5913_v37 = vld [vmem:[#allocation11 + $0x268] sm:$0xf0] }
 0x21a   :  { %v2431_v56 = vpop.f32.mrf.mxu2  ;;  %3809 = vmatpush.bf16.msra.mxu2 %v6052_v53  ;;  %v5916_v20 = vor.u32 %v6927_v24, %v5913_v37  ;;  %v5817_v24 = vld [vmem:[#allocation11 + $0x1a8] sm:$0xf0] }
 0x21b   :  { %v2432_v5 = vadd.f32 %v2431_v56, %v2419_v0  ;;  %v6103_v56 = vld [vmem:[#allocation11 + $0x3d0] sm:$0xf]  ;;  %v5820_v54 = vor.u32 %v6903_v16, %v5817_v24  ;;  %v6969_v24 = vld [vmem:[#allocation11 + $0x3a4] sm:$0xf] }
 0x21d   :  { %3836 = vmatpush.bf16.msrb.mxu0 %v5648_v1  ;;  %3849 = vmatpush.bf16.msrb.mxu1 %v5840_v7  ;;  %v2445_v18 = vadd.f32 %v2444_v3, %v2432_v5  ;;  %v5697_v1 = vld [vmem:[#allocation11 + $0xb8] sm:$0xf0]  ;;  %v6978_v3 = vld [vmem:[#allocation11 + $0x3e4] sm:$0xf0]  ;;  %v7025_v5 = vld [vmem:[#allocation11 + $0x55c] sm:$0xf0] }
 0x21e   :  { %3810 = vmatpush.bf16.msra.mxu2 %v6028_v4  ;;  %v5889_v7 = vld [vmem:[#allocation11 + $0x238] sm:$0xf0]  ;;  %v5700_v2 = vor.u32 %v6873_v35, %v5697_v1  ;;  %v6287_v4 = vld [vmem:[#allocation11 + $0x548] sm:$0xf]  ;;  %v6104_v15 = vor.u32 %v6978_v3, %v6103_v56  ;;  %v6055_v35 = vld [vmem:[#allocation11 + $0x370] sm:$0xf] }
 0x21f   :  { %v2451_v19 = vmax.f32 %v2445_v18, 0.0  ;;  %v6288_v37 = vor.u32 %v7025_v5, %v6287_v4  ;;  %v6079_v18 = vld [vmem:[#allocation11 + $0x3a0] sm:$0xf]  ;;  %v6239_v1 = vld [vmem:[#allocation11 + $0x4e8] sm:$0xf] }
 0x221   :  { %3837 = vmatpush.bf16.msrb.mxu0 %v5624_v8  ;;  %3850 = vmatpush.bf16.msrb.mxu1 %v5816_v38  ;;  %v7614_v25 = vpack.c.bf16 %v2451_v19, %v2451_v19  ;;  %v3631_v28 = vpop.f32.mrf.mxu0  ;;  %v2446_v12 = vpop.f32.mrf.mxu3  ;;  %v5892_v8 = vor.u32 %v6921_v45, %v5889_v7  ;;  %v6867_v38 = vld [vmem:[#allocation11 + $0x74] sm:$0xf]  ;;  %v6080_v19 = vor.u32 %v6972_v51, %v6079_v18  ;;  %v7013_v45 = vld [vmem:[#allocation11 + $0x4fc] sm:$0xf0]  ;;  %v7016_v18 = vld [vmem:[#allocation11 + $0x51c] sm:$0xf] }
 0x222   :  { %v2433_v41 = vpop.f32.mrf.mxu2  ;;  %3811 = vmatpush.bf16.msra.mxu2 %v6004_v34  ;;  %v3632_v49 = vadd.f32 %v3631_v28, %v2650_v33  ;;  %v5676_v52 = vor.u32 %v6867_v38, %v5673_v42  ;;  %v3644_v59 = vpop.f32.mrf.mxu1  ;;  %v7019_v34 = vld [vmem:[#allocation11 + $0x52c] sm:$0xf0]  ;;  %v6240_v28 = vor.u32 %v7013_v45, %v6239_v1  ;;  %v6993_v38 = vld [vmem:[#allocation11 + $0x464] sm:$0xf]  ;;  %v2651_v42 = vperm.slane %v7612_v30, 1 }
 0x223   :  { %3669 = vmatmul.bf16.vlgmr.msrb.gmra.mxu3 %v7614_v25  ;;  %v7007_v41 = vld [vmem:[#allocation11 + $0x4cc] sm:$0xf0]  ;;  %v6265_v51 = vld [vmem:[#allocation11 + $0x530] sm:$0xf0]  ;;  %v6033_v1 = vld [vmem:[#allocation11 + $0x358] sm:$0xf0] }
 0x224   :  { %3838 = vmatmul.bf16.vlgmr.msrb.gmra.mxu0 %v7553_v26  ;;  %3851 = vmatmul.bf16.vlgmr.msrb.gmra.mxu1 %v7556_v23  ;;  %v7619_v0 = vadd.f32 %v3644_v59, %v3632_v49  ;;  %v6216_v31 = vor.u32 %v7007_v41, %v6215_v55  ;;  %v6007_v33 = vld [vmem:[#allocation11 + $0x310] sm:$0xf]  ;;  %v6153_v49 = vld [vmem:[#allocation11 + $0x448] sm:$0xf0]  ;;  %v7004_v45 = vld [vmem:[#allocation11 + $0x4bc] sm:$0xf] }
 0x225   :  { %3882 = vmatpush.bf16.msra.mxu0 %v5796_v44  ;;  %3895 = vmatpush.bf16.msra.mxu1 %v5988_v43  ;;  %v6915_v44 = vld [vmem:[#allocation11 + $0x1f4] sm:$0xf]  ;;  %v5865_v43 = vld [vmem:[#allocation11 + $0x208] sm:$0xf0]  ;;  %v6156_v59 = vor.u32 %v6987_v58, %v6153_v49 }
 0x226   :  { %3856 = vmatpush.bf16.msrb.mxu2 %v6176_v11  ;;  %3765 = vmatpush.bf16.msrb.mxu3 %v6360_v36  ;;  %v5868_v53 = vor.u32 %v6915_v44, %v5865_v43  ;;  %v6966_v11 = vld [vmem:[#allocation11 + $0x384] sm:$0xf0]  ;;  %v6031_v36 = vld [vmem:[#allocation11 + $0x340] sm:$0xf]  ;;  %v7040_v44 = vld [vmem:[#allocation11 + $0x5dc] sm:$0xf] }
 0x227   :  { %3812 = vmatmul.bf16.vlgmr.msra.gmra.mxu2 %v7584_v13  ;;  %v6056_v7 = vor.u32 %v6966_v11, %v6055_v35  ;;  %v6032_v12 = vor.u32 %v6960_v29, %v6031_v36  ;;  %v6361_v43 = vld [vmem:[#allocation11 + $0x5f0] sm:$0xf0]  ;;  %v6957_v11 = vld [vmem:[#allocation11 + $0x344] sm:$0xf]  ;;  %v6009_v55 = vld [vmem:[#allocation11 + $0x328] sm:$0xf0] }
 0x228   :  { %v6364_v22 = vor.u32 %v7040_v44, %v6361_v43  ;;  %v6951_v29 = vld [vmem:[#allocation11 + $0x314] sm:$0xf]  ;;  %v6998_v41 = vld [vmem:[#allocation11 + $0x48c] sm:$0xf]  ;;  %v6343_v43 = vld [vmem:[#allocation11 + $0x5b0] sm:$0xf] }
 0x229   :  { %3883 = vmatpush.bf16.msra.mxu0 %v5772_v21  ;;  %3896 = vmatpush.bf16.msra.mxu1 %v5964_v27  ;;  %v6861_v21 = vld [vmem:[#allocation11 + $0x44] sm:$0xf]  ;;  %v6128_v27 = vor.u32 %v6984_v48, %v6127_v47  ;;  %v3633_v62 = vpop.f32.mrf.mxu0 }
 0x22a   :  { %3857 = vmatpush.bf16.msrb.mxu2 %v6152_v40  ;;  %3766 = vmatpush.bf16.msrb.mxu3 %v6336_v46  ;;  %v6177_v40 = vld [vmem:[#allocation11 + $0x478] sm:$0xf0] }
 0x22b   :  { %v6180_v46 = vor.u32 %v6993_v38, %v6177_v40  ;;  %v7028_v62 = vld [vmem:[#allocation11 + $0x57c] sm:$0xf] }
 0x22d   :  { %3884 = vmatpush.bf16.msra.mxu0 %v5748_v6  ;;  %3897 = vmatpush.bf16.msra.mxu1 %v5940_v10  ;;  %v5652_v6 = vor.u32 %v6861_v21, %v5649_v39  ;;  %v5844_v10 = vor.u32 %v6909_v60, %v5841_v61  ;;  %v6337_v21 = vld [vmem:[#allocation11 + $0x5c0] sm:$0xf0]  ;;  %v6129_v61 = vld [vmem:[#allocation11 + $0x418] sm:$0xf0] }
 0x22e   :  { %3858 = vmatpush.bf16.msrb.mxu2 %v6128_v27  ;;  %3767 = vmatpush.bf16.msrb.mxu3 %v6312_v63  ;;  %v6981_v60 = vld [vmem:[#allocation11 + $0x404] sm:$0xf]  ;;  %v6313_v63 = vld [vmem:[#allocation11 + $0x590] sm:$0xf0] }
 0x22f   :  { %v6132_v56 = vor.u32 %v6981_v60, %v6129_v61  ;;  %v6316_v5 = vor.u32 %v7028_v62, %v6313_v63  ;;  %v6247_v62 = vld [vmem:[#allocation11 + $0x4f0] sm:$0xf]  ;;  %v7052_v63 = vld [vmem:[#allocation14 + $0x38] sm:$0xff] }
 0x231   :  { %3885 = vmatpush.bf16.msra.mxu0 %v5724_v9  ;;  %3898 = vmatpush.bf16.msra.mxu1 %v5916_v20  ;;  %v3646_v9 = vpop.f32.mrf.mxu1  ;;  %v6264_v20 = vor.u32 %v7019_v34, %v6263_v57  ;;  %v6268_v34 = vor.u32 %v7016_v18, %v6265_v51 }
 0x232   :  { %3859 = vmatpush.bf16.msrb.mxu2 %v6104_v15  ;;  %3768 = vmatpush.bf16.msrb.mxu3 %v6288_v37  ;;  %v6289_v15 = vld [vmem:[#allocation11 + $0x560] sm:$0xf0]  ;;  %v6081_v37 = vld [vmem:[#allocation11 + $0x3b8] sm:$0xf0] }
 0x233   :  { %3721 = vmatmul.bf16.vlgmr.msra.gmra.mxu3 %v7614_v25  ;;  %v6292_v16 = vor.u32 %v7022_v14, %v6289_v15  ;;  %v6084_v57 = vor.u32 %v6969_v24, %v6081_v37  ;;  %v6241_v9 = vld [vmem:[#allocation11 + $0x500] sm:$0xf0]  ;;  %v6199_v14 = vld [vmem:[#allocation11 + $0x490] sm:$0xf]  ;;  %v7002_v15 = vld [vmem:[#allocation11 + $0x4a4] sm:$0xf0] }
 0x234   :  { %v6369_v24 = vld [vmem:[#allocation11 + $0x5f8] sm:$0xf0]  ;;  %v7050_v37 = vld [vmem:[#allocation14 + $0x28] sm:$0xff]  ;;  %v6200_v18 = vor.u32 %v7002_v15, %v6199_v14  ;;  %v7053_v15 = vld [vmem:[#allocation14 + $0x40] sm:$0xff] }
 0x235   :  { %3886 = vmatpush.bf16.msra.mxu0 %v5700_v2  ;;  %3899 = vmatpush.bf16.msra.mxu1 %v5892_v8  ;;  %v6954_v2 = vld [vmem:[#allocation11 + $0x324] sm:$0xf0]  ;;  %v7001_v8 = vld [vmem:[#allocation11 + $0x49c] sm:$0xf0] }
 0x236   :  { %3860 = vmatpush.bf16.msrb.mxu2 %v6080_v19  ;;  %3769 = vmatpush.bf16.msrb.mxu3 %v6264_v20  ;;  %v7010_v19 = vld [vmem:[#allocation11 + $0x4ec] sm:$0xf] }
 0x237   :  { %v6244_v35 = vor.u32 %v7010_v19, %v6241_v9  ;;  %v6345_v19 = vld [vmem:[#allocation11 + $0x5c8] sm:$0xf0] }
 0x239   :  { %3887 = vmatpush.bf16.msra.mxu0 %v5676_v52  ;;  %3900 = vmatpush.bf16.msra.mxu1 %v5868_v53  ;;  %v7034_v53 = vld [vmem:[#allocation11 + $0x5ac] sm:$0xf] }
 0x23a   :  { %3861 = vmatpush.bf16.msrb.mxu2 %v6056_v7  ;;  %3770 = vmatpush.bf16.msrb.mxu3 %v6240_v28  ;;  %v6340_v39 = vor.u32 %v7034_v53, %v6337_v21  ;;  %v6217_v7 = vld [vmem:[#allocation11 + $0x4d0] sm:$0xf0]  ;;  %v6036_v28 = vor.u32 %v6957_v11, %v6033_v1  ;;  %v7026_v53 = vld [vmem:[#allocation11 + $0x564] sm:$0xf0]  ;;  %v7029_v1 = vld [vmem:[#allocation11 + $0x584] sm:$0xf] }
 0x23b   :  { %v6220_v36 = vor.u32 %v7004_v45, %v6217_v7  ;;  %v6321_v45 = vld [vmem:[#allocation11 + $0x598] sm:$0xf0] }
 0x23c   :  { %v7048_v7 = vld [vmem:[#allocation14 + $0x18] sm:$0xff] }
 0x23d   :  { %3888 = vmatpush.bf16.msra.mxu0 %v5652_v6  ;;  %3901 = vmatpush.bf16.msra.mxu1 %v5844_v10  ;;  %v6975_v6 = vld [vmem:[#allocation11 + $0x3d4] sm:$0xf]  ;;  %v6105_v10 = vld [vmem:[#allocation11 + $0x3e8] sm:$0xf0] }
 0x23e   :  { %3862 = vmatpush.bf16.msrb.mxu2 %v6032_v12  ;;  %3771 = vmatpush.bf16.msrb.mxu3 %v6216_v31  ;;  %v6108_v17 = vor.u32 %v6975_v6, %v6105_v10  ;;  %v6193_v12 = vld [vmem:[#allocation11 + $0x4a0] sm:$0xf0]  ;;  %v2652_v31 = vperm.slane %v7612_v30, 2  ;;  %v7051_v6 = vld [vmem:[#allocation14 + $0x30] sm:$0xff] }
 0x241   :  { %3889 = vmatpush.bf16.msra.mxu0 %v5628_v50  ;;  %3902 = vmatpush.bf16.msra.mxu1 %v5820_v54  ;;  %v3683_v47 = vpop.f32.mrf.mxu0  ;;  %v3696_v48 = vpop.f32.mrf.mxu1  ;;  %v6963_v50 = vld [vmem:[#allocation11 + $0x374] sm:$0xf]  ;;  %v6057_v54 = vld [vmem:[#allocation11 + $0x388] sm:$0xf0] }
 0x242   :  { %v3684_v52 = vadd.f32 %v3683_v47, %v2651_v42  ;;  %v6060_v20 = vor.u32 %v6963_v50, %v6057_v54  ;;  %v6319_v47 = vld [vmem:[#allocation11 + $0x580] sm:$0xf]  ;;  %v7035_v54 = vld [vmem:[#allocation11 + $0x5b4] sm:$0xf] }
 0x243   :  { %v6348_v11 = vor.u32 %v7035_v54, %v6345_v19 }
 0x244   :  { %3890 = vmatmul.bf16.vlgmr.msra.gmra.mxu0 %v7553_v26  ;;  %3903 = vmatmul.bf16.vlgmr.msra.gmra.mxu1 %v7556_v23  ;;  %v6008_v26 = vor.u32 %v6954_v2, %v6007_v33  ;;  %v6192_v23 = vor.u32 %v7001_v8, %v6191_v32  ;;  %v7625_v27 = vadd.f32 %v3696_v48, %v3684_v52  ;;  %v6367_v32 = vld [vmem:[#allocation11 + $0x5e0] sm:$0xf]  ;;  %v7044_v33 = vld [vmem:[#allocation11 + $0x5f4] sm:$0xf0]  ;;  %v6295_v52 = vld [vmem:[#allocation11 + $0x550] sm:$0xf] }
 0x245   :  { %v6012_v2 = vor.u32 %v6951_v29, %v6009_v55  ;;  %v6196_v8 = vor.u32 %v6998_v41, %v6193_v12  ;;  %v6368_v42 = vor.u32 %v7044_v33, %v6367_v32  ;;  %v7032_v48 = vld [vmem:[#allocation11 + $0x594] sm:$0xf0]  ;;  %v6296_v21 = vor.u32 %v7026_v53, %v6295_v52  ;;  %4334 = vmatpush.bf16.msrb.mxu0 %v7052_v63  ;;  %v7023_v12 = vld [vmem:[#allocation11 + $0x554] sm:$0xf]  ;;  %v7056_v52 = vld [vmem:[#allocation14 + $0x58] sm:$0xff] }
 0x246   :  { %3863 = vmatpush.bf16.msrb.mxu2 %v6008_v26  ;;  %3772 = vmatpush.bf16.msrb.mxu3 %v6192_v23  ;;  %v7038_v26 = vld [vmem:[#allocation11 + $0x5c4] sm:$0xf0]  ;;  %v6320_v49 = vor.u32 %v7032_v48, %v6319_v47  ;;  %v6324_v55 = vor.u32 %v7029_v1, %v6321_v45  ;;  %v7047_v41 = vld [vmem:[#allocation14 + $0x10] sm:$0xff]  ;;  %v7068_v53 = vld [vmem:[#allocation14 + $0xb8] sm:$0xff] }
 0x247   :  { %v7059_v32 = vld [vmem:[#allocation14 + $0x70] sm:$0xff]  ;;  %v7057_v47 = vld [vmem:[#allocation14 + $0x60] sm:$0xff] }
 0x248   :  { %v7075_v1 = vld [vmem:[#allocation14 + $0xf0] sm:$0xff] }
 0x249   :  { %3864 = vmatmul.bf16.vlgmr.msrb.gmra.mxu2 %v7584_v13  ;;  %3773 = vmatmul.bf16.vlgmr.msrb.gmra.mxu3 %v7614_v25  ;;  %v3685_v3 = vpop.f32.mrf.mxu0  ;;  %v3698_v4 = vpop.f32.mrf.mxu1 }
 0x24a   :  { %3908 = vmatpush.bf16.msra.mxu2 %v6180_v46  ;;  %3817 = vmatpush.bf16.msra.mxu3 %v6364_v22  ;;  %v6344_v46 = vor.u32 %v7038_v26, %v6343_v43  ;;  %v6223_v3 = vld [vmem:[#allocation11 + $0x4c0] sm:$0xf]  ;;  %v7008_v4 = vld [vmem:[#allocation11 + $0x4d4] sm:$0xf0]  ;;  %v7011_v43 = vld [vmem:[#allocation11 + $0x4f4] sm:$0xf] }
 0x24b   :  { %v6224_v10 = vor.u32 %v7008_v4, %v6223_v3  ;;  %4335 = vmatpush.bf16.msrb.mxu0 %v7051_v6  ;;  %v6249_v26 = vld [vmem:[#allocation11 + $0x508] sm:$0xf0] }
 0x24c   :  { %v7054_v6 = vld [vmem:[#allocation14 + $0x48] sm:$0xff] }
 0x24e   :  { %3909 = vmatpush.bf16.msra.mxu2 %v6156_v59  ;;  %3818 = vmatpush.bf16.msra.mxu3 %v6340_v39  ;;  %v6271_v59 = vld [vmem:[#allocation11 + $0x520] sm:$0xf]  ;;  %v7020_v39 = vld [vmem:[#allocation11 + $0x534] sm:$0xf0] }
 0x24f   :  { %v6272_v61 = vor.u32 %v7020_v39, %v6271_v59  ;;  %4336 = vmatpush.bf16.msrb.mxu0 %v7050_v37  ;;  %v6999_v59 = vld [vmem:[#allocation11 + $0x494] sm:$0xf]  ;;  %v6201_v39 = vld [vmem:[#allocation11 + $0x4a8] sm:$0xf0]  ;;  %v7064_v37 = vld [vmem:[#allocation14 + $0x98] sm:$0xff] }
 0x252   :  { %3910 = vmatpush.bf16.msra.mxu2 %v6132_v56  ;;  %3819 = vmatpush.bf16.msra.mxu3 %v6316_v5 }
 0x256   :  { %3911 = vmatpush.bf16.msra.mxu2 %v6108_v17  ;;  %3820 = vmatpush.bf16.msra.mxu3 %v6292_v16  ;;  %v2653_v17 = vperm.slane %v7612_v30, 3  ;;  %v7041_v16 = vld [vmem:[#allocation11 + $0x5e4] sm:$0xf] }
 0x25a   :  { %3912 = vmatpush.bf16.msra.mxu2 %v6084_v57  ;;  %3821 = vmatpush.bf16.msra.mxu3 %v6268_v34  ;;  %v6372_v34 = vor.u32 %v7041_v16, %v6369_v24 }
 0x25e   :  { %3913 = vmatpush.bf16.msra.mxu2 %v6060_v20  ;;  %3822 = vmatpush.bf16.msra.mxu3 %v6244_v35  ;;  %v7049_v20 = vld [vmem:[#allocation14 + $0x20] sm:$0xff] }
 0x25f   :  { %4337 = vmatpush.bf16.msrb.mxu0 %v7049_v20  ;;  %v7061_v20 = vld [vmem:[#allocation14 + $0x80] sm:$0xff] }
 0x261   :  { %v3735_v38 = vpop.f32.mrf.mxu0  ;;  %v3748_v40 = vpop.f32.mrf.mxu1 }
 0x262   :  { %3914 = vmatpush.bf16.msra.mxu2 %v6036_v28  ;;  %3823 = vmatpush.bf16.msra.mxu3 %v6220_v36  ;;  %v3736_v44 = vadd.f32 %v3735_v38, %v2652_v31  ;;  %v7060_v28 = vld [vmem:[#allocation14 + $0x78] sm:$0xff]  ;;  %v6297_v31 = vld [vmem:[#allocation11 + $0x568] sm:$0xf0] }
 0x263   :  { %4338 = vmatpush.bf16.msrb.mxu0 %v7048_v7  ;;  %4347 = vmatpush.bf16.msrb.mxu1 %v7060_v28  ;;  %v6273_v38 = vld [vmem:[#allocation11 + $0x538] sm:$0xf0]  ;;  %v2655_v28 = vperm.slane %v7612_v30, 5 }
 0x264   :  { %v7630_v23 = vadd.f32 %v3748_v40, %v3736_v44  ;;  %v7046_v40 = vld [vmem:[#allocation14 + $0x8] sm:$0xff] }
 0x266   :  { %3915 = vmatpush.bf16.msra.mxu2 %v6012_v2  ;;  %3824 = vmatpush.bf16.msra.mxu3 %v6196_v8  ;;  %v7634_v60 = vpop.f32.mrf.mxu2  ;;  %v6300_v2 = vor.u32 %v7023_v12, %v6297_v31  ;;  %v7017_v8 = vld [vmem:[#allocation11 + $0x524] sm:$0xf] }
 0x267   :  { %4339 = vmatpush.bf16.msrb.mxu0 %v7047_v41  ;;  %4348 = vmatpush.bf16.msrb.mxu1 %v7059_v32  ;;  %v6276_v44 = vor.u32 %v7017_v8, %v6273_v38 }
 0x269   :  { %3916 = vmatmul.bf16.vlgmr.msra.gmra.mxu2 %v7584_v13  ;;  %3825 = vmatmul.bf16.vlgmr.msra.gmra.mxu3 %v7614_v25  ;;  %v3737_v22 = vpop.f32.mrf.mxu0  ;;  %v3750_v58 = vpop.f32.mrf.mxu1  ;;  %v7014_v13 = vld [vmem:[#allocation11 + $0x504] sm:$0xf0] }
 0x26a   :  { %3869 = vmatpush.bf16.msrb.mxu3 %v6368_v42  ;;  %v6248_v56 = vor.u32 %v7014_v13, %v6247_v62  ;;  %v7058_v42 = vld [vmem:[#allocation14 + $0x68] sm:$0xff]  ;;  %v6252_v22 = vor.u32 %v7011_v43, %v6249_v26  ;;  %v7005_v58 = vld [vmem:[#allocation11 + $0x4c4] sm:$0xf]  ;;  %4360 = vmatpush.bf16.msrb.mxu2 %v7068_v53  ;;  %v7055_v62 = vld [vmem:[#allocation14 + $0x50] sm:$0xff] }
 0x26b   :  { %4340 = vmatpush.bf16.msrb.mxu0 %v7046_v40  ;;  %4349 = vmatpush.bf16.msrb.mxu1 %v7058_v42  ;;  %v7067_v13 = vld [vmem:[#allocation14 + $0xb0] sm:$0xff]  ;;  %v7069_v43 = vld [vmem:[#allocation14 + $0xc0] sm:$0xff] }
 0x26c   :  { %v7071_v40 = vld [vmem:[#allocation14 + $0xd0] sm:$0xff] }
 0x26e   :  { %3870 = vmatpush.bf16.msrb.mxu3 %v6344_v46  ;;  %v3659_v5 = vpop.f32.mrf.mxu2  ;;  %v7045_v46 = vld [vmem:[#allocation14] sm:$0xff]  ;;  %4361 = vmatpush.bf16.msrb.mxu2 %v7067_v13 }
 0x26f   :  { %4341 = vmatpush.bf16.msrb.mxu0 %v7045_v46  ;;  %4350 = vmatpush.bf16.msrb.mxu1 %v7057_v47  ;;  %v7084_v46 = vld [vmem:[#allocation14 + $0x138] sm:$0xff]  ;;  %v7077_v13 = vld [vmem:[#allocation14 + $0x100] sm:$0xff] }
 0x272   :  { %3871 = vmatpush.bf16.msrb.mxu3 %v6320_v49  ;;  %v6225_v49 = vld [vmem:[#allocation11 + $0x4d8] sm:$0xf0] }
 0x273   :  { %4351 = vmatpush.bf16.msrb.mxu1 %v7056_v52  ;;  %4386 = vmatpush.bf16.msra.mxu0 %v7084_v46  ;;  %v7082_v52 = vld [vmem:[#allocation14 + $0x128] sm:$0xff] }
 0x276   :  { %3872 = vmatpush.bf16.msrb.mxu3 %v6296_v21  ;;  %v7637_v9 = vpop.f32.mrf.mxu2  ;;  %v6228_v21 = vor.u32 %v7005_v58, %v6225_v49  ;;  %v7083_v58 = vld [vmem:[#allocation14 + $0x130] sm:$0xff] }
 0x277   :  { %4352 = vmatpush.bf16.msrb.mxu1 %v7055_v62  ;;  %v3710_v41 = vadd.f32 %v7637_v9, %v7625_v27  ;;  %4387 = vmatpush.bf16.msra.mxu0 %v7083_v58 }
 0x27a   :  { %3873 = vmatpush.bf16.msrb.mxu3 %v6272_v61  ;;  %v2654_v61 = vperm.slane %v7612_v30, 4 }
 0x27b   :  { %4353 = vmatpush.bf16.msrb.mxu1 %v7054_v6  ;;  %4388 = vmatpush.bf16.msra.mxu0 %v7082_v52 }
 0x27e   :  { %3874 = vmatpush.bf16.msrb.mxu3 %v6248_v56  ;;  %v3711_v33 = vpop.f32.mrf.mxu2  ;;  %v6204_v56 = vor.u32 %v6999_v59, %v6201_v39  ;;  %v7081_v59 = vld [vmem:[#allocation14 + $0x120] sm:$0xff]  ;;  %v7080_v39 = vld [vmem:[#allocation14 + $0x118] sm:$0xff] }
 0x27f   :  { %4354 = vmatpush.bf16.msrb.mxu1 %v7053_v15  ;;  %v7072_v33 = vld [vmem:[#allocation14 + $0xd8] sm:$0xff]  ;;  %4389 = vmatpush.bf16.msra.mxu0 %v7081_v59 }
 0x281   :  { %v3787_v51 = vpop.f32.mrf.mxu0  ;;  %v3800_v57 = vpop.f32.mrf.mxu1 }
 0x282   :  { %3875 = vmatpush.bf16.msrb.mxu3 %v6224_v10  ;;  %v3788_v50 = vadd.f32 %v3787_v51, %v2653_v17  ;;  %v7066_v10 = vld [vmem:[#allocation14 + $0xa8] sm:$0xff]  ;;  %v7065_v17 = vld [vmem:[#allocation14 + $0xa0] sm:$0xff]  ;;  %v3658_v51 = vadd.f32 %v7634_v60, %v7619_v0 }
 0x283   :  { %4362 = vmatpush.bf16.msrb.mxu2 %v7066_v10  ;;  %4390 = vmatpush.bf16.msra.mxu0 %v7080_v39  ;;  %v7090_v10 = vld [vmem:[#allocation14 + $0x168] sm:$0xff] }
 0x284   :  { %v7639_v35 = vadd.f32 %v3800_v57, %v3788_v50  ;;  %v7062_v57 = vld [vmem:[#allocation14 + $0x88] sm:$0xff] }
 0x286   :  { %3876 = vmatpush.bf16.msrb.mxu3 %v6200_v18  ;;  %v7063_v18 = vld [vmem:[#allocation14 + $0x90] sm:$0xff] }
 0x287   :  { %4363 = vmatpush.bf16.msrb.mxu2 %v7065_v17 }
 0x289   :  { %3877 = vmatmul.bf16.vlgmr.msrb.gmra.mxu3 %v7614_v25  ;;  %v3789_v36 = vpop.f32.mrf.mxu0  ;;  %v3802_v29 = vpop.f32.mrf.mxu1 }
 0x28a   :  { %3921 = vmatpush.bf16.msra.mxu3 %v6372_v34  ;;  %v7642_v48 = vpop.f32.mrf.mxu2  ;;  %v7074_v36 = vld [vmem:[#allocation14 + $0xe8] sm:$0xff] }
 0x28b   :  { %4364 = vmatpush.bf16.msrb.mxu2 %v7064_v37  ;;  %v3762_v27 = vadd.f32 %v7642_v48, %v7630_v23  ;;  %v7079_v23 = vld [vmem:[#allocation14 + $0x110] sm:$0xff]  ;;  %v7078_v48 = vld [vmem:[#allocation14 + $0x108] sm:$0xff] }
 0x28c   :  { %4391 = vmatpush.bf16.msra.mxu0 %v7079_v23  ;;  %v7086_v37 = vld [vmem:[#allocation14 + $0x148] sm:$0xff] }
 0x28e   :  { %3922 = vmatpush.bf16.msra.mxu3 %v6348_v11  ;;  %v7076_v11 = vld [vmem:[#allocation14 + $0xf8] sm:$0xff] }
 0x28f   :  { %4365 = vmatpush.bf16.msrb.mxu2 %v7063_v18 }
 0x290   :  { %4392 = vmatpush.bf16.msra.mxu0 %v7078_v48 }
 0x292   :  { %3923 = vmatpush.bf16.msra.mxu3 %v6324_v55  ;;  %v3763_v63 = vpop.f32.mrf.mxu2  ;;  %v7073_v55 = vld [vmem:[#allocation14 + $0xe0] sm:$0xff] }
 0x293   :  { %4366 = vmatpush.bf16.msrb.mxu2 %v7062_v57 }
 0x294   :  { %4393 = vmatpush.bf16.msra.mxu0 %v7077_v13 }
 0x296   :  { %3924 = vmatpush.bf16.msra.mxu3 %v6300_v2 }
 0x297   :  { %4367 = vmatpush.bf16.msrb.mxu2 %v7061_v20 }
 0x29a   :  { %3925 = vmatpush.bf16.msra.mxu3 %v6276_v44  ;;  %v7070_v44 = vld [vmem:[#allocation14 + $0xc8] sm:$0xff] }
 0x29e   :  { %3926 = vmatpush.bf16.msra.mxu3 %v6252_v22 }
 0x2a1   :  { %v3839_v3 = vpop.f32.mrf.mxu0  ;;  %v3852_v5 = vpop.f32.mrf.mxu1 }
 0x2a2   :  { %3927 = vmatpush.bf16.msra.mxu3 %v6228_v21  ;;  %v3840_v4 = vadd.f32 %v3839_v3, %v2654_v61 }
 0x2a4   :  { %v7645_v14 = vadd.f32 %v3852_v5, %v3840_v4  ;;  %v7091_v5 = vld [vmem:[#allocation14 + $0x170] sm:$0xff] }
 0x2a6   :  { %3928 = vmatpush.bf16.msra.mxu3 %v6204_v56  ;;  %v3670_v34 = vpop.f32.mrf.mxu3  ;;  %v7092_v56 = vld [vmem:[#allocation14 + $0x178] sm:$0xff] }
 0x2a7   :  { %v3671_v50 = vadd.f32 %v3670_v34, %v3658_v51  ;;  %4399 = vmatpush.bf16.msra.mxu1 %v7092_v56  ;;  %v7085_v51 = vld [vmem:[#allocation14 + $0x140] sm:$0xff] }
 0x2a9   :  { %3929 = vmatmul.bf16.vlgmr.msra.gmra.mxu3 %v7614_v25  ;;  %v3841_v16 = vpop.f32.mrf.mxu0  ;;  %v3854_v24 = vpop.f32.mrf.mxu1  ;;  %v3934_v19 = vmax.f32 %v3671_v50, 0.0 }
 0x2aa   :  { %v3813_v54 = vpop.f32.mrf.mxu2  ;;  %4373 = vmatpush.bf16.msrb.mxu3 %v7076_v11  ;;  %v7089_v16 = vld [vmem:[#allocation14 + $0x160] sm:$0xff]  ;;  %v7088_v24 = vld [vmem:[#allocation14 + $0x158] sm:$0xff] }
 0x2ab   :  { %v3940_v25 = vpack.c.bf16 %v3934_v19, %v3934_v19  ;;  %v3814_v61 = vadd.f32 %v3813_v54, %v7639_v35  ;;  %4400 = vmatpush.bf16.msra.mxu1 %v7091_v5  ;;  %v7087_v35 = vld [vmem:[#allocation14 + $0x150] sm:$0xff] }
 0x2ad   :  { %4342 = vmatmul.bf16.vlgmr.msrb.gmra.mxu0 %v3940_v25 }
 0x2ae   :  { %v3672_v45 = vpop.f32.mrf.mxu3  ;;  %4374 = vmatpush.bf16.msrb.mxu3 %v7075_v1 }
 0x2af   :  { %4401 = vmatpush.bf16.msra.mxu1 %v7090_v10 }
 0x2b2   :  { %v3815_v7 = vpop.f32.mrf.mxu2  ;;  %4375 = vmatpush.bf16.msrb.mxu3 %v7074_v36 }
 0x2b3   :  { %4402 = vmatpush.bf16.msra.mxu1 %v7089_v16 }
 0x2b6   :  { %v3722_v31 = vpop.f32.mrf.mxu3  ;;  %4376 = vmatpush.bf16.msrb.mxu3 %v7073_v55 }
 0x2b7   :  { %v3723_v32 = vadd.f32 %v3722_v31, %v3710_v41  ;;  %4403 = vmatpush.bf16.msra.mxu1 %v7088_v24 }
 0x2b9   :  { %v3935_v2 = vmax.f32 %v3723_v32, 0.0 }
 0x2ba   :  { %4377 = vmatpush.bf16.msrb.mxu3 %v7072_v33 }
 0x2bb   :  { %v3941_v30 = vpack.c.bf16 %v3935_v2, %v3935_v2  ;;  %4404 = vmatpush.bf16.msra.mxu1 %v7087_v35 }
 0x2bd   :  { %4355 = vmatmul.bf16.vlgmr.msrb.gmra.mxu1 %v3941_v30 }
 0x2be   :  { %v3724_v42 = vpop.f32.mrf.mxu3  ;;  %4378 = vmatpush.bf16.msrb.mxu3 %v7071_v40 }
 0x2bf   :  { %4405 = vmatpush.bf16.msra.mxu1 %v7086_v37 }
 0x2c1   :  { %v3891_v0 = vpop.f32.mrf.mxu0  ;;  %v3904_v60 = vpop.f32.mrf.mxu1 }
 0x2c2   :  { %v3892_v29 = vadd.f32 %v3891_v0, %v2655_v28  ;;  %4379 = vmatpush.bf16.msrb.mxu3 %v7070_v44 }
 0x2c3   :  { %4406 = vmatpush.bf16.msra.mxu1 %v7085_v51 }
 0x2c4   :  { %v7653_v12 = vadd.f32 %v3904_v60, %v3892_v29 }
 0x2c6   :  { %4380 = vmatpush.bf16.msrb.mxu3 %v7069_v43 }
 0x2c9   :  { %v3893_v8 = vpop.f32.mrf.mxu0  ;;  %v3906_v38 = vpop.f32.mrf.mxu1 }
 0x2cc   :  { %v3865_v9 = vpop.f32.mrf.mxu2  ;;  %v3774_v26 = vpop.f32.mrf.mxu3 }
 0x2cd   :  { %v3775_v47 = vadd.f32 %v3774_v26, %v3762_v27  ;;  %v3866_v18 = vadd.f32 %v3865_v9, %v7645_v14  ;;  %v7112_v14 = vld [vmem:[%s7674_s8] ss:$0 sm:$0xff]  ;;  %v7358_v27 = vmov 8   ;;  %s7359_s8 = smov [#allocation16]  }
 0x2ce   :  { %7111 = vset.pattern.permute.xlu0 %v7358_v27  ;;  %s4429_s28 = sshll.u32 %s7359_s8, 4  ;;  %s4430_s28 = int_to_ptr.vmem [resolvable:$true] %s4429_s28 }
 0x2cf   :  { %v3936_v22 = vmax.f32 %v3775_v47, 0.0 }
 0x2d1   :  { %v3942_v49 = vpack.c.bf16 %v3936_v22, %v3936_v22 }
 0x2d3   :  { %4368 = vmatmul.bf16.vlgmr.msrb.gmra.mxu2 %v3942_v49 }
 0x2d4   :  { %v3867_v53 = vpop.f32.mrf.mxu2  ;;  %v3776_v21 = vpop.f32.mrf.mxu3 }
 0x2ec   :  { %v3917_v62 = vpop.f32.mrf.mxu2  ;;  %v3826_v63 = vpop.f32.mrf.mxu3 }
 0x2ed   :  { %v3827_v3 = vadd.f32 %v3826_v63, %v3814_v61  ;;  %v3918_v20 = vadd.f32 %v3917_v62, %v7653_v12 }
 0x2ef   :  { %v3937_v4 = vmax.f32 %v3827_v3, 0.0 }
 0x2f1   :  { %v3943_v6 = vpack.c.bf16 %v3937_v4, %v3937_v4 }
 0x2f3   :  { %4381 = vmatmul.bf16.vlgmr.msrb.gmra.mxu3 %v3943_v6 }
 0x2f4   :  { %v3919_v15 = vpop.f32.mrf.mxu2  ;;  %v3828_v17 = vpop.f32.mrf.mxu3 }
 0x30c   :  { %v3878_v57 = vpop.f32.mrf.mxu3 }
 0x30d   :  { %v3879_v34 = vadd.f32 %v3878_v57, %v3866_v18 }
 0x30f   :  { %v3938_v50 = vmax.f32 %v3879_v34, 0.0 }
 0x311   :  { %v3944_v54 = vpack.c.bf16 %v3938_v50, %v3938_v50 }
 0x313   :  { %4394 = vmatmul.bf16.vlgmr.msra.gmra.mxu0 %v3944_v54 }
 0x314   :  { %v3880_v19 = vpop.f32.mrf.mxu3 }
 0x32a   :  { %v4343_v28 = vpop.f32.mrf.mxu0 }
 0x32b   :  { %v4344_v0 = vadd.f32 %v7112_v14, %v4343_v28 }
 0x32c   :  { %v3930_v11 = vpop.f32.mrf.mxu3 }
 0x32d   :  { %v3931_v25 = vadd.f32 %v3930_v11, %v3918_v20 }
 0x32f   :  { %v3939_v1 = vmax.f32 %v3931_v25, 0.0 }
 0x331   :  { %v3945_v45 = vpack.c.bf16 %v3939_v1, %v3939_v1 }
 0x332   :  { %v4345_v36 = vpop.f32.mrf.mxu0 }
 0x333   :  { %4407 = vmatmul.bf16.vlgmr.msra.gmra.mxu1 %v3945_v45 }
 0x334   :  { %v3932_v7 = vpop.f32.mrf.mxu3 }
 0x33a   :  { %v4356_v60 = vpop.f32.mrf.mxu1 }
 0x33b   :  { %v4357_v29 = vadd.f32 %v4356_v60, %v4344_v0 }
 0x342   :  { %v4358_v55 = vpop.f32.mrf.mxu1 }
 0x356   :  { %v4369_v41 = vpop.f32.mrf.mxu2 }
 0x357   :  { %v4370_v31 = vadd.f32 %v4369_v41, %v4357_v29 }
 0x35e   :  { %v4371_v32 = vpop.f32.mrf.mxu2 }
 0x376   :  { %v4382_v12 = vpop.f32.mrf.mxu3 }
 0x377   :  { %v4383_v38 = vadd.f32 %v4382_v12, %v4370_v31 }
 0x37e   :  { %v4384_v33 = vpop.f32.mrf.mxu3 }
 0x390   :  { %v4395_v2 = vpop.f32.mrf.mxu0 }
 0x391   :  { %v4396_v30 = vadd.f32 %v4395_v2, %v4383_v38 }
 0x398   :  { %v4397_v8 = vpop.f32.mrf.mxu0 }
 0x3b0   :  { %v4408_v40 = vpop.f32.mrf.mxu1 }
 0x3b1   :  { %v4409_v42 = vadd.f32 %v4408_v40, %v4396_v30 }
 0x3b3   :  { %4412 = vadd.xlane.f32.xlu0 %v4409_v42 }
 0x3b8   :  { %v4410_v44 = vpop.f32.mrf.mxu1 }
 0x426   :  { %v4413_v9 = vpop.xlane.xlu0 %4412 }
 0x427   :  { %v4414_v43 = vsub.f32 %v4413_v9, %v4409_v42 }
 0x429   :  { %v4415_v26 = vmul.f32 0.125, %v4414_v43 }
 0x42b   :  { %v4416_v46 = vsub.f32 %v4409_v42, %v4415_v26 }
 0x42d   :  { %4419 = vperm.xlu0 %7111, %v4416_v46  }
 0x49f   :  { %v4420_v47 = vpop.permute.xlu0 %4419 }
 0x4a0   :  { %v4422_v22 = vadd.f32 %v4420_v47, %v4409_v42 }
 0x4a2   :  { %4423 = vst [vmem:[#allocation16] sm:$0xff] %v4422_v22 }
 0x4a3   :  { %4434 = dma.vmem_to_hbm [thread:$0]  %s4430_s28, 128, %s4432_s10, [#allocation4]  }
 0x4a4   :  { %7340 = dma.done.wait [#allocation4], 128  }
 0x4a5   :  { %7341 = vsyncadd [#allocation4], 4294967168 }
 0x4a6   :  { %4439 = vsyncpa [#allocation3], 1 }
 0x4a7   :  { %4440 = vsyncpa [#allocation6], 1 }
 0x4a8   :  { %4441 = vsyncpa [#allocation9], 1 }
 0x4a9   :  { %4442 = vsyncpa [#allocation12], 1 }
 0x4aa   :  { %4443 = vsyncpa [#allocation15], 1 }
 0x4ab   :  { %4444 = vsyncpa [#allocation4], 1 }

</bundles_post_ra>
